<compile_context>
chip_gen: v5e
topology: v5e:2x2
jax: 0.10.0
libtpu: 0.0.40
codegen_flags: <defaults>
</compile_context>

<pallas_src>
import functools

import jax
import jax.numpy as jnp
from jax.experimental import pallas as pl
from jax.experimental.pallas import tpu as pltpu


def attention_forward(x_ncdhw, w1, b1, w2, b2):
    """x_ncdhw: (B, Cin, D, H, W) f32 -> (B, Cout, D, H, W) f32 (PyTorch semantics)."""
    B, Cin, D, H, W = x_ncdhw.shape
    Cout = w1.shape[0]
    Dp, Hp, Wp = D + 2, H + 2, W + 2          # padding=1 on each side
    P = Dp * Hp * Wp                          # flat padded spatial size
    S_d, S_h = Hp * Wp, Wp                    # strides of d / h in flat coords
    max_off = 2 * S_d + 2 * S_h + 2           # largest tap offset
    L = P - max_off                           # columns computed (covers all valid bases)
    K1 = 27 * Cin                             # im2col contraction depth

    # ---- wrapper-side packing (no transposes of the activation tensor) ----
    # Pad spatial dims only; trailing-dim reshape is metadata-only (contiguous).
    x_p = jnp.pad(x_ncdhw, ((0, 0), (0, 0), (1, 1), (1, 1), (1, 1)))
    x_flat = x_p.reshape(B, Cin, P)                                   # (B, Cin, P)

    # (Cout, Cin, 3,3,3) -> (Cout, 27*Cin) with column index t*Cin + ci, t = 9kd+3kh+kw.
    w1_mat = jnp.transpose(w1, (0, 2, 3, 4, 1)).reshape(Cout, K1)     # (8, 108): one tile
    w2_mat = w2[:, :, 0, 0, 0]                                        # (Cout, Cout)
    b1_c = b1.reshape(Cout, 1)
    b2_c = b2.reshape(Cout, 1)

    def kernel(x_ref, w1_ref, b1_ref, w2_ref, b2_ref, o_ref, col_ref):
        # x_ref : (Cin, P)        flat padded input, one batch element
        # w1_ref: (Cout, 27*Cin)  packed 3x3x3 weights
        # b1_ref: (Cout, 1)       w2_ref: (Cout, Cout)    b2_ref: (Cout, 1)
        # o_ref : (Cout, L)       flat (padded-coordinate) output columns 0..L-1
        # col_ref: (27*Cin, L)    VMEM im2col scratch
        t = 0
        for kd in range(3):
            for kh in range(3):
                for kw in range(3):
                    off = kd * S_d + kh * S_h + kw
                    # Tap = static lane-offset view of the flat padded row block.
                    col_ref[t * Cin:(t + 1) * Cin, :] = x_ref[:, off:off + L]
                    t += 1

        # Single K=108 im2col matmul on the MXU; accumulator is (8, L): lane-dense.
        acc = jnp.dot(w1_ref[...], col_ref[...],
                      preferred_element_type=jnp.float32)             # (Cout, L)
        hid = jnp.maximum(acc + b1_ref[...], 0.0)                     # bias + ReLU
        hid = jnp.dot(w2_ref[...], hid,
                      preferred_element_type=jnp.float32) + b2_ref[...]  # 1x1x1 conv
        o_ref[...] = (jax.nn.sigmoid(hid) + 1.0).astype(o_ref.dtype)  # sigmoid, +1

    out_flat = pl.pallas_call(
        kernel,
        out_shape=jax.ShapeDtypeStruct((B, Cout, L), jnp.float32),
        grid=(B,),
        in_specs=[
            pl.BlockSpec((None, Cin, P), lambda b: (b, 0, 0)),
            pl.BlockSpec((Cout, K1), lambda b: (0, 0)),
            pl.BlockSpec((Cout, 1), lambda b: (0, 0)),
            pl.BlockSpec((Cout, Cout), lambda b: (0, 0)),
            pl.BlockSpec((Cout, 1), lambda b: (0, 0)),
        ],
        out_specs=pl.BlockSpec((None, Cout, L), lambda b: (b, 0, 0)),
        scratch_shapes=[pltpu.VMEM((K1, L), jnp.float32)],
        compiler_params=pltpu.CompilerParams(
            # Batch iterations are independent -> shardable across v7x's 2 TCs.
            dimension_semantics=("parallel",)),
    )(x_flat, w1_mat, b1_c, w2_mat, b2_c)

    # Drop the interleaved padded-coordinate garbage columns.  Output is already
    # channel-major (NC + flat spatial), so this is a cheap pad/reshape/slice —
    # no transpose.
    out_full = jnp.pad(out_flat, ((0, 0), (0, 0), (0, P - L)))
    out = out_full.reshape(B, Cout, Dp, Hp, Wp)[:, :, :D, :H, :W]
    return out


def attention_reference(x, w1, b1, w2, b2):
    """Pure-JAX reference (XLA convs), NCDHW, for correctness checking."""
    dn1 = jax.lax.conv_dimension_numbers(x.shape, w1.shape,
                                         ('NCDHW', 'OIDHW', 'NCDHW'))
    y = jax.lax.conv_general_dilated(x, w1, (1, 1, 1),
                                     [(1, 1), (1, 1), (1, 1)],
                                     dimension_numbers=dn1)
    y = y + b1.reshape(1, -1, 1, 1, 1)
    y = jnp.maximum(y, 0.0)
    dn2 = jax.lax.conv_dimension_numbers(y.shape, w2.shape,
                                         ('NCDHW', 'OIDHW', 'NCDHW'))
    y = jax.lax.conv_general_dilated(y, w2, (1, 1, 1),
                                     [(0, 0), (0, 0), (0, 0)],
                                     dimension_numbers=dn2)
    y = y + b2.reshape(1, -1, 1, 1, 1)
    return jax.nn.sigmoid(y) + 1.0


if __name__ == "__main__":
    B, Cin, Cout, D, H, W = 2, 4, 8, 8, 8, 8

    key = jax.random.PRNGKey(0)
    kx, kw1, kb1, kw2, kb2 = jax.random.split(key, 5)
    x = jax.random.normal(kx, (B, Cin, D, H, W), jnp.float32)
    # Deterministic synthetic parameters (shapes per nn.Conv3d in __init__).
    w1 = jax.random.normal(kw1, (Cout, Cin, 3, 3, 3), jnp.float32) * 0.1
    b1 = jax.random.normal(kb1, (Cout,), jnp.float32) * 0.1
    w2 = jax.random.normal(kw2, (Cout, Cout, 1, 1, 1), jnp.float32) * 0.1
    b2 = jax.random.normal(kb2, (Cout,), jnp.float32) * 0.1

    out = attention_forward(x, w1, b1, w2, b2)
    jax.block_until_ready(out)

    ref = attention_reference(x, w1, b1, w2, b2)
    assert out.shape == (B, Cout, D, H, W), out.shape
    max_err = float(jnp.max(jnp.abs(out - ref)))
    assert jnp.allclose(out, ref, atol=1e-4, rtol=1e-4), max_err
    print("KERNEL_OK")
</pallas_src>

<mosaic_0001>
module attributes {stable_mosaic.version = 11 : i64} {
  func.func @kernel(%arg0: i32, %arg1: memref<1x4x1000xf32, #tpu.memory_space<vmem>>, %arg2: memref<8x108xf32, #tpu.memory_space<vmem>>, %arg3: memref<8x1xf32, #tpu.memory_space<vmem>>, %arg4: memref<8x8xf32, #tpu.memory_space<vmem>>, %arg5: memref<8x1xf32, #tpu.memory_space<vmem>>, %arg6: memref<1x8x778xf32, #tpu.memory_space<vmem>>, %arg7: memref<108x778xf32, #tpu.memory_space<vmem>>) attributes {dimension_semantics = [#tpu.dimension_semantics<parallel>], iteration_bounds = array<i64: 2>, scalar_prefetch = 0 : i64, scratch_operands = 1 : i64, tpu.core_type = #tpu.core_type<tc>, window_params = [{transform_indices = @transform_0, window_bounds = array<i64: 1, 4, 1000>}, {pipeline_mode = #tpu.pipeline_mode<synchronous>, transform_indices = @transform_1, window_bounds = array<i64: 8, 108>}, {pipeline_mode = #tpu.pipeline_mode<synchronous>, transform_indices = @transform_2, window_bounds = array<i64: 8, 1>}, {pipeline_mode = #tpu.pipeline_mode<synchronous>, transform_indices = @transform_3, window_bounds = array<i64: 8, 8>}, {pipeline_mode = #tpu.pipeline_mode<synchronous>, transform_indices = @transform_4, window_bounds = array<i64: 8, 1>}, {transform_indices = @transform_5, window_bounds = array<i64: 1, 8, 778>}]} {
    %c0 = arith.constant 0 : index
    %c0_0 = arith.constant 0 : index
    %c0_1 = arith.constant 0 : index
    %0 = vector.load %arg1[%c0, %c0_0, %c0_1] : memref<1x4x1000xf32, #tpu.memory_space<vmem>>, vector<1x4x778xf32>
    %1 = vector.shape_cast %0 : vector<1x4x778xf32> to vector<4x778xf32>
    %c0_2 = arith.constant 0 : index
    %c0_3 = arith.constant 0 : index
    %2 = vector.load %arg7[%c0_2, %c0_3] : memref<108x778xf32, #tpu.memory_space<vmem>>, vector<4x778xf32>
    tpu.vector_store %arg7[%c0_2, %c0_3], %1 {strides = array<i32>} : memref<108x778xf32, #tpu.memory_space<vmem>>, vector<4x778xf32>,
    %c0_4 = arith.constant 0 : index
    %c0_5 = arith.constant 0 : index
    %c1 = arith.constant 1 : index
    %3 = vector.load %arg1[%c0_4, %c0_5, %c1] : memref<1x4x1000xf32, #tpu.memory_space<vmem>>, vector<1x4x778xf32>
    %4 = vector.shape_cast %3 : vector<1x4x778xf32> to vector<4x778xf32>
    %c4 = arith.constant 4 : index
    %c0_6 = arith.constant 0 : index
    %5 = vector.load %arg7[%c4, %c0_6] : memref<108x778xf32, #tpu.memory_space<vmem>>, vector<4x778xf32>
    tpu.vector_store %arg7[%c4, %c0_6], %4 {strides = array<i32>} : memref<108x778xf32, #tpu.memory_space<vmem>>, vector<4x778xf32>,
    %c0_7 = arith.constant 0 : index
    %c0_8 = arith.constant 0 : index
    %c2 = arith.constant 2 : index
    %6 = vector.load %arg1[%c0_7, %c0_8, %c2] : memref<1x4x1000xf32, #tpu.memory_space<vmem>>, vector<1x4x778xf32>
    %7 = vector.shape_cast %6 : vector<1x4x778xf32> to vector<4x778xf32>
    %c8 = arith.constant 8 : index
    %c0_9 = arith.constant 0 : index
    %8 = vector.load %arg7[%c8, %c0_9] : memref<108x778xf32, #tpu.memory_space<vmem>>, vector<4x778xf32>
    tpu.vector_store %arg7[%c8, %c0_9], %7 {strides = array<i32>} : memref<108x778xf32, #tpu.memory_space<vmem>>, vector<4x778xf32>,
    %c0_10 = arith.constant 0 : index
    %c0_11 = arith.constant 0 : index
    %c10 = arith.constant 10 : index
    %9 = vector.load %arg1[%c0_10, %c0_11, %c10] : memref<1x4x1000xf32, #tpu.memory_space<vmem>>, vector<1x4x778xf32>
    %10 = vector.shape_cast %9 : vector<1x4x778xf32> to vector<4x778xf32>
    %c12 = arith.constant 12 : index
    %c0_12 = arith.constant 0 : index
    %11 = vector.load %arg7[%c12, %c0_12] : memref<108x778xf32, #tpu.memory_space<vmem>>, vector<4x778xf32>
    tpu.vector_store %arg7[%c12, %c0_12], %10 {strides = array<i32>} : memref<108x778xf32, #tpu.memory_space<vmem>>, vector<4x778xf32>,
    %c0_13 = arith.constant 0 : index
    %c0_14 = arith.constant 0 : index
    %c11 = arith.constant 11 : index
    %12 = vector.load %arg1[%c0_13, %c0_14, %c11] : memref<1x4x1000xf32, #tpu.memory_space<vmem>>, vector<1x4x778xf32>
    %13 = vector.shape_cast %12 : vector<1x4x778xf32> to vector<4x778xf32>
    %c16 = arith.constant 16 : index
    %c0_15 = arith.constant 0 : index
    %14 = vector.load %arg7[%c16, %c0_15] : memref<108x778xf32, #tpu.memory_space<vmem>>, vector<4x778xf32>
    tpu.vector_store %arg7[%c16, %c0_15], %13 {strides = array<i32>} : memref<108x778xf32, #tpu.memory_space<vmem>>, vector<4x778xf32>,
    %c0_16 = arith.constant 0 : index
    %c0_17 = arith.constant 0 : index
    %c12_18 = arith.constant 12 : index
    %15 = vector.load %arg1[%c0_16, %c0_17, %c12_18] : memref<1x4x1000xf32, #tpu.memory_space<vmem>>, vector<1x4x778xf32>
    %16 = vector.shape_cast %15 : vector<1x4x778xf32> to vector<4x778xf32>
    %c20 = arith.constant 20 : index
    %c0_19 = arith.constant 0 : index
    %17 = vector.load %arg7[%c20, %c0_19] : memref<108x778xf32, #tpu.memory_space<vmem>>, vector<4x778xf32>
    tpu.vector_store %arg7[%c20, %c0_19], %16 {strides = array<i32>} : memref<108x778xf32, #tpu.memory_space<vmem>>, vector<4x778xf32>,
    %c0_20 = arith.constant 0 : index
    %c0_21 = arith.constant 0 : index
    %c20_22 = arith.constant 20 : index
    %18 = vector.load %arg1[%c0_20, %c0_21, %c20_22] : memref<1x4x1000xf32, #tpu.memory_space<vmem>>, vector<1x4x778xf32>
    %19 = vector.shape_cast %18 : vector<1x4x778xf32> to vector<4x778xf32>
    %c24 = arith.constant 24 : index
    %c0_23 = arith.constant 0 : index
    %20 = vector.load %arg7[%c24, %c0_23] : memref<108x778xf32, #tpu.memory_space<vmem>>, vector<4x778xf32>
    tpu.vector_store %arg7[%c24, %c0_23], %19 {strides = array<i32>} : memref<108x778xf32, #tpu.memory_space<vmem>>, vector<4x778xf32>,
    %c0_24 = arith.constant 0 : index
    %c0_25 = arith.constant 0 : index
    %c21 = arith.constant 21 : index
    %21 = vector.load %arg1[%c0_24, %c0_25, %c21] : memref<1x4x1000xf32, #tpu.memory_space<vmem>>, vector<1x4x778xf32>
    %22 = vector.shape_cast %21 : vector<1x4x778xf32> to vector<4x778xf32>
    %c28 = arith.constant 28 : index
    %c0_26 = arith.constant 0 : index
    %23 = vector.load %arg7[%c28, %c0_26] : memref<108x778xf32, #tpu.memory_space<vmem>>, vector<4x778xf32>
    tpu.vector_store %arg7[%c28, %c0_26], %22 {strides = array<i32>} : memref<108x778xf32, #tpu.memory_space<vmem>>, vector<4x778xf32>,
    %c0_27 = arith.constant 0 : index
    %c0_28 = arith.constant 0 : index
    %c22 = arith.constant 22 : index
    %24 = vector.load %arg1[%c0_27, %c0_28, %c22] : memref<1x4x1000xf32, #tpu.memory_space<vmem>>, vector<1x4x778xf32>
    %25 = vector.shape_cast %24 : vector<1x4x778xf32> to vector<4x778xf32>
    %c32 = arith.constant 32 : index
    %c0_29 = arith.constant 0 : index
    %26 = vector.load %arg7[%c32, %c0_29] : memref<108x778xf32, #tpu.memory_space<vmem>>, vector<4x778xf32>
    tpu.vector_store %arg7[%c32, %c0_29], %25 {strides = array<i32>} : memref<108x778xf32, #tpu.memory_space<vmem>>, vector<4x778xf32>,
    %c0_30 = arith.constant 0 : index
    %c0_31 = arith.constant 0 : index
    %c100 = arith.constant 100 : index
    %27 = vector.load %arg1[%c0_30, %c0_31, %c100] : memref<1x4x1000xf32, #tpu.memory_space<vmem>>, vector<1x4x778xf32>
    %28 = vector.shape_cast %27 : vector<1x4x778xf32> to vector<4x778xf32>
    %c36 = arith.constant 36 : index
    %c0_32 = arith.constant 0 : index
    %29 = vector.load %arg7[%c36, %c0_32] : memref<108x778xf32, #tpu.memory_space<vmem>>, vector<4x778xf32>
    tpu.vector_store %arg7[%c36, %c0_32], %28 {strides = array<i32>} : memref<108x778xf32, #tpu.memory_space<vmem>>, vector<4x778xf32>,
    %c0_33 = arith.constant 0 : index
    %c0_34 = arith.constant 0 : index
    %c101 = arith.constant 101 : index
    %30 = vector.load %arg1[%c0_33, %c0_34, %c101] : memref<1x4x1000xf32, #tpu.memory_space<vmem>>, vector<1x4x778xf32>
    %31 = vector.shape_cast %30 : vector<1x4x778xf32> to vector<4x778xf32>
    %c40 = arith.constant 40 : index
    %c0_35 = arith.constant 0 : index
    %32 = vector.load %arg7[%c40, %c0_35] : memref<108x778xf32, #tpu.memory_space<vmem>>, vector<4x778xf32>
    tpu.vector_store %arg7[%c40, %c0_35], %31 {strides = array<i32>} : memref<108x778xf32, #tpu.memory_space<vmem>>, vector<4x778xf32>,
    %c0_36 = arith.constant 0 : index
    %c0_37 = arith.constant 0 : index
    %c102 = arith.constant 102 : index
    %33 = vector.load %arg1[%c0_36, %c0_37, %c102] : memref<1x4x1000xf32, #tpu.memory_space<vmem>>, vector<1x4x778xf32>
    %34 = vector.shape_cast %33 : vector<1x4x778xf32> to vector<4x778xf32>
    %c44 = arith.constant 44 : index
    %c0_38 = arith.constant 0 : index
    %35 = vector.load %arg7[%c44, %c0_38] : memref<108x778xf32, #tpu.memory_space<vmem>>, vector<4x778xf32>
    tpu.vector_store %arg7[%c44, %c0_38], %34 {strides = array<i32>} : memref<108x778xf32, #tpu.memory_space<vmem>>, vector<4x778xf32>,
    %c0_39 = arith.constant 0 : index
    %c0_40 = arith.constant 0 : index
    %c110 = arith.constant 110 : index
    %36 = vector.load %arg1[%c0_39, %c0_40, %c110] : memref<1x4x1000xf32, #tpu.memory_space<vmem>>, vector<1x4x778xf32>
    %37 = vector.shape_cast %36 : vector<1x4x778xf32> to vector<4x778xf32>
    %c48 = arith.constant 48 : index
    %c0_41 = arith.constant 0 : index
    %38 = vector.load %arg7[%c48, %c0_41] : memref<108x778xf32, #tpu.memory_space<vmem>>, vector<4x778xf32>
    tpu.vector_store %arg7[%c48, %c0_41], %37 {strides = array<i32>} : memref<108x778xf32, #tpu.memory_space<vmem>>, vector<4x778xf32>,
    %c0_42 = arith.constant 0 : index
    %c0_43 = arith.constant 0 : index
    %c111 = arith.constant 111 : index
    %39 = vector.load %arg1[%c0_42, %c0_43, %c111] : memref<1x4x1000xf32, #tpu.memory_space<vmem>>, vector<1x4x778xf32>
    %40 = vector.shape_cast %39 : vector<1x4x778xf32> to vector<4x778xf32>
    %c52 = arith.constant 52 : index
    %c0_44 = arith.constant 0 : index
    %41 = vector.load %arg7[%c52, %c0_44] : memref<108x778xf32, #tpu.memory_space<vmem>>, vector<4x778xf32>
    tpu.vector_store %arg7[%c52, %c0_44], %40 {strides = array<i32>} : memref<108x778xf32, #tpu.memory_space<vmem>>, vector<4x778xf32>,
    %c0_45 = arith.constant 0 : index
    %c0_46 = arith.constant 0 : index
    %c112 = arith.constant 112 : index
    %42 = vector.load %arg1[%c0_45, %c0_46, %c112] : memref<1x4x1000xf32, #tpu.memory_space<vmem>>, vector<1x4x778xf32>
    %43 = vector.shape_cast %42 : vector<1x4x778xf32> to vector<4x778xf32>
    %c56 = arith.constant 56 : index
    %c0_47 = arith.constant 0 : index
    %44 = vector.load %arg7[%c56, %c0_47] : memref<108x778xf32, #tpu.memory_space<vmem>>, vector<4x778xf32>
    tpu.vector_store %arg7[%c56, %c0_47], %43 {strides = array<i32>} : memref<108x778xf32, #tpu.memory_space<vmem>>, vector<4x778xf32>,
    %c0_48 = arith.constant 0 : index
    %c0_49 = arith.constant 0 : index
    %c120 = arith.constant 120 : index
    %45 = vector.load %arg1[%c0_48, %c0_49, %c120] : memref<1x4x1000xf32, #tpu.memory_space<vmem>>, vector<1x4x778xf32>
    %46 = vector.shape_cast %45 : vector<1x4x778xf32> to vector<4x778xf32>
    %c60 = arith.constant 60 : index
    %c0_50 = arith.constant 0 : index
    %47 = vector.load %arg7[%c60, %c0_50] : memref<108x778xf32, #tpu.memory_space<vmem>>, vector<4x778xf32>
    tpu.vector_store %arg7[%c60, %c0_50], %46 {strides = array<i32>} : memref<108x778xf32, #tpu.memory_space<vmem>>, vector<4x778xf32>,
    %c0_51 = arith.constant 0 : index
    %c0_52 = arith.constant 0 : index
    %c121 = arith.constant 121 : index
    %48 = vector.load %arg1[%c0_51, %c0_52, %c121] : memref<1x4x1000xf32, #tpu.memory_space<vmem>>, vector<1x4x778xf32>
    %49 = vector.shape_cast %48 : vector<1x4x778xf32> to vector<4x778xf32>
    %c64 = arith.constant 64 : index
    %c0_53 = arith.constant 0 : index
    %50 = vector.load %arg7[%c64, %c0_53] : memref<108x778xf32, #tpu.memory_space<vmem>>, vector<4x778xf32>
    tpu.vector_store %arg7[%c64, %c0_53], %49 {strides = array<i32>} : memref<108x778xf32, #tpu.memory_space<vmem>>, vector<4x778xf32>,
    %c0_54 = arith.constant 0 : index
    %c0_55 = arith.constant 0 : index
    %c122 = arith.constant 122 : index
    %51 = vector.load %arg1[%c0_54, %c0_55, %c122] : memref<1x4x1000xf32, #tpu.memory_space<vmem>>, vector<1x4x778xf32>
    %52 = vector.shape_cast %51 : vector<1x4x778xf32> to vector<4x778xf32>
    %c68 = arith.constant 68 : index
    %c0_56 = arith.constant 0 : index
    %53 = vector.load %arg7[%c68, %c0_56] : memref<108x778xf32, #tpu.memory_space<vmem>>, vector<4x778xf32>
    tpu.vector_store %arg7[%c68, %c0_56], %52 {strides = array<i32>} : memref<108x778xf32, #tpu.memory_space<vmem>>, vector<4x778xf32>,
    %c0_57 = arith.constant 0 : index
    %c0_58 = arith.constant 0 : index
    %c200 = arith.constant 200 : index
    %54 = vector.load %arg1[%c0_57, %c0_58, %c200] : memref<1x4x1000xf32, #tpu.memory_space<vmem>>, vector<1x4x778xf32>
    %55 = vector.shape_cast %54 : vector<1x4x778xf32> to vector<4x778xf32>
    %c72 = arith.constant 72 : index
    %c0_59 = arith.constant 0 : index
    %56 = vector.load %arg7[%c72, %c0_59] : memref<108x778xf32, #tpu.memory_space<vmem>>, vector<4x778xf32>
    tpu.vector_store %arg7[%c72, %c0_59], %55 {strides = array<i32>} : memref<108x778xf32, #tpu.memory_space<vmem>>, vector<4x778xf32>,
    %c0_60 = arith.constant 0 : index
    %c0_61 = arith.constant 0 : index
    %c201 = arith.constant 201 : index
    %57 = vector.load %arg1[%c0_60, %c0_61, %c201] : memref<1x4x1000xf32, #tpu.memory_space<vmem>>, vector<1x4x778xf32>
    %58 = vector.shape_cast %57 : vector<1x4x778xf32> to vector<4x778xf32>
    %c76 = arith.constant 76 : index
    %c0_62 = arith.constant 0 : index
    %59 = vector.load %arg7[%c76, %c0_62] : memref<108x778xf32, #tpu.memory_space<vmem>>, vector<4x778xf32>
    tpu.vector_store %arg7[%c76, %c0_62], %58 {strides = array<i32>} : memref<108x778xf32, #tpu.memory_space<vmem>>, vector<4x778xf32>,
    %c0_63 = arith.constant 0 : index
    %c0_64 = arith.constant 0 : index
    %c202 = arith.constant 202 : index
    %60 = vector.load %arg1[%c0_63, %c0_64, %c202] : memref<1x4x1000xf32, #tpu.memory_space<vmem>>, vector<1x4x778xf32>
    %61 = vector.shape_cast %60 : vector<1x4x778xf32> to vector<4x778xf32>
    %c80 = arith.constant 80 : index
    %c0_65 = arith.constant 0 : index
    %62 = vector.load %arg7[%c80, %c0_65] : memref<108x778xf32, #tpu.memory_space<vmem>>, vector<4x778xf32>
    tpu.vector_store %arg7[%c80, %c0_65], %61 {strides = array<i32>} : memref<108x778xf32, #tpu.memory_space<vmem>>, vector<4x778xf32>,
    %c0_66 = arith.constant 0 : index
    %c0_67 = arith.constant 0 : index
    %c210 = arith.constant 210 : index
    %63 = vector.load %arg1[%c0_66, %c0_67, %c210] : memref<1x4x1000xf32, #tpu.memory_space<vmem>>, vector<1x4x778xf32>
    %64 = vector.shape_cast %63 : vector<1x4x778xf32> to vector<4x778xf32>
    %c84 = arith.constant 84 : index
    %c0_68 = arith.constant 0 : index
    %65 = vector.load %arg7[%c84, %c0_68] : memref<108x778xf32, #tpu.memory_space<vmem>>, vector<4x778xf32>
    tpu.vector_store %arg7[%c84, %c0_68], %64 {strides = array<i32>} : memref<108x778xf32, #tpu.memory_space<vmem>>, vector<4x778xf32>,
    %c0_69 = arith.constant 0 : index
    %c0_70 = arith.constant 0 : index
    %c211 = arith.constant 211 : index
    %66 = vector.load %arg1[%c0_69, %c0_70, %c211] : memref<1x4x1000xf32, #tpu.memory_space<vmem>>, vector<1x4x778xf32>
    %67 = vector.shape_cast %66 : vector<1x4x778xf32> to vector<4x778xf32>
    %c88 = arith.constant 88 : index
    %c0_71 = arith.constant 0 : index
    %68 = vector.load %arg7[%c88, %c0_71] : memref<108x778xf32, #tpu.memory_space<vmem>>, vector<4x778xf32>
    tpu.vector_store %arg7[%c88, %c0_71], %67 {strides = array<i32>} : memref<108x778xf32, #tpu.memory_space<vmem>>, vector<4x778xf32>,
    %c0_72 = arith.constant 0 : index
    %c0_73 = arith.constant 0 : index
    %c212 = arith.constant 212 : index
    %69 = vector.load %arg1[%c0_72, %c0_73, %c212] : memref<1x4x1000xf32, #tpu.memory_space<vmem>>, vector<1x4x778xf32>
    %70 = vector.shape_cast %69 : vector<1x4x778xf32> to vector<4x778xf32>
    %c92 = arith.constant 92 : index
    %c0_74 = arith.constant 0 : index
    %71 = vector.load %arg7[%c92, %c0_74] : memref<108x778xf32, #tpu.memory_space<vmem>>, vector<4x778xf32>
    tpu.vector_store %arg7[%c92, %c0_74], %70 {strides = array<i32>} : memref<108x778xf32, #tpu.memory_space<vmem>>, vector<4x778xf32>,
    %c0_75 = arith.constant 0 : index
    %c0_76 = arith.constant 0 : index
    %c220 = arith.constant 220 : index
    %72 = vector.load %arg1[%c0_75, %c0_76, %c220] : memref<1x4x1000xf32, #tpu.memory_space<vmem>>, vector<1x4x778xf32>
    %73 = vector.shape_cast %72 : vector<1x4x778xf32> to vector<4x778xf32>
    %c96 = arith.constant 96 : index
    %c0_77 = arith.constant 0 : index
    %74 = vector.load %arg7[%c96, %c0_77] : memref<108x778xf32, #tpu.memory_space<vmem>>, vector<4x778xf32>
    tpu.vector_store %arg7[%c96, %c0_77], %73 {strides = array<i32>} : memref<108x778xf32, #tpu.memory_space<vmem>>, vector<4x778xf32>,
    %c0_78 = arith.constant 0 : index
    %c0_79 = arith.constant 0 : index
    %c221 = arith.constant 221 : index
    %75 = vector.load %arg1[%c0_78, %c0_79, %c221] : memref<1x4x1000xf32, #tpu.memory_space<vmem>>, vector<1x4x778xf32>
    %76 = vector.shape_cast %75 : vector<1x4x778xf32> to vector<4x778xf32>
    %c100_80 = arith.constant 100 : index
    %c0_81 = arith.constant 0 : index
    %77 = vector.load %arg7[%c100_80, %c0_81] : memref<108x778xf32, #tpu.memory_space<vmem>>, vector<4x778xf32>
    tpu.vector_store %arg7[%c100_80, %c0_81], %76 {strides = array<i32>} : memref<108x778xf32, #tpu.memory_space<vmem>>, vector<4x778xf32>,
    %c0_82 = arith.constant 0 : index
    %c0_83 = arith.constant 0 : index
    %c222 = arith.constant 222 : index
    %78 = vector.load %arg1[%c0_82, %c0_83, %c222] : memref<1x4x1000xf32, #tpu.memory_space<vmem>>, vector<1x4x778xf32>
    %79 = vector.shape_cast %78 : vector<1x4x778xf32> to vector<4x778xf32>
    %c104 = arith.constant 104 : index
    %c0_84 = arith.constant 0 : index
    %80 = vector.load %arg7[%c104, %c0_84] : memref<108x778xf32, #tpu.memory_space<vmem>>, vector<4x778xf32>
    tpu.vector_store %arg7[%c104, %c0_84], %79 {strides = array<i32>} : memref<108x778xf32, #tpu.memory_space<vmem>>, vector<4x778xf32>,
    %c0_85 = arith.constant 0 : index
    %c0_86 = arith.constant 0 : index
    %81 = vector.load %arg2[%c0_85, %c0_86] : memref<8x108xf32, #tpu.memory_space<vmem>>, vector<8x108xf32>
    %c0_87 = arith.constant 0 : index
    %c0_88 = arith.constant 0 : index
    %82 = vector.load %arg7[%c0_87, %c0_88] : memref<108x778xf32, #tpu.memory_space<vmem>>, vector<108x778xf32>
    %cst = arith.constant dense<0.000000e+00> : vector<8x778xf32>
    %83 = tpu.matmul %81, %82, %cst {dimension_numbers = #tpu.dot_dimension_numbers<[1], [0], [0], [1], [0, 0, 1, 1], [], []>} : vector<8x108xf32>, vector<108x778xf32>, vector<8x778xf32> -> vector<8x778xf32>
    %c0_89 = arith.constant 0 : index
    %c0_90 = arith.constant 0 : index
    %84 = vector.load %arg3[%c0_89, %c0_90] : memref<8x1xf32, #tpu.memory_space<vmem>>, vector<8x1xf32>
    %85 = vector.broadcast %84 : vector<8x1xf32> to vector<8x778xf32>
    %86 = arith.addf %83, %85 : vector<8x778xf32>
    %cst_91 = arith.constant 0.000000e+00 : f32
    %87 = vector.broadcast %cst_91 : f32 to vector<8x778xf32>
    %88 = arith.maximumf %86, %87 : vector<8x778xf32>
    %c0_92 = arith.constant 0 : index
    %c0_93 = arith.constant 0 : index
    %89 = vector.load %arg4[%c0_92, %c0_93] : memref<8x8xf32, #tpu.memory_space<vmem>>, vector<8x8xf32>
    %cst_94 = arith.constant dense<0.000000e+00> : vector<8x778xf32>
    %90 = tpu.matmul %89, %88, %cst_94 {dimension_numbers = #tpu.dot_dimension_numbers<[1], [0], [0], [1], [0, 0, 1, 1], [], []>} : vector<8x8xf32>, vector<8x778xf32>, vector<8x778xf32> -> vector<8x778xf32>
    %c0_95 = arith.constant 0 : index
    %c0_96 = arith.constant 0 : index
    %91 = vector.load %arg5[%c0_95, %c0_96] : memref<8x1xf32, #tpu.memory_space<vmem>>, vector<8x1xf32>
    %92 = vector.broadcast %91 : vector<8x1xf32> to vector<8x778xf32>
    %93 = arith.addf %90, %92 : vector<8x778xf32>
    %94 = arith.negf %93 : vector<8x778xf32>
    %95 = math.exp %94 : vector<8x778xf32>
    %cst_97 = arith.constant 1.000000e+00 : f32
    %96 = vector.broadcast %cst_97 : f32 to vector<8x778xf32>
    %97 = arith.addf %96, %95 : vector<8x778xf32>
    %98 = arith.divf %96, %97 : vector<8x778xf32>
    %cst_98 = arith.constant 1.000000e+00 : f32
    %99 = vector.broadcast %cst_98 : f32 to vector<8x778xf32>
    %100 = arith.addf %98, %99 : vector<8x778xf32>
    %c0_99 = arith.constant 0 : index
    %c0_100 = arith.constant 0 : index
    %c0_101 = arith.constant 0 : index
    %101 = vector.load %arg6[%c0_99, %c0_100, %c0_101] : memref<1x8x778xf32, #tpu.memory_space<vmem>>, vector<1x8x778xf32>
    %102 = vector.shape_cast %101 : vector<1x8x778xf32> to vector<8x778xf32>
    %103 = vector.shape_cast %100 : vector<8x778xf32> to vector<1x8x778xf32>
    tpu.vector_store %arg6[%c0_99, %c0_100, %c0_101], %103 {strides = array<i32>} : memref<1x8x778xf32, #tpu.memory_space<vmem>>, vector<1x8x778xf32>,
    return
  }
  func.func @transform_0(%arg0: i32) -> (i32, i32, i32) {
    %c0_i32 = arith.constant 0 : i32
    %c0_i32_0 = arith.constant 0 : i32
    %c0_i32_1 = arith.constant 0 : i32
    return %arg0, %c0_i32, %c0_i32_0 : i32, i32, i32
  }
  func.func @transform_1(%arg0: i32) -> (i32, i32) {
    %c0_i32 = arith.constant 0 : i32
    %c0_i32_0 = arith.constant 0 : i32
    %c0_i32_1 = arith.constant 0 : i32
    return %c0_i32, %c0_i32_0 : i32, i32
  }
  func.func @transform_2(%arg0: i32) -> (i32, i32) {
    %c0_i32 = arith.constant 0 : i32
    %c0_i32_0 = arith.constant 0 : i32
    %c0_i32_1 = arith.constant 0 : i32
    return %c0_i32, %c0_i32_0 : i32, i32
  }
  func.func @transform_3(%arg0: i32) -> (i32, i32) {
    %c0_i32 = arith.constant 0 : i32
    %c0_i32_0 = arith.constant 0 : i32
    %c0_i32_1 = arith.constant 0 : i32
    return %c0_i32, %c0_i32_0 : i32, i32
  }
  func.func @transform_4(%arg0: i32) -> (i32, i32) {
    %c0_i32 = arith.constant 0 : i32
    %c0_i32_0 = arith.constant 0 : i32
    %c0_i32_1 = arith.constant 0 : i32
    return %c0_i32, %c0_i32_0 : i32, i32
  }
  func.func @transform_5(%arg0: i32) -> (i32, i32, i32) {
    %c0_i32 = arith.constant 0 : i32
    %c0_i32_0 = arith.constant 0 : i32
    %c0_i32_1 = arith.constant 0 : i32
    return %arg0, %c0_i32, %c0_i32_0 : i32, i32, i32
  }
}

</mosaic_0001>

<bundles_post_ra>
// kernel: tpu_custom_call.1
= control target key start
LH: loop header
LB: loop body
LE: loop exit
PB: predicated region body
PF: predicated region fallthrough
CT: control target
= control target key end

     0   :  { %10 = vsyncpa [#allocation4], 0  ;;  %s4139_s0 = inlined_call_operand.hbm [shape: f32[2,4,1000], index: 0, kind: input, shape index: {}]   ;;  %s4140_s1 = inlined_call_operand.vmem [shape: f32[8,108], index: 1, kind: input, shape index: {}]   ;;  %s4141_s2 = inlined_call_operand.vmem [shape: f32[8,1], index: 2, kind: input, shape index: {}]   ;;  %s4142_s3 = inlined_call_operand.vmem [shape: f32[8,8], index: 3, kind: input, shape index: {}]   ;;  %s4143_s4 = inlined_call_operand.vmem [shape: f32[8,1], index: 4, kind: input, shape index: {}]   ;;  %s4144_s5 = inlined_call_operand.hbm [shape: f32[2,8,778], index: 5, kind: output, shape index: {}]  }
   0x1   :  { %12 = vsyncpa [#allocation4 + $0x1], 0 }
   0x2   :  { %13 = vsyncpa [#allocation5], 0 }
   0x3   :  { %15 = vsyncpa [#allocation5 + $0x1], 0  ;;  %s2750_s18 = smov 0   ;;  %s2752_s19 = smov 0  }
   0x4   :  { %s2754_s20 = smov 0   ;;  %s2756_s21 = smov 0  }
   0x5 LB: > { %s2771_s22 = sadd.s32 4294967295, %s2691_s21   ;;  %s2450_s23 = sadd.s32 4294967294, %s2691_s21   ;;  %s2691_s21 = sphi %s2756_s21, %s4286_s21   ;;  %s2687_s20 = sphi %s2754_s20, %s4285_s20   ;;  %s2683_s19 = sphi %s2752_s19, %s4284_s19   ;;  %s2679_s18 = sphi %s2750_s18, %s4283_s18  }
   0x6   : > { %s2775_s24 = sadd.s32 1, %s2691_s21   ;;  %s28_s25 = sadd.s32 1, %s2687_s20 }
   0x7   : > { %s25_s26 = ssub.s32 %s2691_s21, %s2775_s24  ;;  %p35_p0 = scmp.ne.s32.totalorder %s2687_s20, %s2683_s19 }
   0x8   : > { %p26_p1 = scmp.eq.s32.totalorder %s25_s26, 0  ;;  %p36_p2 = scmp.eq.s32.totalorder %s2691_s21, 0 }
   0x9   : > { %p41_p3 = scmp.ne.s32.totalorder %s2683_s19, %s2679_s18  ;;  %p42_p4 = scmp.eq.s32.totalorder %s2771_s22, 0 }
   0xa   : > { %s2787_s27 = scalar_select %p26_p1, %s2687_s20, %s28_s25  }
   0xb   : > { %p2789_p5 = por %p36_p2, %p35_p0  ;;  %p2793_p6 = por %p42_p4, %p41_p3 }
   0xc   : > { %p149_p7 = scmp.eq.s32.totalorder %s2771_s22, 1  ;;  %p155_p8 = scmp.eq.s32.totalorder %s2450_s23, 1 }
   0xd   : > { %p2504_p10 = scmp.lt.s32.totalorder %s2691_s21, 2  ;;  %s187_s7 = sand.u32 1, %s2687_s20  }
   0xe   : > { %p2800_p11 = por %p149_p7, %p35_p0  ;;  %p2804_p12 = por %p155_p8, %p41_p3 }
   0xf   : > { %s2489_s8 = sshll.u32 %s2691_s21, 5  ;;  %s2453_s9 = sshll.u32 %s187_s7, 5 }
  0x10   : > { %s196_s12 = scalar_lea.hbm %s4139_s0, %s2489_s8  ;;  %s191_s14 = scalar_lea.vmem [#allocation3], %s2453_s9 }
  0x11   : > { %s198_s13 = sshll.u32 %s196_s12, 4  ;;  %s200_s15 = sshll.u32 %s191_s14, 4  ;;  %s199_s13 = int_to_ptr.hbm [resolvable:$true] %s198_s13  ;;  %s201_s15 = int_to_ptr.vmem [resolvable:$true] %s200_s15 }
  0x12   : > { %p2815_p13 = pnand %p2504_p10, %p2789_p5  ;;  %p2456_p0 = scmp.ge.s32.totalorder %s2691_s21, 1 }
  0x13   : > { %p205_p1 = scmp.lt.s32.totalorder %s2691_s21, 3  ;;  %s188_s17 = scalar_lea.sflag [#allocation4], %s187_s7 }
  0x14   : > { %s2595_s23 = sshra.s32 %s199_s13, 4  ;;  %p2599_p3 = pneg %p2815_p13  ;;  %s2596_s23 = int_to_ptr.hbm [resolvable:$true] %s2595_s23 }
  0x15   : > { %s2597_s25 = scalar_lea.hbm %s2596_s23, 32  ;;  %s2602_s28 = scalar_lea.hbm %s4139_s0, 64 }
  0x16   : > { %p2598_p2 = scmp.ne.s32.totalorder %s2596_s23, %s2597_s25  ;;  %p2603_p5 = scmp.lt.s32.totalorder %s2596_s23, %s4139_s0 }
  0x17   : > { %p2604_p8 = scmp.lt.s32.totalorder %s2602_s28, %s2597_s25 }
  0x18   : > { %p2600_p4 = pnand %p2599_p3, %p2598_p2 }
  0x19   : > { %p2605_p10 = por %p2604_p8, %p2603_p5 }
  0x1a   : > { %p2601_p7 = pneg %p2600_p4 }
  0x1c   : > { %p2606_p9 = pnand %p2605_p10, %p2601_p7 }
  0x1e   : > { %2609 = shalt.err (!%p2606_p9)
}
  0x1f   : > { %2499 = dma.hbm_to_vmem [thread:$0]  (!%p2815_p13), %s199_s13, 512, %s201_s15, %s188_s17  }
  0x20   : > { %p206_p2 = pnand %p2456_p0, %p205_p1 }
  0x22   : > { %209 = sbr.rel (%p206_p2) target bundleno = 1025 (0x401), region = 40 }
  0x27   : > { %s2836_s7 = sand.u32 1, %s2683_s19  }
  0x28   : > { %s2457_s11 = sshll.u32 %s2836_s7, 5  ;;  %s212_s12 = scalar_lea.sflag [#allocation4], %s2836_s7 }
  0x29   : > { %s2840_s14 = scalar_lea.vmem [#allocation3], %s2457_s11 }
  0x2a   : > { %2670 = dma.done.wait (%p2793_p6), %s212_s12, 512  }
  0x2b   : > { %2672 = vsyncadd (%p2793_p6), %s212_s12, 4294966784  ;;  %v2847_v0 = vld [vmem:[%s2840_s14 + $0x10] sm:$0xff]  ;;  %v2850_v1 = vld [vmem:[%s2840_s14 + $0x8] sm:$0xff]  ;;  %s2693_s29 = smov 127   ;;  %s2694_s13 = smov 126   ;;  %vm317_vm0 = vcmask 1039360  }
  0x2c   : > { %v2853_v2 = vld [vmem:[%s2840_s14] sm:$0xff]  ;;  %255 = vst [vmem:[#allocation1 + $0x20] ss:$2 sm:$0xff] %v2847_v0  ;;  %v246_v3 = vld [vmem:[%s2840_s14 + $0x18] sm:$0xf]  ;;  %s2695_s15 = smov 118  }
  0x2d   : > { %253 = vst [vmem:[#allocation1 + $0x10] ss:$2 sm:$0xff] %v2850_v1  ;;  %v283_v10 = vld [vmem:[%s2840_s14 + $0x18] sm:$0xf]  ;;  %s2696_s16 = smov 117   ;;  %s2697_s17 = smov 116  }
  0x2e   : > { %251 = vst [vmem:[#allocation1] ss:$2 sm:$0xff] %v2853_v2  ;;  %v342_v18 = vld [vmem:[%s2840_s14 + $0x18] sm:$0xf]  ;;  %s2698_s23 = smov 108   ;;  %vm278_vm1 = vcmask 76800  }
  0x2f   : > { %257 = vst [vmem:[#allocation1 + $0x30] ss:$2 sm:$0xff] %v246_v3  ;;  %v399_v26 = vld [vmem:[%s2840_s14 + $0x18] sm:$0xf]  ;;  %s2699_s25 = smov 107   ;;  %s2700_s26 = smov 106  }
  0x30   : > { %v457_v43 = vld [vmem:[%s2840_s14 + $0x18] sm:$0xf]  ;;  %vm375_vm2 = vcmask 1031168   ;;  %vm4156_vm3 = vcmask 80900   ;;  %s4145_s8 = smov 28   ;;  %s2702_s28 = smov 7  }
  0x31   : > { %v514_v54 = vld [vmem:[%s2840_s14 + $0x18] sm:$0xf]  ;;  %vm433_vm4 = vcmask 965632   ;;  %s2703_s9 = smov 56   ;;  %vm490_vm5 = vcmask 957440   ;;  %s4160_s10 = smov 6  }
  0x32   : > { %s2705_s11 = smov 55   ;;  %s2706_s12 = smov 54   ;;  %vm548_vm6 = vcmask 949248   ;;  %vm4153_vm7 = vcmask 883712   ;;  %vm663_vm8 = vcmask 875520   ;;  %vm720_vm9 = vcmask 867328  }
  0x33   : > { %v262_v4 = vld.sshfl [vmem:[#allocation1 + $0x20] sm:$0xff pattern:$0x75316420]  ;;  %v263_v5 = vld.sshfl [vmem:[#allocation1 + $0x28] sm:$0xff pattern:$0x75316420] }
  0x34   : > { %293 = vst [vmem:[#allocation1 + $0x21] ss:$2 sm:$0xff] %v2847_v0  ;;  %v260_v6 = vld.sshfl [vmem:[#allocation1 + $0x10] sm:$0xff pattern:$0x75316420]  ;;  %vm4154_vm10 = vcmask 228352  }
  0x35   : > { %276 = vst [vmem:[#allocation2 + $0x20] sm:$0xf] %v262_v4  ;;  %v261_v7 = vld.sshfl [vmem:[#allocation1 + $0x18] sm:$0xff pattern:$0x75316420]  ;;  %vm1307_vm11 = vcmask 457728  }
  0x36   : > { %277 = vst [vmem:[#allocation2 + $0x28] sm:$0xf] %v263_v5  ;;  %v258_v8 = vld.sshfl [vmem:[#allocation1] sm:$0xff pattern:$0x75316420]  ;;  %vm1249_vm12 = vcmask 48128  }
  0x37   : > { %291 = vst [vmem:[#allocation1 + $0x11] ss:$2 sm:$0xff] %v2850_v1  ;;  %v259_v9 = vld.sshfl [vmem:[#allocation1 + $0x8] sm:$0xff pattern:$0x75316420]  ;;  %vm1365_vm13 = vcmask 449536  }
  0x38   : > { %274 = vst [vmem:[#allocation2 + $0x10] sm:$0xf] %v260_v6  ;;  %v2863_v11 = vld.sshfl [vmem:[#allocation1 + $0x30] sm:$0xff pattern:$0x75316420]  ;;  %vm1422_vm14 = vcmask 441344  }
  0x39   : > { %275 = vst [vmem:[#allocation2 + $0x18] sm:$0xf] %v261_v7  ;;  %v572_v4 = vld [vmem:[%s2840_s14 + $0x18] sm:$0xf]  ;;  %vm1187_vm15 = vcmask 56320  }
  0x3a   : > { %289 = vst [vmem:[#allocation1 + $0x1] ss:$2 sm:$0xff] %v2853_v2 }
  0x3b   : > { %v300_v12 = vld.sshfl [vmem:[#allocation1 + $0x20] sm:$0xff pattern:$0x75316420]  ;;  %272 = vst [vmem:[#allocation2] sm:$0xf] %v258_v8 }
  0x3c   : > { %311 = vrot.lane.b32.xlu2 %v300_v12, %s2693_s29  ;;  %273 = vst [vmem:[#allocation2 + $0x8] sm:$0xf] %v259_v9  ;;  %v301_v15 = vld.sshfl [vmem:[#allocation1 + $0x28] sm:$0xff pattern:$0x75316420] }
  0x3d   : > { %295 = vst [vmem:[#allocation1 + $0x31] ss:$2 sm:$0xff] %v283_v10 }
  0x3e   : > { %v298_v13 = vld.sshfl [vmem:[#allocation1 + $0x10] sm:$0xff pattern:$0x75316420]  ;;  %v299_v14 = vld.sshfl [vmem:[#allocation1 + $0x18] sm:$0xff pattern:$0x75316420] }
  0x3f   : > { %307 = vrot.lane.b32.xlu1 %v298_v13, %s2693_s29  ;;  %349 = vst [vmem:[#allocation1 + $0x10] ss:$2 sm:$0xff] %v2850_v1 }
  0x40   : > { %351 = vst [vmem:[#allocation1 + $0x20] ss:$2 sm:$0xff] %v2847_v0 }
  0x41   : > { %v296_v16 = vld.sshfl [vmem:[#allocation1] sm:$0xff pattern:$0x75316420]  ;;  %v297_v17 = vld.sshfl [vmem:[#allocation1 + $0x8] sm:$0xff pattern:$0x75316420] }
  0x42   : > { %303 = vrot.lane.b32.xlu0 %v296_v16, %s2693_s29  ;;  %347 = vst [vmem:[#allocation1] ss:$2 sm:$0xff] %v2853_v2 }
  0x43   : > { %279 = vst.msk [vmem:[#allocation2 + $0x30] sm:$0xf] %vm278_vm1, %v2863_v11 }
  0x44   : > { %313 = vrot.lane.b32.xlu2 %v301_v15, %s2693_s29  ;;  %v302_v19 = vld.sshfl [vmem:[#allocation1 + $0x30] sm:$0xff pattern:$0x75316420] }
  0x45   : > { %353 = vst [vmem:[#allocation1 + $0x30] ss:$2 sm:$0xff] %v342_v18 }
  0x46   : > { %v356_v20 = vld.sshfl [vmem:[#allocation1 + $0x10] sm:$0xff pattern:$0x75316420]  ;;  %v357_v21 = vld.sshfl [vmem:[#allocation1 + $0x18] sm:$0xff pattern:$0x75316420] }
  0x47   : > { %309 = vrot.lane.b32.xlu1 %v299_v14, %s2693_s29  ;;  %v358_v22 = vld.sshfl [vmem:[#allocation1 + $0x20] sm:$0xff pattern:$0x75316420]  ;;  %v359_v23 = vld.sshfl [vmem:[#allocation1 + $0x28] sm:$0xff pattern:$0x75316420] }
  0x48   : > { %407 = vst [vmem:[#allocation1 + $0x11] ss:$2 sm:$0xff] %v2850_v1 }
  0x49   : > { %v355_v24 = vld.sshfl [vmem:[#allocation1 + $0x8] sm:$0xff pattern:$0x75316420]  ;;  %v354_v25 = vld.sshfl [vmem:[#allocation1] sm:$0xff pattern:$0x75316420] }
  0x4a   : > { %305 = vrot.lane.b32.xlu0 %v297_v17, %s2693_s29  ;;  %405 = vst [vmem:[#allocation1 + $0x1] ss:$2 sm:$0xff] %v2853_v2 }
  0x4b   : > { %409 = vst [vmem:[#allocation1 + $0x21] ss:$2 sm:$0xff] %v2847_v0 }
  0x4c   : > { %363 = vrot.lane.b32.xlu2 %v355_v24, %s2694_s13  ;;  %v360_v27 = vld.sshfl [vmem:[#allocation1 + $0x30] sm:$0xff pattern:$0x75316420] }
  0x4d   : > { %411 = vst [vmem:[#allocation1 + $0x31] ss:$2 sm:$0xff] %v399_v26  ;;  %v629_v24 = vld [vmem:[%s2840_s14 + $0x18] sm:$0xf] }
  0x4f   : > { %361 = vrot.lane.b32.xlu1 %v354_v25, %s2694_s13  ;;  %v414_v28 = vld.sshfl [vmem:[#allocation1 + $0x10] sm:$0xff pattern:$0x75316420]  ;;  %v415_v29 = vld.sshfl [vmem:[#allocation1 + $0x18] sm:$0xff pattern:$0x75316420] }
  0x50   : > { %464 = vst [vmem:[#allocation1 + $0x10] ss:$2 sm:$0xff] %v2850_v1 }
  0x51   : > { %v412_v30 = vld.sshfl [vmem:[#allocation1] sm:$0xff pattern:$0x75316420]  ;;  %v413_v31 = vld.sshfl [vmem:[#allocation1 + $0x8] sm:$0xff pattern:$0x75316420] }
  0x52   : > { %315 = vrot.lane.b32.xlu0 %v302_v19, %s2693_s29  ;;  %v417_v32 = vld.sshfl [vmem:[#allocation1 + $0x28] sm:$0xff pattern:$0x75316420]  ;;  %v416_v33 = vld.sshfl [vmem:[#allocation1 + $0x20] sm:$0xff pattern:$0x75316420] }
  0x53   : > { %462 = vst [vmem:[#allocation1] ss:$2 sm:$0xff] %v2853_v2  ;;  %s2707_s29 = smov 46  }
  0x54   : > { %369 = vrot.lane.b32.xlu2 %v358_v22, %s2694_s13  ;;  %466 = vst [vmem:[#allocation1 + $0x20] ss:$2 sm:$0xff] %v2847_v0  ;;  %v418_v42 = vld.sshfl [vmem:[#allocation1 + $0x30] sm:$0xff pattern:$0x75316420] }
  0x55   : > { %468 = vst [vmem:[#allocation1 + $0x30] ss:$2 sm:$0xff] %v457_v43 }
  0x57   : > { %367 = vrot.lane.b32.xlu1 %v357_v21, %s2694_s13  ;;  %v471_v34 = vld.sshfl [vmem:[#allocation1 + $0x10] sm:$0xff pattern:$0x75316420]  ;;  %v472_v35 = vld.sshfl [vmem:[#allocation1 + $0x18] sm:$0xff pattern:$0x75316420] }
  0x58   : > { %522 = vst [vmem:[#allocation1 + $0x11] ss:$2 sm:$0xff] %v2850_v1 }
  0x5a   : > { %365 = vrot.lane.b32.xlu0 %v356_v20, %s2694_s13  ;;  %v470_v36 = vld.sshfl [vmem:[#allocation1 + $0x8] sm:$0xff pattern:$0x75316420]  ;;  %v469_v37 = vld.sshfl [vmem:[#allocation1] sm:$0xff pattern:$0x75316420] }
  0x5b   : > { %520 = vst [vmem:[#allocation1 + $0x1] ss:$2 sm:$0xff] %v2853_v2  ;;  %v474_v38 = vld.sshfl [vmem:[#allocation1 + $0x28] sm:$0xff pattern:$0x75316420] }
  0x5c   : > { %419 = vrot.lane.b32.xlu2 %v412_v30, %s2695_s15  ;;  %v473_v39 = vld.sshfl [vmem:[#allocation1 + $0x20] sm:$0xff pattern:$0x75316420]  ;;  %v475_v52 = vld.sshfl [vmem:[#allocation1 + $0x30] sm:$0xff pattern:$0x75316420] }
  0x5d   : > { %524 = vst [vmem:[#allocation1 + $0x21] ss:$2 sm:$0xff] %v2847_v0 }
  0x5e   : > { %526 = vst [vmem:[#allocation1 + $0x31] ss:$2 sm:$0xff] %v514_v54 }
  0x5f   : > { %373 = vrot.lane.b32.xlu1 %v360_v27, %s2694_s13  ;;  %v2893_v40 = vld.sshfl [vmem:[#allocation1 + $0x10] sm:$0xff pattern:$0x75316420]  ;;  %v2895_v41 = vld.sshfl [vmem:[#allocation1 + $0x18] sm:$0xff pattern:$0x75316420] }
  0x60   : > { %579 = vst [vmem:[#allocation1 + $0x10] ss:$2 sm:$0xff] %v2850_v1 }
  0x62   : > { %371 = vrot.lane.b32.xlu0 %v359_v23, %s2694_s13  ;;  %v528_v44 = vld.sshfl [vmem:[#allocation1 + $0x8] sm:$0xff pattern:$0x75316420]  ;;  %v527_v45 = vld.sshfl [vmem:[#allocation1] sm:$0xff pattern:$0x75316420] }
  0x63   : > { %577 = vst [vmem:[#allocation1] ss:$2 sm:$0xff] %v2853_v2  ;;  %s4157_s13 = smov 45  }
  0x64   : > { %425 = vrot.lane.b32.xlu2 %v415_v29, %s2695_s15  ;;  %v531_v53 = vld.sshfl [vmem:[#allocation1 + $0x20] sm:$0xff pattern:$0x75316420]  ;;  %v532_v55 = vld.sshfl [vmem:[#allocation1 + $0x28] sm:$0xff pattern:$0x75316420] }
  0x65   : > { %581 = vst [vmem:[#allocation1 + $0x20] ss:$2 sm:$0xff] %v2847_v0  ;;  %v533_v3 = vld.sshfl [vmem:[#allocation1 + $0x30] sm:$0xff pattern:$0x75316420] }
  0x66   : > { %583 = vst [vmem:[#allocation1 + $0x30] ss:$2 sm:$0xff] %v572_v4 }
  0x67   : > { %423 = vrot.lane.b32.xlu1 %v414_v28, %s2695_s15  ;;  %v2903_v46 = vld.sshfl [vmem:[#allocation1 + $0x10] sm:$0xff pattern:$0x75316420]  ;;  %v2905_v47 = vld.sshfl [vmem:[#allocation1 + $0x18] sm:$0xff pattern:$0x75316420] }
  0x68   : > { %637 = vst [vmem:[#allocation1 + $0x11] ss:$2 sm:$0xff] %v2850_v1 }
  0x6a   : > { %421 = vrot.lane.b32.xlu0 %v413_v31, %s2695_s15  ;;  %v584_v48 = vld.sshfl [vmem:[#allocation1] sm:$0xff pattern:$0x75316420]  ;;  %v2909_v49 = vld.sshfl [vmem:[#allocation1 + $0x8] sm:$0xff pattern:$0x75316420] }
  0x6b   : > { %635 = vst [vmem:[#allocation1 + $0x1] ss:$2 sm:$0xff] %v2853_v2 }
  0x6c   : > { %431 = vrot.lane.b32.xlu2 %v418_v42, %s2695_s15  ;;  %v589_v7 = vld.sshfl [vmem:[#allocation1 + $0x28] sm:$0xff pattern:$0x75316420]  ;;  %v588_v8 = vld.sshfl [vmem:[#allocation1 + $0x20] sm:$0xff pattern:$0x75316420] }
  0x6d   : > { %639 = vst [vmem:[#allocation1 + $0x21] ss:$2 sm:$0xff] %v2847_v0  ;;  %v590_v23 = vld.sshfl [vmem:[#allocation1 + $0x30] sm:$0xff pattern:$0x75316420] }
  0x6e   : > { %641 = vst [vmem:[#allocation1 + $0x31] ss:$2 sm:$0xff] %v629_v24 }
  0x6f   : > { %429 = vrot.lane.b32.xlu1 %v417_v32, %s2695_s15  ;;  %v2914_v50 = vld.sshfl [vmem:[#allocation1 + $0x10] sm:$0xff pattern:$0x75316420]  ;;  %v2916_v51 = vld.sshfl [vmem:[#allocation1 + $0x18] sm:$0xff pattern:$0x75316420] }
  0x70   : > { %694 = vst [vmem:[#allocation1 + $0x10] ss:$2 sm:$0xff] %v2850_v1 }
  0x72   : > { %427 = vrot.lane.b32.xlu0 %v416_v33, %s2695_s15  ;;  %v2922_v56 = vld.sshfl [vmem:[#allocation1 + $0x8] sm:$0xff pattern:$0x75316420]  ;;  %v2925_v57 = vld.sshfl [vmem:[#allocation1] sm:$0xff pattern:$0x75316420] }
  0x73   : > { %692 = vst [vmem:[#allocation1] ss:$2 sm:$0xff] %v2853_v2  ;;  %s4149_s15 = smov 44  }
  0x74   : > { %480 = vrot.lane.b32.xlu2 %v471_v34, %s2696_s16  ;;  %v647_v16 = vld.sshfl [vmem:[#allocation1 + $0x28] sm:$0xff pattern:$0x75316420]  ;;  %v646_v17 = vld.sshfl [vmem:[#allocation1 + $0x20] sm:$0xff pattern:$0x75316420] }
  0x75   : > { %696 = vst [vmem:[#allocation1 + $0x20] ss:$2 sm:$0xff] %v2847_v0 }
  0x77   : > { %478 = vrot.lane.b32.xlu1 %v470_v36, %s2696_s16  ;;  %v2929_v58 = vld.sshfl [vmem:[#allocation1 + $0x10] sm:$0xff pattern:$0x75316420]  ;;  %v2931_v59 = vld.sshfl [vmem:[#allocation1 + $0x18] sm:$0xff pattern:$0x75316420] }
  0x78   : > { %752 = vst [vmem:[#allocation1 + $0x11] ss:$2 sm:$0xff] %v2850_v1  ;;  %v648_v36 = vld.sshfl [vmem:[#allocation1 + $0x30] sm:$0xff pattern:$0x75316420] }
  0x7a   : > { %476 = vrot.lane.b32.xlu0 %v469_v37, %s2696_s16  ;;  %v2936_v60 = vld.sshfl [vmem:[#allocation1 + $0x8] sm:$0xff pattern:$0x75316420]  ;;  %v2938_v61 = vld.sshfl [vmem:[#allocation1] sm:$0xff pattern:$0x75316420] }
  0x7b   : > { %750 = vst [vmem:[#allocation1 + $0x1] ss:$2 sm:$0xff] %v2853_v2  ;;  %v687_v37 = vld [vmem:[%s2840_s14 + $0x18] sm:$0xf] }
  0x7c   : > { %486 = vrot.lane.b32.xlu2 %v474_v38, %s2696_s16  ;;  %698 = vst [vmem:[#allocation1 + $0x30] ss:$2 sm:$0xff] %v687_v37 }
  0x7f   : > { %484 = vrot.lane.b32.xlu1 %v473_v39, %s2696_s16  ;;  %v2942_v62 = vld.sshfl [vmem:[#allocation1 + $0x10] sm:$0xff pattern:$0x75316420]  ;;  %v2944_v63 = vld.sshfl [vmem:[#allocation1 + $0x18] sm:$0xff pattern:$0x75316420] }
  0x80   : > { %4168 = vst [vmem:[#allocation9_spill] sm:$0xff] %v2944_v63 }
  0x81   : > { %809 = vst [vmem:[#allocation1 + $0x10] ss:$2 sm:$0xff] %v2850_v1 }
  0x82   : > { %482 = vrot.lane.b32.xlu0 %v472_v35, %s2696_s16  ;;  %v2950_v5 = vld.sshfl [vmem:[#allocation1] sm:$0xff pattern:$0x75316420]  ;;  %v2952_v6 = vld.sshfl [vmem:[#allocation1 + $0x8] sm:$0xff pattern:$0x75316420] }
  0x83   : > { %807 = vst [vmem:[#allocation1] ss:$2 sm:$0xff] %v2853_v2 }
  0x84   : > { %536 = vrot.lane.b32.xlu2 %v528_v44, %s2697_s17  ;;  %v3052_v44 = vld.sshfl [vmem:[#allocation1 + $0x28] sm:$0xff pattern:$0x75316420] }
  0x87   : > { %534 = vrot.lane.b32.xlu1 %v527_v45, %s2697_s17 }
  0x88   : > { %v2956_v9 = vld.sshfl [vmem:[#allocation1 + $0x10] sm:$0xff pattern:$0x75316420]  ;;  %v2959_v10 = vld.sshfl [vmem:[#allocation1 + $0x18] sm:$0xff pattern:$0x75316420] }
  0x89   : > { %867 = vst [vmem:[#allocation1 + $0x11] ss:$2 sm:$0xff] %v2850_v1 }
  0x8a   : > { %488 = vrot.lane.b32.xlu0 %v475_v52, %s2696_s16  ;;  %v2964_v12 = vld.sshfl [vmem:[#allocation1] sm:$0xff pattern:$0x75316420]  ;;  %v2966_v13 = vld.sshfl [vmem:[#allocation1 + $0x8] sm:$0xff pattern:$0x75316420] }
  0x8b   : > { %865 = vst [vmem:[#allocation1 + $0x1] ss:$2 sm:$0xff] %v2853_v2  ;;  %s4147_s16 = smov 36  }
  0x8c   : > { %542 = vrot.lane.b32.xlu2 %v531_v53, %s2697_s17 }
  0x8f   : > { %540 = vrot.lane.b32.xlu1 %v2895_v41, %s2697_s17 }
  0x90   : > { %v2971_v14 = vld.sshfl [vmem:[#allocation1 + $0x10] sm:$0xff pattern:$0x75316420]  ;;  %v2973_v15 = vld.sshfl [vmem:[#allocation1 + $0x18] sm:$0xff pattern:$0x75316420] }
  0x91   : > { %924 = vst [vmem:[#allocation1 + $0x10] ss:$2 sm:$0xff] %v2850_v1 }
  0x92   : > { %538 = vrot.lane.b32.xlu0 %v2893_v40, %s2697_s17  ;;  %v2980_v18 = vld.sshfl [vmem:[#allocation1] sm:$0xff pattern:$0x75316420]  ;;  %v2984_v20 = vld.sshfl [vmem:[#allocation1 + $0x8] sm:$0xff pattern:$0x75316420] }
  0x93   : > { %922 = vst [vmem:[#allocation1] ss:$2 sm:$0xff] %v2853_v2  ;;  %v703_v40 = vld.sshfl [vmem:[#allocation1 + $0x20] sm:$0xff pattern:$0x75316420] }
  0x94   : > { %591 = vrot.lane.b32.xlu2 %v584_v48, %s2698_s23  ;;  %754 = vst [vmem:[#allocation1 + $0x21] ss:$2 sm:$0xff] %v2847_v0 }
  0x96   : > { %v2982_v19 = vpop.permute.xlu2 %311 }
  0x97   : > { %546 = vrot.lane.b32.xlu1 %v533_v3, %s2697_s17 }
  0x98   : > { %v2988_v21 = vld.sshfl [vmem:[#allocation1 + $0x10] sm:$0xff pattern:$0x75316420]  ;;  %v2990_v22 = vld.sshfl [vmem:[#allocation1 + $0x18] sm:$0xff pattern:$0x75316420] }
  0x99   : > { %982 = vst [vmem:[#allocation1 + $0x11] ss:$2 sm:$0xff] %v2850_v1 }
  0x9a   : > { %544 = vrot.lane.b32.xlu0 %v532_v55, %s2697_s17  ;;  %v2999_v26 = vld.sshfl [vmem:[#allocation1] sm:$0xff pattern:$0x75316420]  ;;  %v3001_v27 = vld.sshfl [vmem:[#allocation1 + $0x8] sm:$0xff pattern:$0x75316420] }
  0x9b   : > { %980 = vst [vmem:[#allocation1 + $0x1] ss:$2 sm:$0xff] %v2853_v2  ;;  %v744_v55 = vld [vmem:[%s2840_s14 + $0x18] sm:$0xf]  ;;  %s2711_s17 = smov 16  }
  0x9c   : > { %597 = vrot.lane.b32.xlu2 %v2905_v47, %s2698_s23 }
  0x9e   : > { %v2997_v25 = vpop.permute.xlu2 %313 }
  0x9f   : > { %595 = vrot.lane.b32.xlu1 %v2903_v46, %s2698_s23  ;;  %v322_v28 = vsel %vm317_vm0, %v2982_v19, %v2997_v25 }
  0xa0   : > { %335 = vst [vmem:[#allocation2 + $0x20] sm:$0xf0] %v322_v28  ;;  %v3009_v29 = vld.sshfl [vmem:[#allocation1 + $0x10] sm:$0xff pattern:$0x75316420] }
  0xa1   : > { %v3011_v30 = vld.sshfl [vmem:[#allocation1 + $0x18] sm:$0xff pattern:$0x75316420]  ;;  %v802_v28 = vld [vmem:[%s2840_s14 + $0x18] sm:$0xf] }
  0xa2   : > { %593 = vrot.lane.b32.xlu0 %v2909_v49, %s2698_s23  ;;  %1039 = vst [vmem:[#allocation1 + $0x10] ss:$2 sm:$0xff] %v2850_v1  ;;  %v3021_v32 = vld.sshfl [vmem:[#allocation1] sm:$0xff pattern:$0x75316420] }
  0xa3   : > { %v3024_v33 = vld.sshfl [vmem:[#allocation1 + $0x8] sm:$0xff pattern:$0x75316420] }
  0xa4   : > { %603 = vrot.lane.b32.xlu2 %v590_v23, %s2698_s23  ;;  %1037 = vst [vmem:[#allocation1] ss:$2 sm:$0xff] %v2853_v2 }
  0xa6   : > { %v3017_v31 = vpop.permute.xlu2 %363 }
  0xa7   : > { %601 = vrot.lane.b32.xlu1 %v589_v7, %s2698_s23 }
  0xa9   : > { %v3027_v34 = vld.sshfl [vmem:[#allocation1 + $0x10] sm:$0xff pattern:$0x75316420]  ;;  %v3029_v35 = vld.sshfl [vmem:[#allocation1 + $0x18] sm:$0xff pattern:$0x75316420] }
  0xaa   : > { %599 = vrot.lane.b32.xlu0 %v588_v8, %s2698_s23  ;;  %1097 = vst [vmem:[#allocation1 + $0x11] ss:$2 sm:$0xff] %v2850_v1  ;;  %s4152_s23 = smov 35  }
  0xab   : > { %v3040_v38 = vld.sshfl [vmem:[#allocation1] sm:$0xff pattern:$0x75316420]  ;;  %v3042_v39 = vld.sshfl [vmem:[#allocation1 + $0x8] sm:$0xff pattern:$0x75316420] }
  0xac   : > { %653 = vrot.lane.b32.xlu2 %v2914_v50, %s2699_s25  ;;  %1095 = vst [vmem:[#allocation1 + $0x1] ss:$2 sm:$0xff] %v2853_v2 }
  0xae   : > { %v3036_v11 = vpop.permute.xlu2 %369 }
  0xaf   : > { %651 = vrot.lane.b32.xlu1 %v2922_v56, %s2699_s25 }
  0xb1   : > { %v308_v41 = vpop.permute.xlu1 %307  ;;  %v3045_v42 = vld.sshfl [vmem:[#allocation1 + $0x10] sm:$0xff pattern:$0x75316420]  ;;  %v3047_v43 = vld.sshfl [vmem:[#allocation1 + $0x18] sm:$0xff pattern:$0x75316420] }
  0xb2   : > { %649 = vrot.lane.b32.xlu0 %v2925_v57, %s2699_s25  ;;  %1158 = vst [vmem:[#allocation1 + $0x10] ss:$2 sm:$0xff] %v2850_v1  ;;  %v705_v57 = vld.sshfl [vmem:[#allocation1 + $0x30] sm:$0xff pattern:$0x75316420] }
  0xb3   : > { %v3059_v47 = vld.sshfl [vmem:[#allocation1] sm:$0xff pattern:$0x75316420]  ;;  %v3061_v48 = vld.sshfl [vmem:[#allocation1 + $0x8] sm:$0xff pattern:$0x75316420] }
  0xb4   : > { %v304_v45 = vpop.permute.xlu0 %303  ;;  %659 = vrot.lane.b32.xlu2 %v647_v16, %s2699_s25  ;;  %1156 = vst [vmem:[#allocation1] ss:$2 sm:$0xff] %v2853_v2 }
  0xb5   : > { %756 = vst [vmem:[#allocation1 + $0x31] ss:$2 sm:$0xff] %v744_v55 }
  0xb6   : > { %v3056_v46 = vpop.permute.xlu2 %419 }
  0xb7   : > { %657 = vrot.lane.b32.xlu1 %v646_v17, %s2699_s25  ;;  %v3094_v17 = vld.sshfl [vmem:[#allocation1 + $0x20] sm:$0xff pattern:$0x75316420] }
  0xb8   : > { %4169 = vst [vmem:[#allocation10_spill] sm:$0xff] %v3094_v17 }
  0xb9   : > { %v310_v49 = vpop.permute.xlu1 %309  ;;  %v3064_v50 = vld.sshfl [vmem:[#allocation1 + $0x10] sm:$0xff pattern:$0x75316420]  ;;  %v3066_v52 = vld.sshfl [vmem:[#allocation1 + $0x18] sm:$0xff pattern:$0x75316420] }
  0xba   : > { %655 = vrot.lane.b32.xlu0 %v2916_v51, %s2699_s25  ;;  %v320_v53 = vsel %vm317_vm0, %v308_v41, %v310_v49  ;;  %v321_v54 = vsel %vm317_vm0, %v310_v49, %v2982_v19  ;;  %1220 = vst [vmem:[#allocation1 + $0x11] ss:$2 sm:$0xff] %v2850_v1  ;;  %v3084_v1 = vld [vmem:[%s2840_s14 + $0xc] sm:$0xff] }
  0xbb   : > { %333 = vst [vmem:[#allocation2 + $0x10] sm:$0xf0] %v320_v53  ;;  %v1163_v37 = vld.sshfl [vmem:[#allocation1] sm:$0xff pattern:$0x75316420] }
  0xbc   : > { %334 = vst [vmem:[#allocation2 + $0x18] sm:$0xf0] %v321_v54  ;;  %v306_v56 = vpop.permute.xlu0 %305  ;;  %708 = vrot.lane.b32.xlu2 %v2936_v60, %s2700_s26  ;;  %v3100_v23 = vld.sshfl [vmem:[#allocation1 + $0x30] sm:$0xff pattern:$0x75316420] }
  0xbd   : > { %v318_v3 = vsel %vm317_vm0, %v304_v45, %v306_v56  ;;  %v319_v51 = vsel %vm317_vm0, %v306_v56, %v308_v41  ;;  %4171 = vst [vmem:[#allocation12_spill] sm:$0xff] %v3100_v23  ;;  %v859_v56 = vld [vmem:[%s2840_s14 + $0x18] sm:$0xf] }
  0xbe   : > { %331 = vst [vmem:[#allocation2] sm:$0xf0] %v318_v3  ;;  %v3079_v4 = vpop.permute.xlu2 %425 }
  0xbf   : > { %332 = vst [vmem:[#allocation2 + $0x8] sm:$0xf0] %v319_v51  ;;  %706 = vrot.lane.b32.xlu1 %v2938_v61, %s2700_s26  ;;  %v3096_v61 = vld.sshfl [vmem:[#allocation1 + $0x28] sm:$0xff pattern:$0x75316420] }
  0xc0   : > { %4170 = vst [vmem:[#allocation11_spill] sm:$0xff] %v3096_v61 }
  0xc1   : > { %v362_v7 = vpop.permute.xlu1 %361  ;;  %v3086_v8 = vld.sshfl [vmem:[#allocation1 + $0x10] sm:$0xff pattern:$0x75316420]  ;;  %v3088_v60 = vld.sshfl [vmem:[#allocation1 + $0x18] sm:$0xff pattern:$0x75316420] }
  0xc2   : > { %661 = vrot.lane.b32.xlu0 %v648_v36, %s2699_s25  ;;  %v376_v16 = vsel %vm375_vm2, %v362_v7, %v3017_v31  ;;  %1281 = vst [vmem:[#allocation1 + $0x10] ss:$2 sm:$0xff] %v3084_v1  ;;  %s2713_s25 = smov 8  }
  0xc3   : > { %389 = vst [vmem:[#allocation2 + $0x38] sm:$0xf] %v376_v16 }
  0xc4   : > { %v316_v19 = vpop.permute.xlu0 %315  ;;  %714 = vrot.lane.b32.xlu2 %v703_v40, %s2700_s26  ;;  %811 = vst [vmem:[#allocation1 + $0x20] ss:$2 sm:$0xff] %v2847_v0  ;;  %v3112_v40 = vld.sshfl [vmem:[#allocation1 + $0x8] sm:$0xff pattern:$0x75316420] }
  0xc5   : > { %v323_v24 = vsel %vm317_vm0, %v2997_v25, %v316_v19  ;;  %338 = vst.msk [vmem:[#allocation2 + $0x30] sm:$0xf0] %vm4156_vm3, %v316_v19  ;;  %vm4159_vm0 = vcmask 375808  }
  0xc6   : > { %336 = vst [vmem:[#allocation2 + $0x28] sm:$0xf0] %v323_v24  ;;  %v3106_v36 = vpop.permute.xlu2 %431 }
  0xc7   : > { %712 = vrot.lane.b32.xlu1 %v2931_v59, %s2700_s26  ;;  %453 = vst.msk [vmem:[#allocation2 + $0x68] sm:$0xf0] %vm4156_vm3, %v3106_v36 }
  0xc8   : > { %813 = vst [vmem:[#allocation1 + $0x30] ss:$2 sm:$0xff] %v802_v28 }
  0xc9   : > { %v3114_v41 = vld.sshfl [vmem:[#allocation1 + $0x10] sm:$0xff pattern:$0x75316420]  ;;  %v3116_v25 = vld.sshfl [vmem:[#allocation1 + $0x18] sm:$0xff pattern:$0x75316420]  ;;  %v368_v45 = vpop.permute.xlu1 %367 }
  0xca   : > { %710 = vrot.lane.b32.xlu0 %v2929_v58, %s2700_s26  ;;  %1339 = vst [vmem:[#allocation1 + $0x11] ss:$2 sm:$0xff] %v3084_v1  ;;  %v379_v59 = vsel %vm375_vm2, %v368_v45, %v3036_v11 }
  0xcb   : > { %392 = vst [vmem:[#allocation2 + $0x50] sm:$0xf] %v379_v59  ;;  %v3123_v49 = vld.sshfl [vmem:[#allocation1 + $0x20] sm:$0xff pattern:$0x75316420] }
  0xcc   : > { %4172 = vst [vmem:[#allocation13_spill] sm:$0xff] %v3123_v49  ;;  %v366_v53 = vpop.permute.xlu0 %365  ;;  %v3125_v54 = vld.sshfl [vmem:[#allocation1 + $0x28] sm:$0xff pattern:$0x75316420]  ;;  %764 = vrot.lane.b32.xlu2 %v2950_v5, %s4145_s8 }
  0xcd   : > { %4173 = vst [vmem:[#allocation14_spill] sm:$0xff] %v3125_v54  ;;  %v377_v58 = vsel %vm375_vm2, %v3017_v31, %v366_v53  ;;  %v378_v55 = vsel %vm375_vm2, %v366_v53, %v368_v45  ;;  %v3163_v53 = vld [vmem:[%s2840_s14 + $0x4] sm:$0xff] }
  0xce   : > { %1218 = vst [vmem:[#allocation1 + $0x1] ss:$2 sm:$0xff] %v2853_v2  ;;  %v3135_v3 = vpop.permute.xlu2 %480 }
  0xcf   : > { %869 = vst [vmem:[#allocation1 + $0x21] ss:$2 sm:$0xff] %v2847_v0  ;;  %v3137_v51 = vld.sshfl [vmem:[#allocation1 + $0x30] sm:$0xff pattern:$0x75316420]  ;;  %718 = vrot.lane.b32.xlu1 %v705_v57, %s2700_s26 }
  0xd0   : > { %390 = vst [vmem:[#allocation2 + $0x40] sm:$0xf] %v377_v58  ;;  %v917_v57 = vld [vmem:[%s2840_s14 + $0x18] sm:$0xf] }
  0xd1   : > { %391 = vst [vmem:[#allocation2 + $0x48] sm:$0xf] %v378_v55  ;;  %v3140_v5 = vld.sshfl [vmem:[#allocation1 + $0x10] sm:$0xff pattern:$0x75316420]  ;;  %v374_v31 = vpop.permute.xlu1 %373 }
  0xd2   : > { %4174 = vst [vmem:[#allocation15_spill] sm:$0xff] %v3137_v51  ;;  %v3142_v2 = vld.sshfl [vmem:[#allocation1 + $0x18] sm:$0xff pattern:$0x75316420]  ;;  %716 = vrot.lane.b32.xlu0 %v3052_v44, %s2700_s26  ;;  %s4151_s26 = smov 34  }
  0xd3   : > { %871 = vst [vmem:[#allocation1 + $0x31] ss:$2 sm:$0xff] %v859_v56 }
  0xd4   : > { %1396 = vst [vmem:[#allocation1 + $0x10] ss:$2 sm:$0xff] %v3084_v1  ;;  %v372_v19 = vpop.permute.xlu0 %371  ;;  %1171 = vrot.lane.b32.xlu2 %v1163_v37, %s2702_s28 }
  0xd5   : > { %395 = vst.msk [vmem:[#allocation2 + $0x68] sm:$0xf] %vm278_vm1, %v374_v31  ;;  %v380_v24 = vsel %vm375_vm2, %v3036_v11, %v372_v19  ;;  %v381_v28 = vsel %vm375_vm2, %v372_v19, %v374_v31  ;;  %v1225_v44 = vld.sshfl [vmem:[#allocation1] sm:$0xff pattern:$0x75316420]  ;;  %vm4155_vm2 = vcmask 367616  }
  0xd6   : > { %v3148_v7 = vld.sshfl [vmem:[#allocation1 + $0x20] sm:$0xff pattern:$0x75316420]  ;;  %v3150_v16 = vld.sshfl [vmem:[#allocation1 + $0x28] sm:$0xff pattern:$0x75316420]  ;;  %v3158_v45 = vpop.permute.xlu2 %486 }
  0xd7   : > { %4175 = vst [vmem:[#allocation16_spill] sm:$0xff] %v3148_v7  ;;  %v3165_v37 = vld.sshfl [vmem:[#allocation1 + $0x8] sm:$0xff pattern:$0x75316420] }
  0xd8   : > { %4176 = vst [vmem:[#allocation17_spill] sm:$0xff] %v3150_v16 }
  0xd9   : > { %926 = vst [vmem:[#allocation1 + $0x20] ss:$2 sm:$0xff] %v2847_v0  ;;  %v424_v11 = vpop.permute.xlu1 %423 }
  0xda   : > { %393 = vst [vmem:[#allocation2 + $0x58] sm:$0xf] %v380_v24  ;;  %v3160_v59 = vld.sshfl [vmem:[#allocation1 + $0x30] sm:$0xff pattern:$0x75316420]  ;;  %766 = vrot.lane.b32.xlu0 %v2952_v6, %s4145_s8  ;;  %v436_v56 = vsel %vm433_vm4, %v424_v11, %v3079_v4  ;;  %s2715_s8 = smov 18  }
  0xdb   : > { %4177 = vst [vmem:[#allocation18_spill] sm:$0xff] %v3160_v59  ;;  %v3167_v58 = vld.sshfl [vmem:[#allocation1 + $0x10] sm:$0xff pattern:$0x75316420] }
  0xdc   : > { %394 = vst [vmem:[#allocation2 + $0x60] sm:$0xf] %v381_v28  ;;  %v3169_v55 = vld.sshfl [vmem:[#allocation1 + $0x18] sm:$0xff pattern:$0x75316420] }
  0xdd   : > { %928 = vst [vmem:[#allocation1 + $0x30] ss:$2 sm:$0xff] %v917_v57  ;;  %v422_v57 = vpop.permute.xlu0 %421  ;;  %v974_v24 = vld [vmem:[%s2840_s14 + $0x18] sm:$0xf] }
  0xde   : > { %1454 = vst [vmem:[#allocation1 + $0x11] ss:$2 sm:$0xff] %v3084_v1  ;;  %v434_v28 = vsel %vm433_vm4, %v3056_v46, %v422_v57  ;;  %v3185_v61 = vpop.permute.xlu2 %536  ;;  %v435_v16 = vsel %vm433_vm4, %v422_v57, %v424_v11  ;;  %v1032_v59 = vld [vmem:[%s2840_s14 + $0x18] sm:$0xf] }
  0xdf   : > { %1279 = vst [vmem:[#allocation1] ss:$2 sm:$0xff] %v3163_v53 }
  0xe0   : > { %v3177_v31 = vld.sshfl [vmem:[#allocation1 + $0x20] sm:$0xff pattern:$0x75316420]  ;;  %v3179_v19 = vld.sshfl [vmem:[#allocation1 + $0x28] sm:$0xff pattern:$0x75316420] }
  0xe1   : > { %4178 = vst [vmem:[#allocation19_spill] sm:$0xff] %v3177_v31 }
  0xe2   : > { %4179 = vst [vmem:[#allocation20_spill] sm:$0xff] %v3179_v19  ;;  %v430_v19 = vpop.permute.xlu1 %429 }
  0xe3   : > { %984 = vst [vmem:[#allocation1 + $0x21] ss:$2 sm:$0xff] %v2847_v0  ;;  %v439_v11 = vsel %vm433_vm4, %v430_v19, %v3106_v36 }
  0xe4   : > { %449 = vst [vmem:[#allocation2 + $0x48] sm:$0xf0] %v436_v56  ;;  %v3187_v6 = vld.sshfl [vmem:[#allocation1 + $0x30] sm:$0xff pattern:$0x75316420] }
  0xe5   : > { %4180 = vst [vmem:[#allocation21_spill] sm:$0xff] %v3187_v6  ;;  %v3190_v54 = vld.sshfl [vmem:[#allocation1 + $0x10] sm:$0xff pattern:$0x75316420]  ;;  %v428_v57 = vpop.permute.xlu0 %427 }
  0xe6   : > { %447 = vst [vmem:[#allocation2 + $0x38] sm:$0xf0] %v434_v28  ;;  %v3192_v23 = vld.sshfl [vmem:[#allocation1 + $0x18] sm:$0xff pattern:$0x75316420]  ;;  %v3208_v28 = vpop.permute.xlu2 %542 }
  0xe7   : > { %986 = vst [vmem:[#allocation1 + $0x31] ss:$2 sm:$0xff] %v974_v24  ;;  %v1287_v17 = vld.sshfl [vmem:[#allocation1 + $0x8] sm:$0xff pattern:$0x75316420] }
  0xe8   : > { %1511 = vst [vmem:[#allocation1 + $0x10] ss:$2 sm:$0xff] %v3084_v1  ;;  %1295 = vrot.lane.b32.xlu1 %v1287_v17, %s2703_s9  ;;  %v1286_v24 = vld.sshfl [vmem:[#allocation1] sm:$0xff pattern:$0x75316420]  ;;  %v438_v17 = vsel %vm433_vm4, %v428_v57, %v430_v19  ;;  %v1089_v19 = vld [vmem:[%s2840_s14 + $0x18] sm:$0xff] }
  0xe9   : > { %448 = vst [vmem:[#allocation2 + $0x40] sm:$0xf0] %v435_v16  ;;  %1293 = vrot.lane.b32.xlu0 %v1286_v24, %s2703_s9  ;;  %v437_v16 = vsel %vm433_vm4, %v3079_v4, %v428_v57  ;;  %vm1595_vm4 = vcmask 359424  }
  0xea   : > { %v3196_v46 = vld.sshfl [vmem:[#allocation1 + $0x20] sm:$0xff pattern:$0x75316420]  ;;  %v3198_v56 = vld.sshfl [vmem:[#allocation1 + $0x28] sm:$0xff pattern:$0x75316420]  ;;  %v479_v36 = vpop.permute.xlu1 %478 }
  0xeb   : > { %4181 = vst [vmem:[#allocation22_spill] sm:$0xff] %v3196_v46  ;;  %v492_v24 = vsel %vm490_vm5, %v479_v36, %v3135_v3 }
  0xec   : > { %4182 = vst [vmem:[#allocation23_spill] sm:$0xff] %v3198_v56 }
  0xed   : > { %1041 = vst [vmem:[#allocation1 + $0x20] ss:$2 sm:$0xff] %v2847_v0  ;;  %v477_v7 = vpop.permute.xlu0 %476 }
  0xee   : > { %1337 = vst [vmem:[#allocation1 + $0x1] ss:$2 sm:$0xff] %v3163_v53  ;;  %v3210_v56 = vld.sshfl [vmem:[#allocation1 + $0x30] sm:$0xff pattern:$0x75316420] }
  0xef   : > { %4183 = vst [vmem:[#allocation24_spill] sm:$0xff] %v3210_v56 }
  0xf0   : > { %452 = vst [vmem:[#allocation2 + $0x60] sm:$0xf0] %v439_v11  ;;  %1233 = vrot.lane.b32.xlu1 %v1225_v44, %s4160_s10  ;;  %v491_v11 = vsel %vm490_vm5, %v477_v7, %v479_v36  ;;  %v3228_v44 = vpop.permute.xlu2 %591 }
  0xf1   : > { %1043 = vst [vmem:[#allocation1 + $0x30] ss:$2 sm:$0xff] %v1032_v59 }
  0xf2   : > { %450 = vst [vmem:[#allocation2 + $0x50] sm:$0xf0] %v437_v16 }
  0xf3   : > { %451 = vst [vmem:[#allocation2 + $0x58] sm:$0xf0] %v438_v17  ;;  %v485_v17 = vpop.permute.xlu1 %484 }
  0xf4   : > { %505 = vst [vmem:[#allocation2 + $0x78] sm:$0xf] %v492_v24  ;;  %v3215_v51 = vld.sshfl [vmem:[#allocation1 + $0x20] sm:$0xff pattern:$0x75316420]  ;;  %v495_v7 = vsel %vm490_vm5, %v485_v17, %v3158_v45 }
  0xf5   : > { %4184 = vst [vmem:[#allocation25_spill] sm:$0xff] %v3215_v51  ;;  %v3217_v4 = vld.sshfl [vmem:[#allocation1 + $0x28] sm:$0xff pattern:$0x75316420] }
  0xf6   : > { %4185 = vst [vmem:[#allocation26_spill] sm:$0xff] %v3217_v4  ;;  %v1344_v59 = vld.sshfl [vmem:[#allocation1] sm:$0xff pattern:$0x75316420] }
  0xf7   : > { %1099 = vst [vmem:[#allocation1 + $0x21] ss:$2 sm:$0xff] %v2847_v0  ;;  %1351 = vrot.lane.b32.xlu2 %v1344_v59, %s2705_s11  ;;  %v1345_v57 = vld.sshfl [vmem:[#allocation1 + $0x8] sm:$0xff pattern:$0x75316420] }
  0xf8   : > { %504 = vst [vmem:[#allocation2 + $0x70] sm:$0xf] %v491_v11  ;;  %v3224_v16 = vld.sshfl [vmem:[#allocation1 + $0x30] sm:$0xff pattern:$0x75316420]  ;;  %1353 = vrot.lane.b32.xlu0 %v1345_v57, %s2705_s11  ;;  %v483_v11 = vpop.permute.xlu0 %482 }
  0xf9   : > { %4186 = vst [vmem:[#allocation27_spill] sm:$0xff] %v3224_v16  ;;  %v3230_v24 = vld.sshfl [vmem:[#allocation1 + $0x10] sm:$0xff pattern:$0x75316420]  ;;  %v3252_v16 = vpop.permute.xlu2 %597 }
  0xfa   : > { %1394 = vst [vmem:[#allocation1] ss:$2 sm:$0xff] %v3163_v53  ;;  %v3232_v4 = vld.sshfl [vmem:[#allocation1 + $0x18] sm:$0xff pattern:$0x75316420] }
  0xfb   : > { %1101 = vst [vmem:[#allocation1 + $0x31] ss:$2 sm:$0xff] %v1089_v19  ;;  %v535_v46 = vpop.permute.xlu1 %534 }
  0xfc   : > { %1569 = vst [vmem:[#allocation1 + $0x11] ss:$2 sm:$0xff] %v3084_v1 }
  0xfd   : > { %508 = vst [vmem:[#allocation2 + $0x90] sm:$0xf] %v495_v7  ;;  %v493_v7 = vsel %vm490_vm5, %v3135_v3, %v483_v11 }
  0xfe   : > { %v3237_v36 = vld.sshfl [vmem:[#allocation1 + $0x20] sm:$0xff pattern:$0x75316420]  ;;  %v3239_v59 = vld.sshfl [vmem:[#allocation1 + $0x28] sm:$0xff pattern:$0x75316420] }
  0xff   : > { %4187 = vst [vmem:[#allocation28_spill] sm:$0xff] %v3237_v36 }
 0x100   : > { %4188 = vst [vmem:[#allocation29_spill] sm:$0xff] %v3239_v59  ;;  %v494_v59 = vsel %vm490_vm5, %v483_v11, %v485_v17 }
 0x101   : > { %1160 = vst [vmem:[#allocation1 + $0x20] ss:$2 sm:$0xff] %v2847_v0  ;;  %v1401_v57 = vld.sshfl [vmem:[#allocation1] sm:$0xff pattern:$0x75316420] }
 0x102   : > { %v1402_v56 = vld.sshfl [vmem:[#allocation1 + $0x8] sm:$0xff pattern:$0x75316420]  ;;  %v3242_v49 = vld.sshfl [vmem:[#allocation1 + $0x30] sm:$0xff pattern:$0x75316420]  ;;  %1408 = vrot.lane.b32.xlu2 %v1401_v57, %s2706_s12  ;;  %v489_v57 = vpop.permute.xlu0 %488 }
 0x103   : > { %4189 = vst [vmem:[#allocation30_spill] sm:$0xff] %v3242_v49  ;;  %v3244_v6 = vld.sshfl [vmem:[#allocation1 + $0x38] sm:$0xff pattern:$0x75316420]  ;;  %1410 = vrot.lane.b32.xlu0 %v1402_v56, %s2706_s12  ;;  %v496_v3 = vsel %vm490_vm5, %v3158_v45, %v489_v57  ;;  %v541_v11 = vpop.permute.xlu1 %540  ;;  %vm4161_vm5 = vcmask 293888  }
 0x104   : > { %4190 = vst [vmem:[#allocation31_spill] sm:$0xff] %v3244_v6 }
 0x105   : > { %1162 = vst [vmem:[#allocation1 + $0x30] ss:$2 sm:$0xff] %v1089_v19 }
 0x106   : > { %1452 = vst [vmem:[#allocation1 + $0x1] ss:$2 sm:$0xff] %v3163_v53 }
 0x107   : > { %506 = vst [vmem:[#allocation2 + $0x80] sm:$0xf] %v493_v7  ;;  %v3274_v7 = vld [vmem:[%s2840_s14 + $0x14] sm:$0xff] }
 0x108   : > { %507 = vst [vmem:[#allocation2 + $0x88] sm:$0xf] %v494_v59  ;;  %v3254_v31 = vld.sshfl [vmem:[#allocation1 + $0x20] sm:$0xff pattern:$0x75316420] }
 0x109   : > { %4191 = vst [vmem:[#allocation32_spill] sm:$0xff] %v3254_v31  ;;  %v3256_v49 = vld.sshfl [vmem:[#allocation1 + $0x28] sm:$0xff pattern:$0x75316420] }
 0x10a   : > { %4192 = vst [vmem:[#allocation33_spill] sm:$0xff] %v3256_v49  ;;  %1235 = vrot.lane.b32.xlu2 %v3165_v37, %s4160_s10 }
 0x10b   : > { %1222 = vst [vmem:[#allocation1 + $0x21] ss:$2 sm:$0xff] %v2847_v0  ;;  %1173 = vrot.lane.b32.xlu0 %v3112_v40, %s2702_s28  ;;  %v549_v0 = vsel %vm548_vm6, %v535_v46, %v3185_v61  ;;  %v1274_v46 = vld [vmem:[%s2840_s14 + $0x1c] sm:$0xf]  ;;  %v547_v36 = vpop.permute.xlu1 %546 }
 0x10c   : > { %509 = vst [vmem:[#allocation2 + $0x98] sm:$0xf] %v496_v3  ;;  %v3261_v56 = vld.sshfl [vmem:[#allocation1 + $0x30] sm:$0xff pattern:$0x75316420]  ;;  %v3281_v3 = vpop.permute.xlu2 %603 }
 0x10d   : > { %4193 = vst [vmem:[#allocation34_spill] sm:$0xff] %v3261_v56  ;;  %v3263_v17 = vld.sshfl [vmem:[#allocation1 + $0x38] sm:$0xff pattern:$0x75316420] }
 0x10e   : > { %4194 = vst [vmem:[#allocation35_spill] sm:$0xff] %v3263_v17  ;;  %v1459_v59 = vld.sshfl [vmem:[#allocation1] sm:$0xff pattern:$0x75316420] }
 0x10f   : > { %1224 = vst [vmem:[#allocation1 + $0x31] ss:$2 sm:$0xff] %v1089_v19  ;;  %1466 = vrot.lane.b32.xlu1 %v1459_v59, %s2707_s29  ;;  %v1460_v45 = vld.sshfl [vmem:[#allocation1 + $0x8] sm:$0xff pattern:$0x75316420]  ;;  %v539_v19 = vpop.permute.xlu0 %538 }
 0x110   : > { %510 = vst.msk [vmem:[#allocation2 + $0xa0] sm:$0xf] %vm278_vm1, %v489_v57  ;;  %v550_v59 = vsel %vm548_vm6, %v3185_v61, %v539_v19  ;;  %v552_v61 = vsel %vm548_vm6, %v541_v11, %v3208_v28  ;;  %v3322_v17 = vld.sshfl [vmem:[#allocation1 + $0x10] sm:$0xff pattern:$0x75316420] }
 0x111   : > { %1509 = vst [vmem:[#allocation1] ss:$2 sm:$0xff] %v3163_v53 }
 0x112   : > { %562 = vst [vmem:[#allocation2 + $0x70] sm:$0xf0] %v549_v0  ;;  %v3277_v37 = vld.sshfl [vmem:[#allocation1 + $0x20] sm:$0xff pattern:$0x75316420]  ;;  %1468 = vrot.lane.b32.xlu2 %v1460_v45, %s2707_s29  ;;  %v551_v0 = vsel %vm548_vm6, %v539_v19, %v541_v11 }
 0x113   : > { %4195 = vst [vmem:[#allocation36_spill] sm:$0xff] %v3277_v37  ;;  %v3279_v40 = vld.sshfl [vmem:[#allocation1 + $0x28] sm:$0xff pattern:$0x75316420]  ;;  %v1331_v19 = vld [vmem:[%s2840_s14 + $0x1c] sm:$0xf] }
 0x114   : > { %4196 = vst [vmem:[#allocation37_spill] sm:$0xff] %v3279_v40 }
 0x115   : > { %1283 = vst [vmem:[#allocation1 + $0x20] ss:$2 sm:$0xff] %v3274_v7 }
 0x116   : > { %563 = vst [vmem:[#allocation2 + $0x78] sm:$0xf0] %v550_v59  ;;  %v3287_v57 = vld.sshfl [vmem:[#allocation1 + $0x30] sm:$0xff pattern:$0x75316420] }
 0x117   : > { %4197 = vst [vmem:[#allocation38_spill] sm:$0xff] %v3287_v57  ;;  %v3289_v49 = vld.sshfl [vmem:[#allocation1 + $0x38] sm:$0xff pattern:$0x75316420]  ;;  %v545_v45 = vpop.permute.xlu0 %544 }
 0x118   : > { %4198 = vst [vmem:[#allocation39_spill] sm:$0xff] %v3289_v49  ;;  %v1516_v40 = vld.sshfl [vmem:[#allocation1] sm:$0xff pattern:$0x75316420]  ;;  %v553_v11 = vsel %vm548_vm6, %v3208_v28, %v545_v45  ;;  %v1389_v28 = vld [vmem:[%s2840_s14 + $0x1c] sm:$0xf] }
 0x119   : > { %1285 = vst [vmem:[#allocation1 + $0x30] ss:$2 sm:$0xff] %v1274_v46  ;;  %v1517_v6 = vld.sshfl [vmem:[#allocation1 + $0x8] sm:$0xff pattern:$0x75316420]  ;;  %1523 = vrot.lane.b32.xlu1 %v1516_v40, %s4157_s13  ;;  %v3303_v46 = vpop.permute.xlu2 %653 }
 0x11a   : > { %1567 = vst [vmem:[#allocation1 + $0x1] ss:$2 sm:$0xff] %v3163_v53  ;;  %1525 = vrot.lane.b32.xlu2 %v1517_v6, %s4157_s13  ;;  %v554_v6 = vsel %vm548_vm6, %v545_v45, %v547_v36  ;;  %vm1710_vm6 = vcmask 285696  }
 0x11b   : > { %564 = vst [vmem:[#allocation2 + $0x80] sm:$0xf0] %v551_v0 }
 0x11c   : > { %v3297_v59 = vld.sshfl [vmem:[#allocation1 + $0x20] sm:$0xff pattern:$0x75316420]  ;;  %v3299_v49 = vld.sshfl [vmem:[#allocation1 + $0x28] sm:$0xff pattern:$0x75316420] }
 0x11d   : > { %4199 = vst [vmem:[#allocation40_spill] sm:$0xff] %v3299_v49  ;;  %v596_v49 = vpop.permute.xlu1 %595 }
 0x11e   : > { %1341 = vst [vmem:[#allocation1 + $0x21] ss:$2 sm:$0xff] %v3274_v7 }
 0x11f   : > { %565 = vst [vmem:[#allocation2 + $0x88] sm:$0xf0] %v552_v61 }
 0x120   : > { %v3305_v51 = vld.sshfl [vmem:[#allocation1 + $0x30] sm:$0xff pattern:$0x75316420]  ;;  %625 = vst.msk [vmem:[#allocation2 + $0xd8] sm:$0xf] %vm278_vm1, %v3281_v3 }
 0x121   : > { %4200 = vst [vmem:[#allocation41_spill] sm:$0xff] %v3305_v51  ;;  %v1575_v40 = vld.sshfl [vmem:[#allocation1 + $0x8] sm:$0xff pattern:$0x75316420]  ;;  %v3329_v45 = vpop.permute.xlu2 %659 }
 0x122   : > { %1343 = vst [vmem:[#allocation1 + $0x31] ss:$2 sm:$0xff] %v1331_v19  ;;  %v1574_v0 = vld.sshfl [vmem:[#allocation1] sm:$0xff pattern:$0x75316420]  ;;  %1583 = vrot.lane.b32.xlu1 %v1575_v40, %s4149_s15  ;;  %v594_v19 = vpop.permute.xlu0 %593 }
 0x123   : > { %1581 = vrot.lane.b32.xlu0 %v1574_v0, %s4149_s15  ;;  %1624 = vst [vmem:[#allocation1] ss:$2 sm:$0xff] %v3163_v53  ;;  %v3327_v40 = vld.sshfl [vmem:[#allocation1 + $0x18] sm:$0xff pattern:$0x75316420]  ;;  %v606_v56 = vsel %vm4153_vm7, %v3228_v44, %v594_v19 }
 0x124   : > { %566 = vst [vmem:[#allocation2 + $0x90] sm:$0xf0] %v553_v11 }
 0x125   : > { %v3316_v61 = vld.sshfl [vmem:[#allocation1 + $0x20] sm:$0xff pattern:$0x75316420]  ;;  %v3318_v57 = vld.sshfl [vmem:[#allocation1 + $0x28] sm:$0xff pattern:$0x75316420] }
 0x126   : > { %4201 = vst [vmem:[#allocation42_spill] sm:$0xff] %v3316_v61 }
 0x127   : > { %4202 = vst [vmem:[#allocation43_spill] sm:$0xff] %v3318_v57  ;;  %v602_v57 = vpop.permute.xlu1 %601 }
 0x128   : > { %1398 = vst [vmem:[#allocation1 + $0x20] ss:$2 sm:$0xff] %v3274_v7 }
 0x129   : > { %567 = vst [vmem:[#allocation2 + $0x98] sm:$0xf0] %v554_v6  ;;  %v3324_v37 = vld.sshfl [vmem:[#allocation1 + $0x30] sm:$0xff pattern:$0x75316420] }
 0x12a   : > { %4203 = vst [vmem:[#allocation44_spill] sm:$0xff] %v3324_v37  ;;  %v1632_v11 = vld.sshfl [vmem:[#allocation1 + $0x8] sm:$0xff pattern:$0x75316420]  ;;  %v600_v63 = vpop.permute.xlu0 %599 }
 0x12b   : > { %568 = vst.msk [vmem:[#allocation2 + $0xa0] sm:$0xf0] %vm4156_vm3, %v547_v36  ;;  %v1631_v0 = vld.sshfl [vmem:[#allocation1] sm:$0xff pattern:$0x75316420]  ;;  %1640 = vrot.lane.b32.xlu1 %v1632_v11, %s4147_s16  ;;  %v608_v36 = vsel %vm4153_vm7, %v596_v49, %v3252_v16 }
 0x12c   : > { %1400 = vst [vmem:[#allocation1 + $0x30] ss:$2 sm:$0xff] %v1389_v28  ;;  %1638 = vrot.lane.b32.xlu0 %v1631_v0, %s4147_s16  ;;  %v1446_v11 = vld [vmem:[%s2840_s14 + $0x1c] sm:$0xf]  ;;  %v607_v0 = vsel %vm4153_vm7, %v594_v19, %v596_v49 }
 0x12d   : > { %1682 = vst [vmem:[#allocation1 + $0x1] ss:$2 sm:$0xff] %v3163_v53 }
 0x12e   : > { %1626 = vst [vmem:[#allocation1 + $0x10] ss:$2 sm:$0xff] %v3084_v1 }
 0x12f   : > { %v3337_v6 = vld.sshfl [vmem:[#allocation1 + $0x20] sm:$0xff pattern:$0x75316420]  ;;  %v3339_v28 = vld.sshfl [vmem:[#allocation1 + $0x28] sm:$0xff pattern:$0x75316420]  ;;  %v652_v61 = vpop.permute.xlu1 %651 }
 0x130   : > { %4204 = vst [vmem:[#allocation45_spill] sm:$0xff] %v3339_v28 }
 0x131   : > { %1456 = vst [vmem:[#allocation1 + $0x21] ss:$2 sm:$0xff] %v3274_v7 }
 0x132   : > { %621 = vst [vmem:[#allocation2 + $0xb8] sm:$0xf] %v608_v36  ;;  %v3353_v36 = vpop.permute.xlu2 %708 }
 0x133   : > { %v3346_v31 = vld.sshfl [vmem:[#allocation1 + $0x30] sm:$0xff pattern:$0x75316420]  ;;  %619 = vst [vmem:[#allocation2 + $0xa8] sm:$0xf] %v606_v56  ;;  %1053 = vrot.lane.b32.xlu1 %v3042_v39, %s2711_s17  ;;  %v611_v39 = vsel %vm4153_vm7, %v602_v57, %v3281_v3 }
 0x134   : > { %1458 = vst [vmem:[#allocation1 + $0x31] ss:$2 sm:$0xff] %v1446_v11  ;;  %v1689_v37 = vld.sshfl [vmem:[#allocation1] sm:$0xff pattern:$0x75316420]  ;;  %v650_v11 = vpop.permute.xlu0 %649 }
 0x135   : > { %620 = vst [vmem:[#allocation2 + $0xb0] sm:$0xf] %v607_v0  ;;  %1696 = vrot.lane.b32.xlu2 %v1689_v37, %s4152_s23  ;;  %v1633_v44 = vld.sshfl [vmem:[#allocation1 + $0x10] sm:$0xff pattern:$0x75316420]  ;;  %v609_v37 = vsel %vm4153_vm7, %v3252_v16, %v600_v63  ;;  %v610_v0 = vsel %vm4153_vm7, %v600_v63, %v602_v57  ;;  %v665_v63 = vsel %vm663_vm8, %v652_v61, %v3303_v46  ;;  %vm1126_vm7 = vcmask 64512  }
 0x136   : > { %v3351_v28 = vld.sshfl [vmem:[#allocation1 + $0x18] sm:$0xff pattern:$0x75316420]  ;;  %1642 = vrot.lane.b32.xlu0 %v1633_v44, %s4147_s16  ;;  %v1690_v49 = vld.sshfl [vmem:[#allocation1 + $0x8] sm:$0xff pattern:$0x75316420]  ;;  %v664_v57 = vsel %vm663_vm8, %v650_v11, %v652_v61 }
 0x137   : > { %1684 = vst [vmem:[#allocation1 + $0x11] ss:$2 sm:$0xff] %v3084_v1  ;;  %v658_v44 = vpop.permute.xlu1 %657 }
 0x138   : > { %v3357_v56 = vld.sshfl [vmem:[#allocation1 + $0x20] sm:$0xff pattern:$0x75316420]  ;;  %v3359_v19 = vld.sshfl [vmem:[#allocation1 + $0x28] sm:$0xff pattern:$0x75316420] }
 0x139   : > { %1513 = vst [vmem:[#allocation1 + $0x20] ss:$2 sm:$0xff] %v3274_v7 }
 0x13a   : > { %1739 = vst [vmem:[#allocation1] ss:$2 sm:$0xff] %v3163_v53 }
 0x13b   : > { %624 = vst [vmem:[#allocation2 + $0xd0] sm:$0xf] %v611_v39  ;;  %v715_v39 = vpop.permute.xlu2 %714 }
 0x13c   : > { %622 = vst [vmem:[#allocation2 + $0xc0] sm:$0xf] %v609_v37  ;;  %v656_v37 = vpop.permute.xlu0 %655 }
 0x13d   : > { %623 = vst [vmem:[#allocation2 + $0xc8] sm:$0xf] %v610_v0  ;;  %1110 = vrot.lane.b32.xlu2 %v3059_v47, %s2713_s25  ;;  %v668_v47 = vsel %vm663_vm8, %v658_v44, %v3329_v45  ;;  %v667_v0 = vsel %vm663_vm8, %v656_v37, %v658_v44 }
 0x13e   : > { %v1691_v51 = vld.sshfl [vmem:[#allocation1 + $0x10] sm:$0xff pattern:$0x75316420]  ;;  %v3370_v3 = vld.sshfl [vmem:[#allocation1 + $0x18] sm:$0xff pattern:$0x75316420]  ;;  %1698 = vrot.lane.b32.xlu0 %v1690_v49, %s4152_s23 }
 0x13f   : > { %1700 = vrot.lane.b32.xlu1 %v1691_v51, %s4152_s23  ;;  %1741 = vst [vmem:[#allocation1 + $0x10] ss:$2 sm:$0xff] %v3084_v1  ;;  %v666_v1 = vsel %vm663_vm8, %v3303_v46, %v656_v37  ;;  %v707_v61 = vpop.permute.xlu1 %706 }
 0x140   : > { %v3377_v53 = vld.sshfl [vmem:[#allocation1 + $0x20] sm:$0xff pattern:$0x75316420]  ;;  %v3379_v16 = vld.sshfl [vmem:[#allocation1 + $0x28] sm:$0xff pattern:$0x75316420]  ;;  %v721_v11 = vsel %vm720_vm9, %v707_v61, %v3353_v36 }
 0x141   : > { %1571 = vst [vmem:[#allocation1 + $0x21] ss:$2 sm:$0xff] %v3274_v7  ;;  %v1747_v51 = vld.sshfl [vmem:[#allocation1 + $0x8] sm:$0xff pattern:$0x75316420] }
 0x142   : > { %678 = vst [vmem:[#allocation2 + $0xb0] sm:$0xf0] %v665_v63  ;;  %v1746_v49 = vld.sshfl [vmem:[#allocation1] sm:$0xff pattern:$0x75316420] }
 0x143   : > { %677 = vst [vmem:[#allocation2 + $0xa8] sm:$0xf0] %v664_v57  ;;  %v765_v63 = vpop.permute.xlu2 %764 }
 0x144   : > { %681 = vst [vmem:[#allocation2 + $0xc8] sm:$0xf0] %v668_v47  ;;  %v662_v46 = vpop.permute.xlu0 %661 }
 0x145   : > { %679 = vst [vmem:[#allocation2 + $0xb8] sm:$0xf0] %v666_v1  ;;  %1755 = vrot.lane.b32.xlu2 %v1747_v51, %s4151_s26  ;;  %v669_v44 = vsel %vm663_vm8, %v3329_v45, %v662_v46  ;;  %v3399_v51 = vld.sshfl [vmem:[#allocation1 + $0x30] sm:$0xff pattern:$0x75316420]  ;;  %vm4162_vm8 = vcmask 277504  }
 0x146   : > { %1051 = vrot.lane.b32.xlu0 %v3040_v38, %s2711_s17  ;;  %680 = vst [vmem:[#allocation2 + $0xc0] sm:$0xf0] %v667_v0  ;;  %v1749_v57 = vld.sshfl [vmem:[#allocation1 + $0x18] sm:$0xff pattern:$0x75316420] }
 0x147   : > { %1753 = vrot.lane.b32.xlu1 %v1746_v49, %s4151_s26  ;;  %734 = vst [vmem:[#allocation2 + $0xe0] sm:$0xf] %v721_v11  ;;  %v1748_v37 = vld.sshfl [vmem:[#allocation1 + $0x10] sm:$0xff pattern:$0x75316420]  ;;  %v713_v47 = vpop.permute.xlu1 %712 }
 0x148   : > { %683 = vst.msk [vmem:[#allocation2 + $0xd8] sm:$0xf0] %vm4156_vm3, %v662_v46  ;;  %v724_v1 = vsel %vm720_vm9, %v713_v47, %v715_v39  ;;  %v1504_v38 = vld [vmem:[%s2840_s14 + $0x1c] sm:$0xf]  ;;  %vm4158_vm3 = vcmask 138240  }
 0x149   : > { %682 = vst [vmem:[#allocation2 + $0xd0] sm:$0xf0] %v669_v44 }
 0x14a   : > { %737 = vst [vmem:[#allocation2 + $0xf8] sm:$0xf] %v724_v1 }
 0x14b   : > { %1515 = vst [vmem:[#allocation1 + $0x30] ss:$2 sm:$0xff] %v1504_v38  ;;  %v3408_v61 = vpop.permute.xlu2 %1171 }
 0x14c   : > { %v711_v45 = vpop.permute.xlu0 %710 }
 0x14d   : > { %1759 = vrot.lane.b32.xlu2 %v1749_v57, %s4151_s26  ;;  %v722_v49 = vsel %vm720_vm9, %v3353_v36, %v711_v45  ;;  %v723_v0 = vsel %vm720_vm9, %v711_v45, %v713_v47  ;;  %v3435_v47 = vld.sshfl [vmem:[#allocation1 + $0x28] sm:$0xff pattern:$0x75316420] }
 0x14e   : > { %1112 = vrot.lane.b32.xlu0 %v3061_v48, %s2713_s25  ;;  %735 = vst [vmem:[#allocation2 + $0xe8] sm:$0xf] %v722_v49  ;;  %v1561_v48 = vld [vmem:[%s2840_s14 + $0x1c] sm:$0xf] }
 0x14f   : > { %1757 = vrot.lane.b32.xlu1 %v1748_v37, %s4151_s26  ;;  %736 = vst [vmem:[#allocation2 + $0xf0] sm:$0xf] %v723_v0  ;;  %v719_v11 = vpop.permute.xlu1 %718  ;;  %v3425_v37 = vld.sshfl [vmem:[#allocation1 + $0x20] sm:$0xff pattern:$0x75316420] }
 0x150   : > { %740 = vst.msk [vmem:[#allocation2 + $0x110] sm:$0xf] %vm278_vm1, %v719_v11 }
 0x151   : > { %1628 = vst [vmem:[#allocation1 + $0x20] ss:$2 sm:$0xff] %v3274_v7 }
 0x152   : > { %v3418_v36 = vld.sshfl [vmem:[#allocation1 + $0x30] sm:$0xff pattern:$0x75316420] }
 0x153   : > { %1573 = vst [vmem:[#allocation1 + $0x31] ss:$2 sm:$0xff] %v1561_v48 }
 0x154   : > { %v717_v46 = vpop.permute.xlu0 %716 }
 0x155   : > { %1585 = vrot.lane.b32.xlu2 %v3322_v17, %s4149_s15  ;;  %v725_v44 = vsel %vm720_vm9, %v715_v39, %v717_v46  ;;  %v726_v57 = vsel %vm720_vm9, %v717_v46, %v719_v11  ;;  %v1352_v17 = vpop.permute.xlu2 %1351  ;;  %vm1065_vm9 = vcmask 130048  }
 0x156   : > { %1644 = vrot.lane.b32.xlu0 %v3351_v28, %s4147_s16  ;;  %738 = vst [vmem:[#allocation2 + $0x100] sm:$0xf] %v725_v44  ;;  %s2716_s16 = smov 17  }
 0x157   : > { %1527 = vrot.lane.b32.xlu1 %v3230_v24, %s4157_s13  ;;  %739 = vst [vmem:[#allocation2 + $0x108] sm:$0xf] %v726_v57  ;;  %v1619_v24 = vld [vmem:[%s2840_s14 + $0x1c] sm:$0xf] }
 0x158   : > { %v3451_v38 = vld.sshfl [vmem:[#allocation1 + $0x28] sm:$0xff pattern:$0x75316420] }
 0x15a   : > { %v3431_v28 = vld.sshfl [vmem:[#allocation1 + $0x30] sm:$0xff pattern:$0x75316420]  ;;  %v3453_v45 = vpop.permute.xlu1 %1295 }
 0x15b   : > { %1630 = vst [vmem:[#allocation1 + $0x30] ss:$2 sm:$0xff] %v1619_v24 }
 0x15c   : > { %v3433_v39 = vpop.permute.xlu0 %766 }
 0x15d   : > { %936 = vrot.lane.b32.xlu2 %v2999_v26, %s2715_s8  ;;  %v779_v26 = vsel %vm4154_vm10, %v765_v63, %v3433_v39  ;;  %v1409_v1 = vpop.permute.xlu2 %1408  ;;  %v3449_v63 = vld.sshfl [vmem:[#allocation1 + $0x20] sm:$0xff pattern:$0x75316420]  ;;  %vm1896_vm10 = vcmask 1043456  }
 0x15e   : > { %938 = vrot.lane.b32.xlu0 %v3001_v27, %s2715_s8  ;;  %792 = vst [vmem:[#allocation2 + $0xe0] sm:$0xf0] %v779_v26 }
 0x15f   : > { %1702 = vrot.lane.b32.xlu1 %v3370_v3, %s4152_s23  ;;  %v1676_v3 = vld [vmem:[%s2840_s14 + $0x1c] sm:$0xf]  ;;  %1686 = vst [vmem:[#allocation1 + $0x21] ss:$2 sm:$0xff] %v3274_v7 }
 0x162   : > { %v3447_v27 = vld.sshfl [vmem:[#allocation1 + $0x30] sm:$0xff pattern:$0x75316420]  ;;  %v1234_v46 = vpop.permute.xlu1 %1233 }
 0x163   : > { %1688 = vst [vmem:[#allocation1 + $0x31] ss:$2 sm:$0xff] %v1676_v3 }
 0x165   : > { %996 = vrot.lane.b32.xlu2 %v3024_v33, %s2716_s16  ;;  %v1294_v33 = vpop.permute.xlu0 %1293  ;;  %v3471_v48 = vpop.permute.xlu2 %1235 }
 0x166   : > { %1412 = vrot.lane.b32.xlu0 %v3167_v58, %s2706_s12  ;;  %v1734_v58 = vld [vmem:[%s2840_s14 + $0x1c] sm:$0xf]  ;;  %v3467_v0 = vld.sshfl [vmem:[#allocation1 + $0x20] sm:$0xff pattern:$0x75316420]  ;;  %s2717_s14 = smov 27  }
 0x167   : > { %994 = vrot.lane.b32.xlu1 %v3021_v32, %s2716_s16  ;;  %v1308_v32 = vsel %vm1307_vm11, %v1294_v33, %v3453_v45  ;;  %v3469_v11 = vld.sshfl [vmem:[#allocation1 + $0x28] sm:$0xff pattern:$0x75316420] }
 0x168   : > { %1321 = vst [vmem:[#allocation2 + $0x1f8] sm:$0xf] %v1308_v32 }
 0x169   : > { %1743 = vst [vmem:[#allocation1 + $0x20] ss:$2 sm:$0xff] %v3274_v7 }
 0x16a   : > { %v3465_v49 = vld.sshfl [vmem:[#allocation1 + $0x30] sm:$0xff pattern:$0x75316420] }
 0x16b   : > { %1745 = vst [vmem:[#allocation1 + $0x30] ss:$2 sm:$0xff] %v1734_v58 }
 0x16d   : > { %1529 = vrot.lane.b32.xlu2 %v3232_v4, %s4157_s13  ;;  %v1250_v4 = vsel %vm1249_vm12, %v1234_v46, %v3471_v48  ;;  %v3486_v7 = vpop.permute.xlu2 %1468 }
 0x16e   : > { %1587 = vrot.lane.b32.xlu0 %v3327_v40, %s4149_s15  ;;  %1264 = vst [vmem:[#allocation2 + $0x1c0] sm:$0xf0] %v1250_v4  ;;  %s2718_s15 = smov 26  }
 0x16f   : > { %1470 = vrot.lane.b32.xlu1 %v3190_v54, %s2707_s29  ;;  %v3476_v54 = vpop.permute.xlu0 %1353 }
 0x170   : > { %v1366_v40 = vsel %vm1365_vm13, %v1352_v17, %v3476_v54  ;;  %v1750_v57 = vld.sshfl [vmem:[#allocation1 + $0x20] sm:$0xff pattern:$0x75316420] }
 0x171   : > { %1379 = vst [vmem:[#allocation2 + $0x1f8] sm:$0xf0] %v1366_v40 }
 0x175   : > { %823 = vrot.lane.b32.xlu2 %v2966_v13, %s2717_s14 }
 0x176   : > { %879 = vrot.lane.b32.xlu0 %v2980_v18, %s2718_s15  ;;  %v3502_v18 = vpop.permute.xlu2 %1525 }
 0x177   : > { %821 = vrot.lane.b32.xlu1 %v2964_v12, %s2717_s14  ;;  %v3488_v44 = vpop.permute.xlu0 %1410 }
 0x178   : > { %v1423_v13 = vsel %vm1422_vm14, %v1409_v1, %v3488_v44 }
 0x179   : > { %1436 = vst [vmem:[#allocation2 + $0x230] sm:$0xf] %v1423_v13 }
 0x17d   : > { %1297 = vrot.lane.b32.xlu2 %v3114_v41, %s2703_s9 }
 0x17e   : > { %1355 = vrot.lane.b32.xlu0 %v3140_v5, %s2705_s11 }
 0x17f   : > { %881 = vrot.lane.b32.xlu1 %v2984_v20, %s2718_s15  ;;  %v3498_v12 = vpop.permute.xlu0 %1173 }
 0x180   : > { %v1188_v41 = vsel %vm1187_vm15, %v3408_v61, %v3498_v12  ;;  %v1752_v61 = vld.sshfl [vmem:[#allocation1 + $0x30] sm:$0xff pattern:$0x75316420] }
 0x181   : > { %v1467_v20 = vpop.permute.xlu1 %1466  ;;  %1202 = vst [vmem:[#allocation2 + $0x1c0] sm:$0xf] %v1188_v41 }
 0x182   : > { %v1481_v5 = vsel %vm4159_vm0, %v1467_v20, %v3486_v7 }
 0x183   : > { %1494 = vst [vmem:[#allocation2 + $0x230] sm:$0xf0] %v1481_v5 }
 0x185   : > { %1472 = vrot.lane.b32.xlu2 %v3192_v23, %s2707_s29 }
 0x186   : > { %1175 = vrot.lane.b32.xlu0 %v3064_v50, %s2702_s28 }
 0x187   : > { %1414 = vrot.lane.b32.xlu1 %v3169_v55, %s2706_s12 }
 0x18a   : > { %v1859_v5 = vld [vmem:[#allocation2 + $0x230] sm:$0xff] }
 0x18b   : > { %v1524_v23 = vpop.permute.xlu1 %1523 }
 0x18c   : > { %v1538_v50 = vsel %vm4155_vm2, %v1524_v23, %v3502_v18 }
 0x18d   : > { %1299 = vrot.lane.b32.xlu2 %v3116_v25, %s2703_s9  ;;  %1551 = vst [vmem:[#allocation2 + $0x268] sm:$0xf] %v1538_v50 }
 0x18e   : > { %1357 = vrot.lane.b32.xlu0 %v3142_v2, %s2705_s11 }
 0x18f   : > { %1237 = vrot.lane.b32.xlu1 %v3086_v8, %s4160_s10  ;;  %v1697_v55 = vpop.permute.xlu2 %1696 }
 0x194   : > { %v1584_v8 = vpop.permute.xlu1 %1583 }
 0x195   : > { %1765 = vrot.lane.b32.xlu2 %v1752_v61, %s4151_s26  ;;  %v1582_v17 = vpop.permute.xlu0 %1581  ;;  %v1852_v61 = vld [vmem:[#allocation2 + $0x1f8] sm:$0xff] }
 0x196   : > { %1055 = vrot.lane.b32.xlu0 %v3027_v34, %s2711_s17  ;;  %v1596_v2 = vsel %vm1595_vm4, %v1582_v17, %v1584_v8 }
 0x197   : > { %1761 = vrot.lane.b32.xlu1 %v1750_v57, %s4151_s26  ;;  %v1111_v25 = vpop.permute.xlu2 %1110  ;;  %1609 = vst [vmem:[#allocation2 + $0x268] sm:$0xf0] %v1596_v2  ;;  %s4205_s26 = smov 36  }
 0x19d   : > { %1177 = vrot.lane.b32.xlu2 %v3066_v52, %s2702_s28  ;;  %v1641_v24 = vpop.permute.xlu1 %1640 }
 0x19e   : > { %1239 = vrot.lane.b32.xlu0 %v3088_v60, %s4160_s10  ;;  %v1639_v34 = vpop.permute.xlu0 %1638 }
 0x19f   : > { %1114 = vrot.lane.b32.xlu1 %v3045_v42, %s2713_s25  ;;  %v1756_v26 = vpop.permute.xlu2 %1755  ;;  %v1653_v3 = vsel %vm4161_vm5, %v1639_v34, %v1641_v24 }
 0x1a0   : > { %1666 = vst [vmem:[#allocation2 + $0x2a0] sm:$0xf] %v1653_v3 }
 0x1a5   : > { %1704 = vrot.lane.b32.xlu2 %v3467_v0, %s4152_s23  ;;  %v3539_v42 = vpop.permute.xlu1 %1053 }
 0x1a6   : > { %1650 = vrot.lane.b32.xlu0 %v3447_v27, %s4205_s26 }
 0x1a7   : > { %1646 = vrot.lane.b32.xlu1 %v3449_v63, %s4205_s26  ;;  %v3541_v52 = vpop.permute.xlu2 %1759 }
 0x1a8   : > { %v1643_v60 = vpop.permute.xlu0 %1642 }
 0x1a9   : > { %v1654_v1 = vsel %vm4161_vm5, %v1641_v24, %v1643_v60 }
 0x1aa   : > { %1667 = vst [vmem:[#allocation2 + $0x2a8] sm:$0xf] %v1654_v1 }
 0x1ad   : > { %940 = vrot.lane.b32.xlu2 %v2988_v21, %s2715_s8 }
 0x1ae   : > { %998 = vrot.lane.b32.xlu0 %v3009_v29, %s2716_s16 }
 0x1af   : > { %1708 = vrot.lane.b32.xlu1 %v3465_v49, %s4152_s23  ;;  %v3550_v63 = vpop.permute.xlu2 %1585  ;;  %s4206_s23 = smov 44  }
 0x1b0   : > { %v1597_v33 = vsel %vm1595_vm4, %v1584_v8, %v3550_v63  ;;  %v1699_v32 = vpop.permute.xlu0 %1698  ;;  %v1845_v8 = vld [vmem:[#allocation2 + $0x1c0] sm:$0xff] }
 0x1b1   : > { %v3552_v27 = vpop.permute.xlu1 %1700  ;;  %1610 = vst [vmem:[#allocation2 + $0x270] sm:$0xf0] %v1597_v33  ;;  %v1711_v58 = vsel %vm1710_vm6, %v1697_v55, %v1699_v32 }
 0x1b2   : > { %v1712_v21 = vsel %vm1710_vm6, %v1699_v32, %v3552_v27  ;;  %1724 = vst [vmem:[#allocation2 + $0x2a0] sm:$0xf0] %v1711_v58  ;;  %v4210_v58 = vld [vmem:[#allocation44_spill] sm:$0xff] }
 0x1b3   : > { %1725 = vst [vmem:[#allocation2 + $0x2a8] sm:$0xf0] %v1712_v21 }
 0x1b5   : > { %1116 = vrot.lane.b32.xlu2 %v3047_v43, %s2713_s25 }
 0x1b6   : > { %1531 = vrot.lane.b32.xlu0 %v3377_v53, %s4157_s13 }
 0x1b7   : > { %1057 = vrot.lane.b32.xlu1 %v3029_v35, %s2711_s17  ;;  %v3565_v29 = vpop.permute.xlu2 %936 }
 0x1b8   : > { %v1052_v0 = vpop.permute.xlu0 %1051 }
 0x1b9   : > { %v1754_v49 = vpop.permute.xlu1 %1753  ;;  %v1066_v4 = vsel %vm1065_vm9, %v1052_v0, %v3539_v42 }
 0x1ba   : > { %v1768_v46 = vsel %vm4162_vm8, %v1754_v49, %v1756_v26  ;;  %1079 = vst [vmem:[#allocation2 + $0x188] sm:$0xf] %v1066_v4  ;;  %v4211_v4 = vld [vmem:[#allocation32_spill] sm:$0xff] }
 0x1bb   : > { %1781 = vst [vmem:[#allocation2 + $0x2d8] sm:$0xf] %v1768_v46 }
 0x1bd   : > { %1535 = vrot.lane.b32.xlu2 %v3418_v36, %s4157_s13  ;;  %s4207_s13 = smov 28  }
 0x1be   : > { %1593 = vrot.lane.b32.xlu0 %v3431_v28, %s4206_s23  ;;  %v1866_v28 = vld [vmem:[#allocation2 + $0x268] sm:$0xff] }
 0x1bf   : > { %1589 = vrot.lane.b32.xlu1 %v3425_v37, %s4206_s23  ;;  %v3576_v35 = vpop.permute.xlu2 %996  ;;  %v1873_v37 = vld [vmem:[#allocation2 + $0x2a0] sm:$0xff] }
 0x1c0   : > { %v3578_v53 = vpop.permute.xlu0 %1112 }
 0x1c1   : > { %v1758_v43 = vpop.permute.xlu1 %1757  ;;  %v1127_v36 = vsel %vm1126_vm7, %v1111_v25, %v3578_v53  ;;  %v1874_v25 = vld [vmem:[#allocation2 + $0x2a8] sm:$0xff] }
 0x1c2   : > { %v1769_v40 = vsel %vm4162_vm8, %v1756_v26, %v1758_v43  ;;  %v1770_v13 = vsel %vm4162_vm8, %v1758_v43, %v3541_v52  ;;  %v1880_v41 = vld [vmem:[#allocation2 + $0x2d8] sm:$0xf]  ;;  %1141 = vst [vmem:[#allocation2 + $0x188] sm:$0xf0] %v1127_v36  ;;  %v4212_v43 = vld [vmem:[#allocation9_spill] sm:$0xff] }
 0x1c3   : > { %1782 = vst [vmem:[#allocation2 + $0x2e0] sm:$0xf] %v1769_v40  ;;  %2458 = vmatpush.msk.msra.mxu0 %vm1896_vm10, %v1880_v41 }
 0x1c4   : > { %1783 = vst [vmem:[#allocation2 + $0x2e8] sm:$0xf] %v1770_v13  ;;  %v4213_v13 = vld [vmem:[#allocation34_spill] sm:$0xff] }
 0x1c5   : > { %1921 = vmatpush.msra.mxu0 %v1873_v37  ;;  %883 = vrot.lane.b32.xlu2 %v2971_v14, %s2718_s15 }
 0x1c6   : > { %942 = vrot.lane.b32.xlu0 %v2990_v22, %s2715_s8 }
 0x1c7   : > { %825 = vrot.lane.b32.xlu1 %v2956_v9, %s2717_s14  ;;  %1922 = vmatpush.msra.mxu0 %v1866_v28  ;;  %v3590_v20 = vpop.permute.xlu2 %1529 }
 0x1c8   : > { %v3594_v55 = vpop.permute.xlu0 %1644 }
 0x1c9   : > { %1923 = vmatpush.msra.mxu0 %v1859_v5  ;;  %v1528_v23 = vpop.permute.xlu1 %1527  ;;  %v1655_v9 = vsel %vm4161_vm5, %v1643_v60, %v3594_v55  ;;  %v1838_v17 = vld [vmem:[#allocation2 + $0x188] sm:$0xff]  ;;  %v4214_v5 = vld [vmem:[#allocation36_spill] sm:$0xff] }
 0x1ca   : > { %v1539_v50 = vsel %vm4155_vm2, %v3502_v18, %v1528_v23  ;;  %v1540_v14 = vsel %vm4155_vm2, %v1528_v23, %v3590_v20  ;;  %v1881_v57 = vld [vmem:[#allocation2 + $0x2e0] sm:$0xf]  ;;  %1668 = vst [vmem:[#allocation2 + $0x2b0] sm:$0xf] %v1655_v9  ;;  %vm950_vm2 = vcmask 146432   ;;  %v4215_v23 = vld [vmem:[#allocation35_spill] sm:$0xff] }
 0x1cb   : > { %1552 = vst [vmem:[#allocation2 + $0x270] sm:$0xf] %v1539_v50  ;;  %1924 = vmatpush.msra.mxu0 %v1852_v61  ;;  %2460 = vmatpush.msk.msra.mxu1 %vm1896_vm10, %v1881_v57  ;;  %v1882_v22 = vld [vmem:[#allocation2 + $0x2e8] sm:$0xf] }
 0x1cc   : > { %1553 = vst [vmem:[#allocation2 + $0x278] sm:$0xf] %v1540_v14  ;;  %2462 = vmatpush.msk.msra.mxu2 %vm1896_vm10, %v1882_v22  ;;  %v4216_v14 = vld [vmem:[#allocation38_spill] sm:$0xff] }
 0x1cd   : > { %1925 = vmatpush.msra.mxu0 %v1845_v8  ;;  %1941 = vmatpush.msra.mxu1 %v1874_v25 }
 0x1ce   : > { %1416 = vrot.lane.b32.xlu2 %v3337_v6, %s2706_s12  ;;  %1474 = vrot.lane.b32.xlu0 %v3357_v56, %s2707_s29 }
 0x1cf   : > { %1000 = vrot.lane.b32.xlu1 %v3011_v30, %s2716_s16  ;;  %1926 = vmatpush.msra.mxu0 %v1838_v17  ;;  %v3608_v18 = vpop.permute.xlu2 %823  ;;  %v1817_v17 = vld [vmem:[#allocation2 + $0xe0] sm:$0xff] }
 0x1d0   : > { %v3614_v24 = vpop.permute.xlu0 %938 }
 0x1d1   : > { %v3612_v2 = vpop.permute.xlu1 %1702  ;;  %v951_v30 = vsel %vm950_vm2, %v3565_v29, %v3614_v24 }
 0x1d2   : > { %v1713_v26 = vsel %vm1710_vm6, %v3552_v27, %v3612_v2  ;;  %v1867_v34 = vld [vmem:[#allocation2 + $0x270] sm:$0xff]  ;;  %964 = vst [vmem:[#allocation2 + $0x150] sm:$0xf] %v951_v30 }
 0x1d3   : > { %1726 = vst [vmem:[#allocation2 + $0x2b0] sm:$0xf0] %v1713_v26  ;;  %1942 = vmatpush.msra.mxu1 %v1867_v34  ;;  %v4217_v26 = vld [vmem:[#allocation25_spill] sm:$0xff]  ;;  %v1810_v34 = vld [vmem:[#allocation2 + $0xa8] sm:$0xff]  ;;  %v4218_v30 = vld [vmem:[#allocation39_spill] sm:$0xff] }
 0x1d6   : > { %1478 = vrot.lane.b32.xlu2 %v3399_v51, %s2707_s29  ;;  %768 = vrot.lane.b32.xlu0 %v2942_v62, %s4207_s13 }
 0x1d7   : > { %1420 = vrot.lane.b32.xlu1 %v3346_v31, %s2706_s12  ;;  %v1298_v6 = vpop.permute.xlu2 %1297 }
 0x1d8   : > { %v1309_v56 = vsel %vm1307_vm11, %v3453_v45, %v1298_v6  ;;  %v1413_v60 = vpop.permute.xlu0 %1412 }
 0x1d9   : > { %v995_v3 = vpop.permute.xlu1 %994  ;;  %1322 = vst [vmem:[#allocation2 + $0x200] sm:$0xf] %v1309_v56  ;;  %v1424_v51 = vsel %vm1422_vm14, %v3488_v44, %v1413_v60  ;;  %v4219_v56 = vld [vmem:[#allocation28_spill] sm:$0xff] }
 0x1da   : > { %v1009_v1 = vsel %vm4158_vm3, %v995_v3, %v3576_v35  ;;  %v1875_v27 = vld [vmem:[#allocation2 + $0x2b0] sm:$0xff]  ;;  %1437 = vst [vmem:[#allocation2 + $0x238] sm:$0xf] %v1424_v51  ;;  %vm835_vm3 = vcmask 220160   ;;  %v1796_v51 = vld [vmem:[#allocation2 + $0x38] sm:$0xff] }
 0x1db   : > { %1022 = vst [vmem:[#allocation2 + $0x150] sm:$0xf0] %v1009_v1  ;;  %1961 = vmatpush.msra.mxu2 %v1875_v27 }
 0x1de   : > { %885 = vrot.lane.b32.xlu2 %v2973_v15, %s2718_s15  ;;  %1301 = vrot.lane.b32.xlu0 %v3297_v59, %s2703_s9  ;;  %v4209_v59 = vld [vmem:[#allocation42_spill] sm:$0xff] }
 0x1df   : > { %827 = vrot.lane.b32.xlu1 %v2959_v10, %s2717_s14  ;;  %v3638_v62 = vpop.permute.xlu2 %1472  ;;  %v4208_v10 = vld [vmem:[#allocation41_spill] sm:$0xff] }
 0x1e0   : > { %v3642_v45 = vpop.permute.xlu0 %1587 }
 0x1e1   : > { %v1471_v31 = vpop.permute.xlu1 %1470  ;;  %v1598_v15 = vsel %vm1595_vm4, %v3550_v63, %v3642_v45 }
 0x1e2   : > { %v1482_v44 = vsel %vm4159_vm0, %v3486_v7, %v1471_v31  ;;  %v1483_v33 = vsel %vm4159_vm0, %v1471_v31, %v3638_v62  ;;  %v1831_v32 = vld [vmem:[#allocation2 + $0x150] sm:$0xff]  ;;  %1611 = vst [vmem:[#allocation2 + $0x278] sm:$0xf0] %v1598_v15  ;;  %vm893_vm0 = vcmask 211968   ;;  %v4221_v15 = vld [vmem:[#allocation30_spill] sm:$0xff] }
 0x1e3   : > { %1495 = vst [vmem:[#allocation2 + $0x238] sm:$0xf0] %v1482_v44  ;;  %1927 = vmatpush.msra.mxu0 %v1831_v32  ;;  %v4220_v32 = vld [vmem:[#allocation31_spill] sm:$0xff] }
 0x1e4   : > { %1496 = vst [vmem:[#allocation2 + $0x240] sm:$0xf0] %v1483_v33  ;;  %v1789_v33 = vld [vmem:[#allocation2] sm:$0xff] }
 0x1e6   : > { %1305 = vrot.lane.b32.xlu2 %v4208_v10, %s2703_s9  ;;  %1363 = vrot.lane.b32.xlu0 %v4210_v58, %s2705_s11 }
 0x1e7   : > { %1359 = vrot.lane.b32.xlu1 %v4209_v59, %s2705_s11  ;;  %v3655_v7 = vpop.permute.xlu2 %1299 }
 0x1e8   : > { %v1310_v21 = vsel %vm1307_vm11, %v1298_v6, %v3655_v7  ;;  %v880_v29 = vpop.permute.xlu0 %879  ;;  %v1803_v6 = vld [vmem:[#allocation2 + $0x70] sm:$0xff] }
 0x1e9   : > { %v822_v63 = vpop.permute.xlu1 %821  ;;  %1323 = vst [vmem:[#allocation2 + $0x208] sm:$0xf] %v1310_v21  ;;  %v1868_v46 = vld [vmem:[#allocation2 + $0x278] sm:$0xff] }
 0x1ea   : > { %v836_v49 = vsel %vm835_vm3, %v822_v63, %v3608_v18  ;;  %v1860_v0 = vld [vmem:[#allocation2 + $0x238] sm:$0xff]  ;;  %1962 = vmatpush.msra.mxu2 %v1868_v46 }
 0x1eb   : > { %849 = vst [vmem:[#allocation2 + $0x118] sm:$0xf] %v836_v49  ;;  %1943 = vmatpush.msra.mxu1 %v1860_v0  ;;  %v4223_v0 = vld [vmem:[#allocation19_spill] sm:$0xff] }
 0x1ee   : > { %1179 = vrot.lane.b32.xlu2 %v4211_v4, %s2702_s28  ;;  %1183 = vrot.lane.b32.xlu0 %v4213_v13, %s2702_s28  ;;  %v4225_v4 = vld [vmem:[#allocation22_spill] sm:$0xff] }
 0x1ef   : > { %770 = vrot.lane.b32.xlu1 %v4212_v43, %s4207_s13  ;;  %v3667_v40 = vpop.permute.xlu2 %1765 }
 0x1f0   : > { %1787 = vst.msk [vmem:[#allocation2 + $0x308] sm:$0xf] %vm278_vm1, %v3667_v40  ;;  %v1356_v36 = vpop.permute.xlu0 %1355 }
 0x1f1   : > { %v3673_v41 = vpop.permute.xlu1 %881  ;;  %v1367_v28 = vsel %vm1365_vm13, %v3476_v54, %v1356_v36 }
 0x1f2   : > { %v894_v37 = vsel %vm893_vm0, %v880_v29, %v3673_v41  ;;  %1380 = vst [vmem:[#allocation2 + $0x200] sm:$0xf0] %v1367_v28 }
 0x1f3   : > { %907 = vst [vmem:[#allocation2 + $0x118] sm:$0xf0] %v894_v37 }
 0x1f6   : > { %1241 = vrot.lane.b32.xlu2 %v4214_v5, %s4160_s10  ;;  %1245 = vrot.lane.b32.xlu0 %v4216_v14, %s4160_s10 }
 0x1f7   : > { %1185 = vrot.lane.b32.xlu1 %v4215_v23, %s2702_s28  ;;  %v3683_v50 = vpop.permute.xlu2 %1177 }
 0x1f8   : > { %v1176_v57 = vpop.permute.xlu0 %1175 }
 0x1f9   : > { %v3687_v61 = vpop.permute.xlu1 %1414  ;;  %v1189_v22 = vsel %vm1187_vm15, %v3498_v12, %v1176_v57  ;;  %v1190_v8 = vsel %vm1187_vm15, %v1176_v57, %v3683_v50  ;;  %v1853_v25 = vld [vmem:[#allocation2 + $0x200] sm:$0xff] }
 0x1fa   : > { %v1425_v9 = vsel %vm1422_vm14, %v1413_v60, %v3687_v61  ;;  %v1824_v54 = vld [vmem:[#allocation2 + $0x118] sm:$0xff]  ;;  %1203 = vst [vmem:[#allocation2 + $0x1c8] sm:$0xf] %v1189_v22  ;;  %1944 = vmatpush.msra.mxu1 %v1853_v25  ;;  %v4228_v57 = vld [vmem:[#allocation13_spill] sm:$0xff] }
 0x1fb   : > { %1438 = vst [vmem:[#allocation2 + $0x240] sm:$0xf] %v1425_v9  ;;  %1928 = vmatpush.msra.mxu0 %v1824_v54  ;;  %v4229_v9 = vld [vmem:[#allocation24_spill] sm:$0xff] }
 0x1fc   : > { %1204 = vst [vmem:[#allocation2 + $0x1d0] sm:$0xf] %v1190_v8  ;;  %v4230_v22 = vld [vmem:[#allocation16_spill] sm:$0xff] }
 0x1fd   : > { %1929 = vmatpush.msra.mxu0 %v1817_v17 }
 0x1fe   : > { %1059 = vrot.lane.b32.xlu2 %v4217_v26, %s2711_s17  ;;  %1118 = vrot.lane.b32.xlu0 %v4219_v56, %s2713_s25 }
 0x1ff   : > { %1247 = vrot.lane.b32.xlu1 %v4218_v30, %s4160_s10  ;;  %1930 = vmatpush.msra.mxu0 %v1810_v34  ;;  %v3699_v12 = vpop.permute.xlu2 %1704  ;;  %s4222_s10 = smov 34   ;;  %v4234_v34 = vld [vmem:[#allocation15_spill] sm:$0xff] }
 0x200   : > { %v1714_v3 = vsel %vm1710_vm6, %v3612_v2, %v3699_v12  ;;  %v3706_v1 = vpop.permute.xlu0 %1357  ;;  %v1751_v2 = vld.sshfl [vmem:[#allocation1 + $0x28] sm:$0xff pattern:$0x75316420] }
 0x201   : > { %1931 = vmatpush.msra.mxu0 %v1803_v6  ;;  %v1238_v60 = vpop.permute.xlu1 %1237  ;;  %1727 = vst [vmem:[#allocation2 + $0x2b8] sm:$0xf0] %v1714_v3  ;;  %v1368_v44 = vsel %vm1365_vm13, %v1356_v36, %v3706_v1  ;;  %v4236_v3 = vld [vmem:[#allocation10_spill] sm:$0xff] }
 0x202   : > { %v1251_v27 = vsel %vm1249_vm12, %v3471_v48, %v1238_v60  ;;  %v1861_v31 = vld [vmem:[#allocation2 + $0x240] sm:$0xff]  ;;  %1381 = vst [vmem:[#allocation2 + $0x208] sm:$0xf0] %v1368_v44 }
 0x203   : > { %1265 = vst [vmem:[#allocation2 + $0x1c8] sm:$0xf0] %v1251_v27  ;;  %1932 = vmatpush.msra.mxu0 %v1796_v51  ;;  %1963 = vmatpush.msra.mxu2 %v1861_v31  ;;  %v4238_v27 = vld [vmem:[#allocation45_spill] sm:$0xff] }
 0x205   : > { %1933 = vmatpush.msra.mxu0 %v1789_v33  ;;  %v4240_v33 = vld [vmem:[#allocation12_spill] sm:$0xff] }
 0x206   : > { %1124 = vrot.lane.b32.xlu2 %v4220_v32, %s2713_s25  ;;  %1763 = vrot.lane.b32.xlu0 %v1751_v2, %s4222_s10  ;;  %s4226_s10 = smov 35   ;;  %v4241_v32 = vld [vmem:[#allocation40_spill] sm:$0xff] }
 0x207   : > { %1122 = vrot.lane.b32.xlu1 %v4221_v15, %s2713_s25  ;;  %v3716_v10 = vpop.permute.xlu2 %940 }
 0x208   : > { %v952_v48 = vsel %vm950_vm2, %v3614_v24, %v3716_v10  ;;  %v1056_v58 = vpop.permute.xlu0 %1055  ;;  %v4224_v24 = vld [vmem:[#allocation27_spill] sm:$0xff] }
 0x209   : > { %v3722_v59 = vpop.permute.xlu1 %1761  ;;  %965 = vst [vmem:[#allocation2 + $0x158] sm:$0xf] %v952_v48  ;;  %v1067_v29 = vsel %vm1065_vm9, %v3539_v42, %v1056_v58  ;;  %v1854_v49 = vld [vmem:[#allocation2 + $0x208] sm:$0xff] }
 0x20a   : > { %v1771_v21 = vsel %vm4162_vm8, %v3541_v52, %v3722_v59  ;;  %v1846_v63 = vld [vmem:[#allocation2 + $0x1c8] sm:$0xff]  ;;  %1080 = vst [vmem:[#allocation2 + $0x190] sm:$0xf] %v1067_v29  ;;  %1964 = vmatpush.msra.mxu2 %v1854_v49  ;;  %vm4232_vm8 = vcmask 80900   ;;  %v4243_v29 = vld [vmem:[#allocation43_spill] sm:$0xff] }
 0x20b   : > { %1784 = vst [vmem:[#allocation2 + $0x2f0] sm:$0xf] %v1771_v21  ;;  %1945 = vmatpush.msra.mxu1 %v1846_v63  ;;  %v4242_v63 = vld [vmem:[#allocation33_spill] sm:$0xff] }
 0x20e   : > { %944 = vrot.lane.b32.xlu2 %v4223_v0, %s2715_s8  ;;  %1002 = vrot.lane.b32.xlu0 %v4225_v4, %s2716_s16 }
 0x20f   : > { %1063 = vrot.lane.b32.xlu1 %v4224_v24, %s2711_s17  ;;  %v3733_v46 = vpop.permute.xlu2 %1116 }
 0x210   : > { %v3737_v43 = vpop.permute.xlu0 %1239 }
 0x211   : > { %v1115_v52 = vpop.permute.xlu1 %1114  ;;  %v1252_v37 = vsel %vm1249_vm12, %v1238_v60, %v3737_v43 }
 0x212   : > { %v1128_v42 = vsel %vm1126_vm7, %v3578_v53, %v1115_v52  ;;  %v1129_v13 = vsel %vm1126_vm7, %v1115_v52, %v3733_v46  ;;  %v1883_v36 = vld [vmem:[#allocation2 + $0x2f0] sm:$0xf]  ;;  %1266 = vst [vmem:[#allocation2 + $0x1d0] sm:$0xf0] %v1252_v37  ;;  %v4227_v53 = vld [vmem:[#allocation21_spill] sm:$0xff]  ;;  %v4250_v37 = vld [vmem:[#allocation20_spill] sm:$0xff] }
 0x213   : > { %1142 = vst [vmem:[#allocation2 + $0x190] sm:$0xf0] %v1128_v42  ;;  %2464 = vmatpush.msk.msra.mxu3 %vm1896_vm10, %v1883_v36  ;;  %v4248_v42 = vld [vmem:[#allocation29_spill] sm:$0xff] }
 0x214   : > { %1143 = vst [vmem:[#allocation2 + $0x198] sm:$0xf0] %v1129_v13  ;;  %v4249_v13 = vld [vmem:[#allocation26_spill] sm:$0xff] }
 0x216   : > { %1706 = vrot.lane.b32.xlu2 %v3469_v11, %s4226_s10  ;;  %948 = vrot.lane.b32.xlu0 %v4227_v53, %s2715_s8 }
 0x217   : > { %1648 = vrot.lane.b32.xlu1 %v3451_v38, %s4205_s26  ;;  %v3750_v28 = vpop.permute.xlu2 %1535  ;;  %s4233_s26 = smov 45  }
 0x218   : > { %1557 = vst.msk [vmem:[#allocation2 + $0x298] sm:$0xf] %vm278_vm1, %v3750_v28  ;;  %v3758_v23 = vpop.permute.xlu0 %1650 }
 0x219   : > { %v3756_v5 = vpop.permute.xlu1 %1646  ;;  %1672 = vst.msk [vmem:[#allocation2 + $0x2d0] sm:$0xf] %vm278_vm1, %v3758_v23  ;;  %v1847_v38 = vld [vmem:[#allocation2 + $0x1d0] sm:$0xff] }
 0x21a   : > { %v1656_v14 = vsel %vm4161_vm5, %v3594_v55, %v3756_v5  ;;  %v1839_v11 = vld [vmem:[#allocation2 + $0x190] sm:$0xff]  ;;  %1965 = vmatpush.msra.mxu2 %v1847_v38  ;;  %vm4231_vm5 = vcmask 138240  }
 0x21b   : > { %1669 = vst [vmem:[#allocation2 + $0x2b8] sm:$0xf] %v1656_v14  ;;  %1946 = vmatpush.msra.mxu1 %v1839_v11 }
 0x21e   : > { %829 = vrot.lane.b32.xlu2 %v4228_v57, %s2717_s14  ;;  %887 = vrot.lane.b32.xlu0 %v4230_v22, %s2718_s15  ;;  %v4254_v22 = vld [vmem:[#allocation17_spill] sm:$0xff] }
 0x21f   : > { %1006 = vrot.lane.b32.xlu1 %v4229_v9, %s2716_s16  ;;  %v884_v54 = vpop.permute.xlu2 %883  ;;  %v4252_v9 = vld [vmem:[#allocation14_spill] sm:$0xff] }
 0x220   : > { %v895_v55 = vsel %vm893_vm0, %v3673_v41, %v884_v54  ;;  %v999_v25 = vpop.permute.xlu0 %998 }
 0x221   : > { %v3773_v8 = vpop.permute.xlu1 %1708  ;;  %908 = vst [vmem:[#allocation2 + $0x120] sm:$0xf0] %v895_v55  ;;  %v1010_v26 = vsel %vm4231_vm5, %v3576_v35, %v999_v25  ;;  %vm4235_vm5 = vcmask 367616  }
 0x222   : > { %v1876_v17 = vld [vmem:[#allocation2 + $0x2b8] sm:$0xff]  ;;  %1730 = vst.msk [vmem:[#allocation2 + $0x2d0] sm:$0xf0] %vm4232_vm8, %v3773_v8 }
 0x223   : > { %1981 = vmatpush.msra.mxu3 %v1876_v17  ;;  %1023 = vst [vmem:[#allocation2 + $0x158] sm:$0xf0] %v1010_v26 }
 0x226   : > { %1591 = vrot.lane.b32.xlu2 %v3435_v47, %s4206_s23  ;;  %833 = vrot.lane.b32.xlu0 %v4234_v34, %s2717_s14 }
 0x227   : > { %1533 = vrot.lane.b32.xlu1 %v3379_v16, %s4233_s26 }
 0x228   : > { %v3783_v41 = vpop.permute.xlu2 %1416  ;;  %v3792_v6 = vpop.permute.xlu0 %1531 }
 0x229   : > { %v1426_v35 = vsel %vm1422_vm14, %v3687_v61, %v3783_v41  ;;  %v3790_v30 = vpop.permute.xlu1 %1057  ;;  %v1541_v16 = vsel %vm4235_vm5, %v3590_v20, %v3792_v6  ;;  %v4237_v61 = vld [vmem:[#allocation18_spill] sm:$0xff]  ;;  %vm4239_vm5 = vmmov %vm4232_vm8 }
 0x22a   : > { %1439 = vst [vmem:[#allocation2 + $0x248] sm:$0xf] %v1426_v35  ;;  %v1068_v47 = vsel %vm1065_vm9, %v1056_v58, %v3790_v30  ;;  %v1832_v56 = vld [vmem:[#allocation2 + $0x158] sm:$0xff]  ;;  %v1811_v35 = vld [vmem:[#allocation2 + $0xb0] sm:$0xff] }
 0x22b   : > { %1081 = vst [vmem:[#allocation2 + $0x198] sm:$0xf] %v1068_v47  ;;  %1947 = vmatpush.msra.mxu1 %v1832_v56  ;;  %v1804_v47 = vld [vmem:[#allocation2 + $0x78] sm:$0xff] }
 0x22c   : > { %1554 = vst [vmem:[#allocation2 + $0x280] sm:$0xf] %v1541_v16 }
 0x22e   : > { %772 = vrot.lane.b32.xlu2 %v4236_v3, %s4207_s13  ;;  %1418 = vrot.lane.b32.xlu0 %v4238_v27, %s2706_s12 }
 0x22f   : > { %891 = vrot.lane.b32.xlu1 %v4237_v61, %s2718_s15  ;;  %v1797_v61 = vld [vmem:[#allocation2 + $0x40] sm:$0xff] }
 0x230   : > { %v3803_v60 = vpop.permute.xlu2 %1478  ;;  %v3811_v20 = vpop.permute.xlu0 %1593 }
 0x231   : > { %1500 = vst.msk [vmem:[#allocation2 + $0x260] sm:$0xf0] %vm4232_vm8, %v3803_v60  ;;  %v3809_v51 = vpop.permute.xlu1 %1589  ;;  %vm4246_vm8 = vcmask 138240  }
 0x232   : > { %v1599_v31 = vsel %vm1595_vm4, %v3642_v45, %v3809_v51  ;;  %v1840_v44 = vld [vmem:[#allocation2 + $0x198] sm:$0xff]  ;;  %1615 = vst.msk [vmem:[#allocation2 + $0x298] sm:$0xf0] %vm4239_vm5, %v3811_v20  ;;  %vm4247_vm5 = vcmask 375808  }
 0x233   : > { %1612 = vst [vmem:[#allocation2 + $0x280] sm:$0xf0] %v1599_v31  ;;  %1966 = vmatpush.msra.mxu2 %v1840_v44  ;;  %v1790_v44 = vld [vmem:[#allocation2 + $0x8] sm:$0xff] }
 0x236   : > { %776 = vrot.lane.b32.xlu2 %v4240_v33, %s4207_s13  ;;  %1303 = vrot.lane.b32.xlu0 %v4241_v32, %s2703_s9  ;;  %s4244_s9 = smov 6  }
 0x237   : > { %1476 = vrot.lane.b32.xlu1 %v3359_v19, %s2707_s29 }
 0x238   : > { %v3822_v2 = vpop.permute.xlu2 %885  ;;  %v3830_v21 = vpop.permute.xlu0 %942 }
 0x239   : > { %v896_v45 = vsel %vm893_vm0, %v884_v54, %v3822_v2  ;;  %v826_v15 = vpop.permute.xlu1 %825  ;;  %v953_v19 = vsel %vm950_vm2, %v3716_v10, %v3830_v21 }
 0x23a   : > { %909 = vst [vmem:[#allocation2 + $0x128] sm:$0xf0] %v896_v45  ;;  %v837_v48 = vsel %vm835_vm3, %v3608_v18, %v826_v15  ;;  %v1869_v58 = vld [vmem:[#allocation2 + $0x280] sm:$0xff] }
 0x23b   : > { %850 = vst [vmem:[#allocation2 + $0x120] sm:$0xf] %v837_v48  ;;  %1982 = vmatpush.msra.mxu3 %v1869_v58  ;;  %v4245_v18 = vld [vmem:[#allocation37_spill] sm:$0xff] }
 0x23c   : > { %966 = vst [vmem:[#allocation2 + $0x160] sm:$0xf] %v953_v19 }
 0x23e   : > { %1181 = vrot.lane.b32.xlu2 %v4242_v63, %s2702_s28  ;;  %1243 = vrot.lane.b32.xlu0 %v4245_v18, %s4244_s9 }
 0x23f   : > { %1361 = vrot.lane.b32.xlu1 %v4243_v29, %s2705_s11 }
 0x240   : > { %v3839_v49 = vpop.permute.xlu2 %1305  ;;  %v3849_v4 = vpop.permute.xlu0 %1474 }
 0x241   : > { %1327 = vst.msk [vmem:[#allocation2 + $0x228] sm:$0xf] %vm278_vm1, %v3839_v49  ;;  %v3845_v0 = vpop.permute.xlu1 %1000  ;;  %v1484_v52 = vsel %vm4247_vm5, %v3638_v62, %v3849_v4  ;;  %vm4256_vm5 = vcmask 80900  }
 0x242   : > { %v1011_v10 = vsel %vm4246_vm8, %v999_v25, %v3845_v0  ;;  %v1825_v24 = vld [vmem:[#allocation2 + $0x120] sm:$0xff]  ;;  %1497 = vst [vmem:[#allocation2 + $0x248] sm:$0xf0] %v1484_v52  ;;  %vm4251_vm8 = vcmask 228352  }
 0x243   : > { %1024 = vst [vmem:[#allocation2 + $0x160] sm:$0xf0] %v1011_v10  ;;  %1948 = vmatpush.msra.mxu1 %v1825_v24  ;;  %v1812_v10 = vld [vmem:[#allocation2 + $0xb8] sm:$0xff]  ;;  %v1805_v24 = vld [vmem:[#allocation2 + $0x80] sm:$0xff] }
 0x246   : > { %1120 = vrot.lane.b32.xlu2 %v4248_v42, %s2713_s25  ;;  %946 = vrot.lane.b32.xlu0 %v4250_v37, %s2715_s8  ;;  %v1798_v42 = vld [vmem:[#allocation2 + $0x48] sm:$0xff]  ;;  %s2491_s25 = smul.u32 56, %s2771_s22  ;;  %s2364_s8 = scalar_lea.sflag [#allocation5], %s2836_s7 }
 0x247   : > { %1061 = vrot.lane.b32.xlu1 %v4249_v13, %s2711_s17  ;;  %s2490_s17 = smul.u32 56, %s2836_s7 }
 0x248   : > { %v3858_v36 = vpop.permute.xlu2 %1179  ;;  %v769_v11 = vpop.permute.xlu0 %768  ;;  %s2375_s26 = scalar_lea.hbm %s4144_s5, %s2491_s25 }
 0x249   : > { %v1191_v53 = vsel %vm1187_vm15, %v3683_v50, %v3858_v36  ;;  %v3865_v14 = vpop.permute.xlu1 %1420  ;;  %v780_v38 = vsel %vm4251_vm8, %v3433_v39, %v769_v11  ;;  %v1862_v57 = vld [vmem:[#allocation2 + $0x248] sm:$0xff]  ;;  %v4253_v50 = vld [vmem:[#allocation23_spill] sm:$0xff]  ;;  %s4093_s23 = scalar_lea.vmem [#allocation6], %s2490_s17  ;;  %s2379_s9 = sshll.u32 %s2375_s26, 4  ;;  %s2380_s9 = int_to_ptr.hbm [resolvable:$true] %s2379_s9 }
 0x24a   : > { %1205 = vst [vmem:[#allocation2 + $0x1d8] sm:$0xf] %v1191_v53  ;;  %v1833_v62 = vld [vmem:[#allocation2 + $0x160] sm:$0xff]  ;;  %1983 = vmatpush.msra.mxu3 %v1862_v57  ;;  %s2377_s22 = sshll.u32 %s4093_s23, 4  ;;  %s2639_s28 = sshra.s32 %s2380_s9, 4  ;;  %s2378_s22 = int_to_ptr.vmem [resolvable:$true] %s2377_s22  ;;  %s2640_s28 = int_to_ptr.hbm [resolvable:$true] %s2639_s28 }
 0x24b   : > { %1442 = vst.msk [vmem:[#allocation2 + $0x260] sm:$0xf] %vm278_vm1, %v3865_v14  ;;  %1967 = vmatpush.msra.mxu2 %v1833_v62  ;;  %v1791_v62 = vld [vmem:[#allocation2 + $0x10] sm:$0xff]  ;;  %s2641_s11 = scalar_lea.hbm %s2640_s28, 56  ;;  %p2646_p0 = scmp.lt.s32.totalorder %s2640_s28, %s4144_s5 }
 0x24c   : > { %793 = vst [vmem:[#allocation2 + $0xe8] sm:$0xf0] %v780_v38  ;;  %v1886_v38 = vld [vmem:[#allocation2 + $0x308] sm:$0xf]  ;;  %p2642_p6 = scmp.ne.s32.totalorder %s2640_s28, %s2641_s11 }
 0x24e   : > { %831 = vrot.lane.b32.xlu2 %v4252_v9, %s2717_s14  ;;  %889 = vrot.lane.b32.xlu0 %v4254_v22, %s2718_s15  ;;  %p2643_p9 = pnand %p2642_p6, %p2800_p11 }
 0x24f   : > { %1004 = vrot.lane.b32.xlu1 %v4253_v50, %s2716_s16 }
 0x250   : > { %v3875_v54 = vpop.permute.xlu2 %1241  ;;  %v3886_v17 = vpop.permute.xlu0 %1301  ;;  %p2644_p13 = pneg %p2643_p9 }
 0x251   : > { %v1253_v55 = vsel %vm1249_vm12, %v3737_v43, %v3875_v54  ;;  %v3882_v25 = vpop.permute.xlu1 %827  ;;  %v1311_v26 = vsel %vm1307_vm11, %v3655_v7, %v3886_v17  ;;  %v4255_v43 = vld [vmem:[#allocation11_spill] sm:$0xff] }
 0x252   : > { %1267 = vst [vmem:[#allocation2 + $0x1d8] sm:$0xf0] %v1253_v55  ;;  %v838_v39 = vsel %vm835_vm3, %v826_v15, %v3882_v25  ;;  %v1865_v55 = vld [vmem:[#allocation2 + $0x260] sm:$0xff] }
 0x253   : > { %851 = vst [vmem:[#allocation2 + $0x128] sm:$0xf] %v838_v39  ;;  %v1818_v34 = vld [vmem:[#allocation2 + $0xe8] sm:$0xff] }
 0x254   : > { %1324 = vst [vmem:[#allocation2 + $0x210] sm:$0xf] %v1311_v26  ;;  %1949 = vmatpush.msra.mxu1 %v1818_v34 }
 0x256   : > { %1950 = vmatpush.msra.mxu1 %v1811_v35 }
 0x257   : > { %774 = vrot.lane.b32.xlu1 %v4255_v43, %s4207_s13  ;;  %s2645_s13 = scalar_lea.hbm %s4144_s5, 112 }
 0x258   : > { %v3893_v16 = vpop.permute.xlu2 %1059  ;;  %1951 = vmatpush.msra.mxu1 %v1804_v47  ;;  %v3903_v31 = vpop.permute.xlu0 %1363  ;;  %p2647_p1 = scmp.lt.s32.totalorder %s2645_s13, %s2641_s11 }
 0x259   : > { %v1069_v56 = vsel %vm1065_vm9, %v3790_v30, %v3893_v16  ;;  %v3898_v3 = vpop.permute.xlu1 %1359  ;;  %1385 = vst.msk [vmem:[#allocation2 + $0x228] sm:$0xf0] %vm4256_vm5, %v3903_v31 }
 0x25a   : > { %1082 = vst [vmem:[#allocation2 + $0x1a0] sm:$0xf] %v1069_v56  ;;  %v1369_v7 = vsel %vm1365_vm13, %v3706_v1, %v3898_v3  ;;  %v1826_v27 = vld [vmem:[#allocation2 + $0x128] sm:$0xff]  ;;  %1952 = vmatpush.msra.mxu1 %v1797_v61  ;;  %v1848_v1 = vld [vmem:[#allocation2 + $0x1d8] sm:$0xff]  ;;  %p2648_p3 = por %p2647_p1, %p2646_p0 }
 0x25b   : > { %1382 = vst [vmem:[#allocation2 + $0x210] sm:$0xf0] %v1369_v7  ;;  %1968 = vmatpush.msra.mxu2 %v1826_v27 }
 0x25c   : > { %1953 = vmatpush.msra.mxu1 %v1790_v44  ;;  %p2649_p4 = pnand %p2648_p3, %p2644_p13 }
 0x260   : > { %v1125_v30 = vpop.permute.xlu2 %1124  ;;  %v3911_v15 = vpop.permute.xlu0 %1183  ;;  %v1858_v26 = vld [vmem:[#allocation2 + $0x228] sm:$0xff] }
 0x261   : > { %v3907_v33 = vpop.permute.xlu1 %770 }
 0x262   : > { %v781_v32 = vsel %vm4251_vm8, %v769_v11, %v3907_v33  ;;  %v1855_v45 = vld [vmem:[#allocation2 + $0x210] sm:$0xff]  ;;  %vm4258_vm8 = vcmask 277504  }
 0x263   : > { %794 = vst [vmem:[#allocation2 + $0xf0] sm:$0xf0] %v781_v32  ;;  %1984 = vmatpush.msra.mxu3 %v1855_v45 }
 0x265   : > { %1985 = vmatpush.msra.mxu3 %v1848_v1 }
 0x268   : > { %v3913_v48 = vpop.permute.xlu2 %944  ;;  %v3920_v18 = vpop.permute.xlu0 %1245 }
 0x269   : > { %v954_v58 = vsel %vm950_vm2, %v3830_v21, %v3913_v48  ;;  %v1186_v19 = vpop.permute.xlu1 %1185 }
 0x26a   : > { %967 = vst [vmem:[#allocation2 + $0x168] sm:$0xf] %v954_v58  ;;  %v1194_v63 = vsel %vm1187_vm15, %v3911_v15, %v1186_v19  ;;  %v1819_v29 = vld [vmem:[#allocation2 + $0xf0] sm:$0xff] }
 0x26b   : > { %1208 = vst.msk [vmem:[#allocation2 + $0x1f0] sm:$0xf] %vm278_vm1, %v1194_v63  ;;  %1969 = vmatpush.msra.mxu2 %v1819_v29 }
 0x26d   : > { %1970 = vmatpush.msra.mxu2 %v1812_v10  ;;  %v3994_v10 = vld [vmem:[%s4140_s1] sm:$0xff] }
 0x26f   : > { %1971 = vmatpush.msra.mxu2 %v1805_v24 }
 0x270   : > { %v1707_v52 = vpop.permute.xlu2 %1706  ;;  %v3929_v11 = vpop.permute.xlu0 %1118 }
 0x271   : > { %v1715_v21 = vsel %vm1710_vm6, %v3699_v12, %v1707_v52  ;;  %v1716_v13 = vsel %vm1710_vm6, %v1707_v52, %v3773_v8  ;;  %1972 = vmatpush.msra.mxu2 %v1798_v42  ;;  %v1248_v37 = vpop.permute.xlu1 %1247  ;;  %v1130_v57 = vsel %vm1126_vm7, %v3733_v46, %v3929_v11  ;;  %v1879_v12 = vld [vmem:[#allocation2 + $0x2d0] sm:$0xff]  ;;  %v1872_v8 = vld [vmem:[#allocation2 + $0x298] sm:$0xff]  ;;  %vm4257_vm6 = vmmov %vm4256_vm5 }
 0x272   : > { %1728 = vst [vmem:[#allocation2 + $0x2c0] sm:$0xf0] %v1715_v21  ;;  %v1256_v53 = vsel %vm1249_vm12, %v3920_v18, %v1248_v37 }
 0x273   : > { %1729 = vst [vmem:[#allocation2 + $0x2c8] sm:$0xf0] %v1716_v13  ;;  %1973 = vmatpush.msra.mxu2 %v1791_v62 }
 0x274   : > { %1270 = vst.msk [vmem:[#allocation2 + $0x1f0] sm:$0xf0] %vm4256_vm5, %v1256_v53  ;;  %vm4259_vm5 = vmmov %vm4258_vm8 }
 0x275   : > { %2470 = vmatpush.msk.msrb.mxu2 %vm1896_vm10, %v1886_v38  ;;  %1144 = vst [vmem:[#allocation2 + $0x1a0] sm:$0xf0] %v1130_v57 }
 0x277   : > { %2041 = vmatpush.msrb.mxu2 %v1879_v12  ;;  %v1806_v12 = vld [vmem:[#allocation2 + $0x88] sm:$0xff] }
 0x278   : > { %v3936_v9 = vpop.permute.xlu2 %829  ;;  %v1764_v39 = vpop.permute.xlu0 %1763 }
 0x279   : > { %2042 = vmatpush.msrb.mxu2 %v1872_v8  ;;  %v839_v50 = vsel %vm835_vm3, %v3882_v25, %v3936_v9  ;;  %v3941_v22 = vpop.permute.xlu1 %1122  ;;  %v1772_v34 = vsel %vm4258_vm8, %v3722_v59, %v1764_v39  ;;  %v1773_v35 = vsel %vm4259_vm5, %v1764_v39, %v3667_v40  ;;  %vm4262_vm8 = vcmask 293888   ;;  %v1799_v39 = vld [vmem:[#allocation2 + $0x50] sm:$0xff] }
 0x27a   : > { %852 = vst [vmem:[#allocation2 + $0x130] sm:$0xf] %v839_v50  ;;  %v1133_v46 = vsel %vm1126_vm7, %v3941_v22, %v1125_v30  ;;  %vm4263_vm5 = vmmov %vm4262_vm8 }
 0x27b   : > { %2043 = vmatpush.msrb.mxu2 %v1865_v55  ;;  %1147 = vst.msk [vmem:[#allocation2 + $0x1b8] sm:$0xf0] %vm4257_vm6, %v1133_v46  ;;  %v1851_v43 = vld [vmem:[#allocation2 + $0x1f0] sm:$0xff]  ;;  %vm4260_vm6 = vcmask 138240  }
 0x27c   : > { %1785 = vst [vmem:[#allocation2 + $0x2f8] sm:$0xf] %v1772_v34  ;;  %v1841_v25 = vld [vmem:[#allocation2 + $0x1a0] sm:$0xff] }
 0x27d   : > { %2044 = vmatpush.msrb.mxu2 %v1858_v26  ;;  %1786 = vst [vmem:[#allocation2 + $0x300] sm:$0xf] %v1773_v35  ;;  %1986 = vmatpush.msra.mxu3 %v1841_v25 }
 0x27f   : > { %2045 = vmatpush.msrb.mxu2 %v1851_v43 }
 0x280   : > { %v1592_v47 = vpop.permute.xlu2 %1591  ;;  %v3956_v59 = vpop.permute.xlu0 %1002 }
 0x281   : > { %v1600_v56 = vsel %vm1595_vm4, %v3809_v51, %v1592_v47  ;;  %v1601_v61 = vsel %vm1595_vm4, %v1592_v47, %v3811_v20  ;;  %v3954_v7 = vpop.permute.xlu1 %1063  ;;  %v1012_v40 = vsel %vm4260_vm6, %v3845_v0, %v3956_v59  ;;  %vm4261_vm4 = vcmask 228352  }
 0x282   : > { %1613 = vst [vmem:[#allocation2 + $0x288] sm:$0xf0] %v1600_v56 }
 0x283   : > { %1614 = vst [vmem:[#allocation2 + $0x290] sm:$0xf0] %v1601_v61  ;;  %v1884_v27 = vld [vmem:[#allocation2 + $0x2f8] sm:$0xf] }
 0x284   : > { %1085 = vst.msk [vmem:[#allocation2 + $0x1b8] sm:$0xf] %vm278_vm1, %v3954_v7  ;;  %2466 = vmatpush.msk.msrb.mxu0 %vm1896_vm10, %v1884_v27  ;;  %v1885_v51 = vld [vmem:[#allocation2 + $0x300] sm:$0xf] }
 0x285   : > { %1025 = vst [vmem:[#allocation2 + $0x168] sm:$0xf0] %v1012_v40  ;;  %2468 = vmatpush.msk.msrb.mxu1 %vm1896_vm10, %v1885_v51  ;;  %vm4264_vm10 = vcmask 80900   ;;  %v1816_v40 = vld [vmem:[#allocation2 + $0xd8] sm:$0xff] }
 0x286   : > { %vm4265_vm6 = vmmov %vm4264_vm10 }
 0x288   : > { %v3965_v20 = vpop.permute.xlu2 %772  ;;  %v3974_v45 = vpop.permute.xlu0 %948 }
 0x289   : > { %v782_v44 = vsel %vm4261_vm4, %v3907_v33, %v3965_v20  ;;  %v1649_v30 = vpop.permute.xlu1 %1648  ;;  %970 = vst.msk [vmem:[#allocation2 + $0x180] sm:$0xf] %vm278_vm1, %v3974_v45  ;;  %vm4266_vm4 = vcmask 883712  }
 0x28a   : > { %795 = vst [vmem:[#allocation2 + $0xf8] sm:$0xf0] %v782_v44  ;;  %v1657_v0 = vsel %vm4262_vm8, %v3756_v5, %v1649_v30  ;;  %v1658_v32 = vsel %vm4263_vm5, %v1649_v30, %v3758_v23  ;;  %2463 = vmatmul.msk.f32.vlgmr.msra.gmra.mxu2 %vm4266_vm4, %v3994_v10  ;;  %vm4267_vm8 = vmmov %vm4266_vm4  ;;  %v1802_v44 = vld [vmem:[#allocation2 + $0x68] sm:$0xff] }
 0x28b   : > { %1670 = vst [vmem:[#allocation2 + $0x2c0] sm:$0xf] %v1657_v0  ;;  %v1844_v1 = vld [vmem:[#allocation2 + $0x1b8] sm:$0xff]  ;;  %2459 = vmatmul.msk.f32.vlgmr.msra.gmra.mxu0 %vm4267_vm8, %v3994_v10  ;;  %vm4268_vm5 = vmmov %vm4266_vm4 }
 0x28c   : > { %1671 = vst [vmem:[#allocation2 + $0x2c8] sm:$0xf] %v1658_v32  ;;  %2046 = vmatpush.msrb.mxu2 %v1844_v1  ;;  %v1834_v58 = vld [vmem:[#allocation2 + $0x168] sm:$0xff]  ;;  %2461 = vmatmul.msk.f32.vlgmr.msra.gmra.mxu1 %vm4268_vm5, %v3994_v10  ;;  %v1795_v1 = vld [vmem:[#allocation2 + $0x30] sm:$0xff] }
 0x28d   : > { %1987 = vmatpush.msra.mxu3 %v1834_v58 }
 0x290   : > { %v3978_v33 = vpop.permute.xlu2 %776  ;;  %v3986_v19 = vpop.permute.xlu0 %887 }
 0x291   : > { %798 = vst.msk [vmem:[#allocation2 + $0x110] sm:$0xf0] %vm4264_vm10, %v3978_v33  ;;  %v3982_v5 = vpop.permute.xlu1 %1006  ;;  %v897_v29 = vsel %vm893_vm0, %v3822_v2, %v3986_v19  ;;  %vm4269_vm10 = vcmask 367616  }
 0x292   : > { %1028 = vst.msk [vmem:[#allocation2 + $0x180] sm:$0xf0] %vm4265_vm6, %v3982_v5  ;;  %v1877_v23 = vld [vmem:[#allocation2 + $0x2c0] sm:$0xff]  ;;  %vm4270_vm6 = vmmov %vm4269_vm10 }
 0x293   : > { %2001 = vmatpush.msrb.mxu0 %v1877_v23  ;;  %v1878_v63 = vld [vmem:[#allocation2 + $0x2c8] sm:$0xff]  ;;  %910 = vst [vmem:[#allocation2 + $0x130] sm:$0xf0] %v897_v29 }
 0x294   : > { %2021 = vmatpush.msrb.mxu1 %v1878_v63 }
 0x298   : > { %v1182_v24 = vpop.permute.xlu2 %1181  ;;  %v834_v53 = vpop.permute.xlu0 %833  ;;  %v1823_v61 = vld [vmem:[#allocation2 + $0x110] sm:$0xff] }
 0x299   : > { %v1192_v2 = vsel %vm1187_vm15, %v3858_v36, %v1182_v24  ;;  %v1193_v52 = vsel %vm1187_vm15, %v1182_v24, %v3911_v15  ;;  %v1534_v42 = vpop.permute.xlu1 %1533  ;;  %v1837_v21 = vld [vmem:[#allocation2 + $0x180] sm:$0xff]  ;;  %v1820_v36 = vld [vmem:[#allocation2 + $0xf8] sm:$0xff]  ;;  %855 = vst.msk [vmem:[#allocation2 + $0x148] sm:$0xf] %vm278_vm1, %v834_v53  ;;  %vm4271_vm1 = vcmask 80900   ;;  %vm4272_vm15 = vmmov %vm4266_vm4 }
 0x29a   : > { %1206 = vst [vmem:[#allocation2 + $0x1e0] sm:$0xf] %v1192_v2  ;;  %v1542_v13 = vsel %vm4269_vm10, %v3792_v6, %v1534_v42  ;;  %v1543_v37 = vsel %vm4270_vm6, %v1534_v42, %v3750_v28  ;;  %2047 = vmatpush.msrb.mxu2 %v1837_v21  ;;  %v1827_v62 = vld [vmem:[#allocation2 + $0x130] sm:$0xff]  ;;  %v1813_v15 = vld [vmem:[#allocation2 + $0xc0] sm:$0xff] }
 0x29b   : > { %1207 = vst [vmem:[#allocation2 + $0x1e8] sm:$0xf] %v1193_v52  ;;  %1988 = vmatpush.msra.mxu3 %v1827_v62 }
 0x29c   : > { %1555 = vst [vmem:[#allocation2 + $0x288] sm:$0xf] %v1542_v13 }
 0x29d   : > { %1556 = vst [vmem:[#allocation2 + $0x290] sm:$0xf] %v1543_v37  ;;  %1989 = vmatpush.msra.mxu3 %v1820_v36 }
 0x29f   : > { %1990 = vmatpush.msra.mxu3 %v1813_v15 }
 0x2a0   : > { %v1121_v38 = vpop.permute.xlu2 %1120  ;;  %v1419_v8 = vpop.permute.xlu0 %1418 }
 0x2a1   : > { %v1131_v6 = vsel %vm1126_vm7, %v3929_v11, %v1121_v38  ;;  %v1132_v28 = vsel %vm1126_vm7, %v1121_v38, %v3941_v22  ;;  %v4015_v57 = vpop.permute.xlu1 %891  ;;  %1991 = vmatpush.msra.mxu3 %v1806_v12  ;;  %v1427_v55 = vsel %vm1422_vm14, %v3783_v41, %v1419_v8  ;;  %v1428_v46 = vsel %vm1422_vm14, %v1419_v8, %v3865_v14  ;;  %v1792_v22 = vld [vmem:[#allocation2 + $0x18] sm:$0xff]  ;;  %v1807_v12 = vld [vmem:[#allocation2 + $0x90] sm:$0xff] }
 0x2a2   : > { %1145 = vst [vmem:[#allocation2 + $0x1a8] sm:$0xf0] %v1131_v6  ;;  %vm4273_vm14 = vcmask 375808   ;;  %v1800_v8 = vld [vmem:[#allocation2 + $0x58] sm:$0xff] }
 0x2a3   : > { %1146 = vst [vmem:[#allocation2 + $0x1b0] sm:$0xf0] %v1132_v28  ;;  %v1870_v50 = vld [vmem:[#allocation2 + $0x288] sm:$0xff]  ;;  %1992 = vmatpush.msra.mxu3 %v1799_v39  ;;  %vm4274_vm4 = vmmov %vm4273_vm14 }
 0x2a4   : > { %913 = vst.msk [vmem:[#allocation2 + $0x148] sm:$0xf0] %vm4271_vm1, %v4015_v57  ;;  %2002 = vmatpush.msrb.mxu0 %v1870_v50  ;;  %v1871_v11 = vld [vmem:[#allocation2 + $0x290] sm:$0xff]  ;;  %v1801_v50 = vld [vmem:[#allocation2 + $0x60] sm:$0xff] }
 0x2a5   : > { %2022 = vmatpush.msrb.mxu1 %v1871_v11  ;;  %1440 = vst [vmem:[#allocation2 + $0x250] sm:$0xf] %v1427_v55  ;;  %1993 = vmatpush.msra.mxu3 %v1792_v22  ;;  %v1793_v55 = vld [vmem:[#allocation2 + $0x20] sm:$0xff] }
 0x2a6   : > { %1441 = vst [vmem:[#allocation2 + $0x258] sm:$0xf] %v1428_v46  ;;  %2465 = vmatmul.msk.f32.vlgmr.msra.gmra.mxu3 %vm4272_vm15, %v3994_v10  ;;  %v1794_v46 = vld [vmem:[#allocation2 + $0x28] sm:$0xff] }
 0x2a8   : > { %v832_v26 = vpop.permute.xlu2 %831  ;;  %v1304_v43 = vpop.permute.xlu0 %1303 }
 0x2a9   : > { %v840_v41 = vsel %vm835_vm3, %v3936_v9, %v832_v26  ;;  %v841_v14 = vsel %vm835_vm3, %v832_v26, %v834_v53  ;;  %v1477_v34 = vpop.permute.xlu1 %1476  ;;  %v1312_v56 = vsel %vm1307_vm11, %v3886_v17, %v1304_v43  ;;  %v1313_v9 = vsel %vm1307_vm11, %v1304_v43, %v3839_v49  ;;  %vm4275_vm3 = vmmov %vm4268_vm5 }
 0x2aa   : > { %853 = vst [vmem:[#allocation2 + $0x138] sm:$0xf] %v840_v41  ;;  %v1485_v35 = vsel %vm4273_vm14, %v3849_v4, %v1477_v34  ;;  %v1486_v25 = vsel %vm4274_vm4, %v1477_v34, %v3803_v60  ;;  %v1809_v4 = vld [vmem:[#allocation2 + $0xa0] sm:$0xff]  ;;  %vm4276_vm11 = vcmask 138240   ;;  %v2065_v34 = vld [vmem:[%s4142_s3] sm:$0xff] }
 0x2ab   : > { %854 = vst [vmem:[#allocation2 + $0x140] sm:$0xf] %v841_v14  ;;  %v1830_v47 = vld [vmem:[#allocation2 + $0x148] sm:$0xff] }
 0x2ac   : > { %1498 = vst [vmem:[#allocation2 + $0x250] sm:$0xf0] %v1485_v35  ;;  %2048 = vmatpush.msrb.mxu2 %v1830_v47 }
 0x2ad   : > { %1499 = vst [vmem:[#allocation2 + $0x258] sm:$0xf0] %v1486_v25 }
 0x2ae   : > { %2049 = vmatpush.msrb.mxu2 %v1823_v61  ;;  %1325 = vst [vmem:[#allocation2 + $0x218] sm:$0xf] %v1312_v56 }
 0x2af   : > { %1326 = vst [vmem:[#allocation2 + $0x220] sm:$0xf] %v1313_v9 }
 0x2b0   : > { %2050 = vmatpush.msrb.mxu2 %v1816_v40  ;;  %v1244_v51 = vpop.permute.xlu0 %1243 }
 0x2b1   : > { %v1362_v60 = vpop.permute.xlu1 %1361  ;;  %v1254_v30 = vsel %vm1249_vm12, %v3875_v54, %v1244_v51  ;;  %v1255_v0 = vsel %vm1249_vm12, %v1244_v51, %v3920_v18  ;;  %v1887_v54 = vld [vmem:[%s4141_s2] sm:$0xff]  ;;  %vm4277_vm12 = vmmov %vm4276_vm11 }
 0x2b2   : > { %2051 = vmatpush.msrb.mxu2 %v1809_v4  ;;  %v1370_v27 = vsel %vm1365_vm13, %v3898_v3, %v1362_v60  ;;  %v1371_v17 = vsel %vm1365_vm13, %v1362_v60, %v3903_v31  ;;  %1268 = vst [vmem:[#allocation2 + $0x1e0] sm:$0xf0] %v1254_v30  ;;  %v2719_v3 = vmov 0   ;;  %vm4278_vm13 = vcmask 228352  }
 0x2b3   : > { %1383 = vst [vmem:[#allocation2 + $0x218] sm:$0xf0] %v1370_v27  ;;  %v1863_v49 = vld [vmem:[#allocation2 + $0x250] sm:$0xff]  ;;  %2565 = vset.pattern.permute.xlu2 %v2719_v3  ;;  %2566 = vset.pattern.permute.xlu0 %v2719_v3 }
 0x2b4   : > { %1384 = vst [vmem:[#allocation2 + $0x220] sm:$0xf0] %v1371_v17  ;;  %2052 = vmatpush.msrb.mxu2 %v1802_v44  ;;  %2003 = vmatpush.msrb.mxu0 %v1863_v49  ;;  %v1864_v32 = vld [vmem:[#allocation2 + $0x258] sm:$0xff] }
 0x2b5   : > { %2023 = vmatpush.msrb.mxu1 %v1864_v32  ;;  %1269 = vst [vmem:[#allocation2 + $0x1e8] sm:$0xf0] %v1255_v0  ;;  %1890 = vperm.xlu2 %2565, %v1887_v54  }
 0x2b6   : > { %2053 = vmatpush.msrb.mxu2 %v1795_v1 }
 0x2b7   : > { %2471 = vmatmul.msk.f32.vlgmr.msrb.gmra.mxu2 %vm4275_vm3, %v3994_v10 }
 0x2b8   : > { %v947_v63 = vpop.permute.xlu0 %946 }
 0x2b9   : > { %v1062_v31 = vpop.permute.xlu1 %1061  ;;  %v955_v24 = vsel %vm950_vm2, %v3913_v48, %v947_v63  ;;  %v956_v2 = vsel %vm950_vm2, %v947_v63, %v3974_v45  ;;  %v1849_v52 = vld [vmem:[#allocation2 + $0x1e0] sm:$0xff]  ;;  %vm4279_vm2 = vmmov %vm4278_vm13 }
 0x2ba   : > { %v1070_v18 = vsel %vm1065_vm9, %v3893_v16, %v1062_v31  ;;  %v1071_v58 = vsel %vm1065_vm9, %v1062_v31, %v3954_v7  ;;  %v1856_v23 = vld [vmem:[#allocation2 + $0x218] sm:$0xff]  ;;  %968 = vst [vmem:[#allocation2 + $0x170] sm:$0xf] %v955_v24 }
 0x2bb   : > { %1083 = vst [vmem:[#allocation2 + $0x1a8] sm:$0xf] %v1070_v18  ;;  %2004 = vmatpush.msrb.mxu0 %v1856_v23  ;;  %v1857_v29 = vld [vmem:[#allocation2 + $0x220] sm:$0xff] }
 0x2bc   : > { %1084 = vst [vmem:[#allocation2 + $0x1b0] sm:$0xf] %v1071_v58  ;;  %2024 = vmatpush.msrb.mxu1 %v1857_v29  ;;  %v1850_v16 = vld [vmem:[#allocation2 + $0x1e8] sm:$0xff] }
 0x2bd   : > { %2005 = vmatpush.msrb.mxu0 %v1849_v52  ;;  %969 = vst [vmem:[#allocation2 + $0x178] sm:$0xf] %v956_v2 }
 0x2be   : > { %2025 = vmatpush.msrb.mxu1 %v1850_v16 }
 0x2c0   : > { %v890_v48 = vpop.permute.xlu0 %889 }
 0x2c1   : > { %v1005_v7 = vpop.permute.xlu1 %1004  ;;  %v898_v37 = vsel %vm893_vm0, %v3986_v19, %v890_v48  ;;  %v899_v53 = vsel %vm893_vm0, %v890_v48, %v4015_v57  ;;  %v1814_v57 = vld [vmem:[#allocation2 + $0xc8] sm:$0xff]  ;;  %vm4280_vm0 = vmmov %vm4275_vm3 }
 0x2c2   : > { %v1013_v42 = vsel %vm4276_vm11, %v3956_v59, %v1005_v7  ;;  %v1014_v21 = vsel %vm4277_vm12, %v1005_v7, %v3982_v5  ;;  %v1842_v13 = vld [vmem:[#allocation2 + $0x1a8] sm:$0xff]  ;;  %911 = vst [vmem:[#allocation2 + $0x138] sm:$0xf0] %v898_v37  ;;  %vm4281_vm9 = vmmov %vm4280_vm0 }
 0x2c3   : > { %1026 = vst [vmem:[#allocation2 + $0x170] sm:$0xf0] %v1013_v42  ;;  %2006 = vmatpush.msrb.mxu0 %v1842_v13  ;;  %v1843_v45 = vld [vmem:[#allocation2 + $0x1b0] sm:$0xff] }
 0x2c4   : > { %1027 = vst [vmem:[#allocation2 + $0x178] sm:$0xf0] %v1014_v21  ;;  %2026 = vmatpush.msrb.mxu1 %v1843_v45 }
 0x2c5   : > { %912 = vst [vmem:[#allocation2 + $0x140] sm:$0xf0] %v899_v53 }
 0x2c9   : > { %v775_v62 = vpop.permute.xlu1 %774  ;;  %v1828_v19 = vld [vmem:[#allocation2 + $0x138] sm:$0xff] }
 0x2ca   : > { %v783_v59 = vsel %vm4278_vm13, %v3965_v20, %v775_v62  ;;  %v784_v5 = vsel %vm4279_vm2, %v775_v62, %v3978_v33  ;;  %v1835_v36 = vld [vmem:[#allocation2 + $0x170] sm:$0xff]  ;;  %v1808_v33 = vld [vmem:[#allocation2 + $0x98] sm:$0xff] }
 0x2cb   : > { %796 = vst [vmem:[#allocation2 + $0x100] sm:$0xf0] %v783_v59  ;;  %2007 = vmatpush.msrb.mxu0 %v1835_v36  ;;  %v1836_v15 = vld [vmem:[#allocation2 + $0x178] sm:$0xff]  ;;  %v1815_v20 = vld [vmem:[#allocation2 + $0xd0] sm:$0xff] }
 0x2cc   : > { %797 = vst [vmem:[#allocation2 + $0x108] sm:$0xf0] %v784_v5  ;;  %2027 = vmatpush.msrb.mxu1 %v1836_v15  ;;  %v1829_v38 = vld [vmem:[#allocation2 + $0x140] sm:$0xff] }
 0x2cd   : > { %2008 = vmatpush.msrb.mxu0 %v1828_v19 }
 0x2ce   : > { %2028 = vmatpush.msrb.mxu1 %v1829_v38 }
 0x2d2   : > { %v1821_v6 = vld [vmem:[#allocation2 + $0x100] sm:$0xff] }
 0x2d3   : > { %2009 = vmatpush.msrb.mxu0 %v1821_v6  ;;  %v1822_v28 = vld [vmem:[#allocation2 + $0x108] sm:$0xff] }
 0x2d4   : > { %2029 = vmatpush.msrb.mxu1 %v1822_v28 }
 0x2d5   : > { %2010 = vmatpush.msrb.mxu0 %v1814_v57 }
 0x2d6   : > { %2030 = vmatpush.msrb.mxu1 %v1815_v20 }
 0x2d7   : > { %2011 = vmatpush.msrb.mxu0 %v1807_v12 }
 0x2d8   : > { %2031 = vmatpush.msrb.mxu1 %v1808_v33 }
 0x2d9   : > { %2012 = vmatpush.msrb.mxu0 %v1800_v8 }
 0x2da   : > { %2032 = vmatpush.msrb.mxu1 %v1801_v50 }
 0x2db   : > { %2013 = vmatpush.msrb.mxu0 %v1793_v55 }
 0x2dc   : > { %2033 = vmatpush.msrb.mxu1 %v1794_v46  ;;  %2467 = vmatmul.msk.f32.vlgmr.msrb.gmra.mxu0 %vm4280_vm0, %v3994_v10 }
 0x2dd   : > { %2469 = vmatmul.msk.f32.vlgmr.msrb.gmra.mxu1 %vm4281_vm9, %v3994_v10  ;;  %v2066_v10 = vld [vmem:[%s4143_s4] sm:$0xff] }
 0x2de   : > { %2069 = vperm.xlu0 %2566, %v2066_v10  }
 0x308   : > { %v1935_v11 = vpop.f32.mrf.mxu0 }
 0x309   : > { %v1955_v26 = vpop.f32.mrf.mxu1 }
 0x30d   : > { %v1975_v25 = vpop.f32.mrf.mxu2 }
 0x30f   : > { %v1891_v39 = vpop.permute.xlu2 %1890 }
 0x310   : > { %v1936_v22 = vadd.f32 %v1935_v11, %v1891_v39  ;;  %v1956_v41 = vadd.f32 %v1955_v26, %v1891_v39  ;;  %v1976_v43 = vadd.f32 %v1975_v25, %v1891_v39 }
 0x312   : > { %v2058_v14 = vmax.f32 %v1936_v22, 0.0  ;;  %v2059_v35 = vmax.f32 %v1956_v41, 0.0  ;;  %v2060_v47 = vmax.f32 %v1976_v43, 0.0 }
 0x314   : > { %2090 = vmatpush.msrb.mxu3 %v2058_v14 }
 0x315   : > { %2472 = vmatmul.msk.f32.vlgmr.msrb.gmra.mxu3 %vm1126_vm7, %v2065_v34 }
 0x316   : > { %2110 = vmatpush.msra.mxu3 %v2059_v35 }
 0x318   : > { %2130 = vmatpush.msrb.mxu3 %v2060_v47 }
 0x31d   : > { %2473 = vmatmul.msk.f32.vlgmr.msra.gmra.mxu3 %vm1126_vm7, %v2065_v34 }
 0x325   : > { %2474 = vmatmul.msk.f32.vlgmr.msrb.gmra.mxu3 %vm1126_vm7, %v2065_v34 }
 0x329   : > { %v1995_v56 = vpop.f32.mrf.mxu3 }
 0x32a   : > { %v1996_v9 = vadd.f32 %v1995_v56, %v1891_v39 }
 0x32c   : > { %v2061_v61 = vmax.f32 %v1996_v9, 0.0 }
 0x32e   : > { %2150 = vmatpush.msra.mxu3 %v2061_v61 }
 0x32f   : > { %2475 = vmatmul.msk.f32.vlgmr.msra.gmra.mxu3 %vm1126_vm7, %v2065_v34 }
 0x33a   : > { %v2055_v40 = vpop.f32.mrf.mxu2 }
 0x33b   : > { %v2056_v4 = vadd.f32 %v2055_v40, %v1891_v39 }
 0x33d   : > { %v2064_v60 = vmax.f32 %v2056_v4, 0.0 }
 0x33f   : > { %2210 = vmatpush.msra.mxu2 %v2064_v60 }
 0x340   : > { %2478 = vmatmul.msk.f32.vlgmr.msra.gmra.mxu2 %vm1126_vm7, %v2065_v34 }
 0x350   : > { %v4086_v0 = vpop.permute.xlu0 %2069 }
 0x359   : > { %v2015_v27 = vpop.f32.mrf.mxu0 }
 0x35a   : > { %v2016_v17 = vadd.f32 %v2015_v27, %v1891_v39  ;;  %v2035_v51 = vpop.f32.mrf.mxu1 }
 0x35b   : > { %v2036_v44 = vadd.f32 %v2035_v51, %v1891_v39 }
 0x35c   : > { %v2062_v49 = vmax.f32 %v2016_v17, 0.0 }
 0x35d   : > { %v2063_v30 = vmax.f32 %v2036_v44, 0.0 }
 0x35e   : > { %2170 = vmatpush.msra.mxu0 %v2062_v49 }
 0x35f   : > { %2190 = vmatpush.msra.mxu1 %v2063_v30  ;;  %2476 = vmatmul.msk.f32.vlgmr.msra.gmra.mxu0 %vm1126_vm7, %v2065_v34 }
 0x360   : > { %2477 = vmatmul.msk.f32.vlgmr.msra.gmra.mxu1 %vm1126_vm7, %v2065_v34 }
 0x398   : > { %v2092_v32 = vpop.f32.mrf.mxu3 }
 0x399   : > { %v2093_v1 = vadd.f32 %v2092_v32, %v4086_v0 }
 0x39b   : > { %v2479_v3 = vmul.f32 -1.442695, %v2093_v1 }
 0x39d   : > { %2567 = vpow2.f32 %v2479_v3 }
 0x3a0   : > { %v2112_v54 = vpop.f32.mrf.mxu3 }
 0x3a1   : > { %v2113_v31 = vadd.f32 %v2112_v54, %v4086_v0 }
 0x3a3   : > { %v2568_v18 = vpop.eup %2567  ;;  %v2480_v58 = vmul.f32 -1.442695, %v2113_v31 }
 0x3a4   : > { %v2236_v23 = vadd.f32 1.0, %v2568_v18 }
 0x3a5   : > { %2569 = vpow2.f32 %v2480_v58 }
 0x3a6   : > { %2571 = vrcp.f32 %v2236_v23  ;;  %v2254_v42 = vand.u32 2147483648, %v2236_v23  ;;  %vm2248_vm7 = vweird.f32 %v2236_v23  ;;  %v2252_v13 = vand.u32 2147483647, %v2236_v23 }
 0x3a8   : > { %v2132_v63 = vpop.f32.mrf.mxu3  ;;  %v2255_v53 = vor.u32 1.1754944e-38, %v2254_v42  ;;  %vm2253_vm10 = vcmp.eq.f32.partialorder %v2252_v13, 8.507059e+37 }
 0x3a9   : > { %v2133_v29 = vadd.f32 %v2132_v63, %v4086_v0 }
 0x3ab   : > { %v2570_v24 = vpop.eup %2569  ;;  %v2481_v2 = vmul.f32 -1.442695, %v2133_v29 }
 0x3ac   : > { %v2572_v52 = vpop.eup %2571  ;;  %v2237_v16 = vadd.f32 1.0, %v2570_v24 }
 0x3ad   : > { %v2244_v7 = vmul.f32 %v2572_v52, %v2236_v23  ;;  %2573 = vpow2.f32 %v2481_v2  ;;  %vm2249_vm8 = vweird.f32 %v2572_v52 }
 0x3ae   : > { %2575 = vrcp.f32 %v2237_v16  ;;  %vm2250_vm5 = vmor %vm2248_vm7, %vm2249_vm8  ;;  %vm2263_vm6 = vweird.f32 %v2237_v16  ;;  %v2269_v28 = vand.u32 2147483648, %v2237_v16  ;;  %v2267_v12 = vand.u32 2147483647, %v2237_v16 }
 0x3af   : > { %v2245_v21 = vsub.f32 1.0, %v2244_v7 }
 0x3b0   : > { %v2270_v8 = vor.u32 1.1754944e-38, %v2269_v28  ;;  %vm2268_vm14 = vcmp.eq.f32.partialorder %v2267_v12, 8.507059e+37 }
 0x3b1   : > { %v2246_v45 = vmul.f32 %v2572_v52, %v2245_v21 }
 0x3b2   : > { %v2152_v48 = vpop.f32.mrf.mxu3 }
 0x3b3   : > { %v2153_v37 = vadd.f32 %v2152_v48, %v4086_v0  ;;  %v2574_v62 = vpop.eup %2573  ;;  %v2247_v59 = vadd.f32 %v2572_v52, %v2246_v45 }
 0x3b4   : > { %v2576_v36 = vpop.eup %2575  ;;  %v2238_v15 = vadd.f32 1.0, %v2574_v62 }
 0x3b5   : > { %v2482_v5 = vmul.f32 -1.442695, %v2153_v37  ;;  %v2251_v19 = vsel %vm2250_vm5, %v2572_v52, %v2247_v59  ;;  %v2259_v38 = vmul.f32 %v2576_v36, %v2237_v16  ;;  %vm2264_vm1 = vweird.f32 %v2576_v36 }
 0x3b6   : > { %v2256_v6 = vsel %vm2253_vm10, %v2255_v53, %v2251_v19  ;;  %vm2265_vm15 = vmor %vm2263_vm6, %vm2264_vm1  ;;  %vm2278_vm4 = vweird.f32 %v2238_v15  ;;  %v2284_v41 = vand.u32 2147483648, %v2238_v15  ;;  %v2282_v35 = vand.u32 2147483647, %v2238_v15 }
 0x3b7   : > { %2577 = vpow2.f32 %v2482_v5  ;;  %v2348_v57 = vadd.f32 1.0, %v2256_v6  ;;  %v2260_v20 = vsub.f32 1.0, %v2259_v38  ;;  %vm2361_vm6 = vcmask 80896  }
 0x3b8   : > { %2579 = vrcp.f32 %v2238_v15  ;;  %v2285_v10 = vor.u32 1.1754944e-38, %v2284_v41  ;;  %vm2283_vm12 = vcmp.eq.f32.partialorder %v2282_v35, 8.507059e+37 }
 0x3b9   : > { %2355 = vst [vmem:[%s4093_s23] sm:$0xff] %v2348_v57  ;;  %v2261_v33 = vmul.f32 %v2576_v36, %v2260_v20 }
 0x3bb   : > { %v2262_v55 = vadd.f32 %v2576_v36, %v2261_v33 }
 0x3bd   : > { %v2578_v50 = vpop.eup %2577  ;;  %v2266_v11 = vsel %vm2265_vm15, %v2576_v36, %v2262_v55 }
 0x3be   : > { %v2580_v46 = vpop.eup %2579  ;;  %v2239_v39 = vadd.f32 1.0, %v2578_v50  ;;  %v2271_v26 = vsel %vm2268_vm14, %v2270_v8, %v2266_v11 }
 0x3bf   : > { %v2274_v22 = vmul.f32 %v2580_v46, %v2238_v15  ;;  %v2349_v14 = vadd.f32 1.0, %v2271_v26  ;;  %vm2279_vm3 = vweird.f32 %v2580_v46 }
 0x3c0   : > { %2581 = vrcp.f32 %v2239_v39  ;;  %vm2280_vm11 = vmor %vm2278_vm4, %vm2279_vm3  ;;  %vm2293_vm13 = vweird.f32 %v2239_v39  ;;  %v2299_v27 = vand.u32 2147483648, %v2239_v39  ;;  %v2297_v44 = vand.u32 2147483647, %v2239_v39 }
 0x3c1   : > { %v2275_v34 = vsub.f32 1.0, %v2274_v22  ;;  %2356 = vst [vmem:[%s4093_s23 + $0x8] sm:$0xff] %v2349_v14 }
 0x3c2   : > { %v2300_v30 = vor.u32 1.1754944e-38, %v2299_v27  ;;  %vm2298_vm9 = vcmp.eq.f32.partialorder %v2297_v44, 8.507059e+37 }
 0x3c3   : > { %v2212_v25 = vpop.f32.mrf.mxu2  ;;  %v2276_v43 = vmul.f32 %v2580_v46, %v2275_v34 }
 0x3c4   : > { %v2213_v47 = vadd.f32 %v2212_v25, %v4086_v0 }
 0x3c5   : > { %v2277_v56 = vadd.f32 %v2580_v46, %v2276_v43 }
 0x3c6   : > { %v2485_v9 = vmul.f32 -1.442695, %v2213_v47  ;;  %v2582_v61 = vpop.eup %2581 }
 0x3c7   : > { %v2281_v40 = vsel %vm2280_vm11, %v2580_v46, %v2277_v56  ;;  %v2289_v4 = vmul.f32 %v2582_v61, %v2239_v39  ;;  %vm2294_vm2 = vweird.f32 %v2582_v61 }
 0x3c8   : > { %2583 = vpow2.f32 %v2485_v9  ;;  %v2286_v60 = vsel %vm2283_vm12, %v2285_v10, %v2281_v40  ;;  %vm2295_vm0 = vmor %vm2293_vm13, %vm2294_vm2 }
 0x3c9   : > { %v2350_v17 = vadd.f32 1.0, %v2286_v60  ;;  %v2290_v51 = vsub.f32 1.0, %v2289_v4 }
 0x3cb   : > { %2357 = vst [vmem:[%s4093_s23 + $0x10] sm:$0xff] %v2350_v17  ;;  %v2291_v49 = vmul.f32 %v2582_v61, %v2290_v51 }
 0x3cd   : > { %v2292_v1 = vadd.f32 %v2582_v61, %v2291_v49 }
 0x3ce   : > { %v2584_v32 = vpop.eup %2583 }
 0x3cf   : > { %v2242_v3 = vadd.f32 1.0, %v2584_v32  ;;  %v2296_v54 = vsel %vm2295_vm0, %v2582_v61, %v2292_v1 }
 0x3d0   : > { %v2301_v31 = vsel %vm2298_vm9, %v2300_v30, %v2296_v54 }
 0x3d1   : > { %2585 = vrcp.f32 %v2242_v3  ;;  %v2351_v18 = vadd.f32 1.0, %v2301_v31  ;;  %v2344_v63 = vand.u32 2147483648, %v2242_v3  ;;  %vm2338_vm7 = vweird.f32 %v2242_v3 }
 0x3d2   : > { %v2342_v24 = vand.u32 2147483647, %v2242_v3 }
 0x3d3   : > { %2358 = vst [vmem:[%s4093_s23 + $0x18] sm:$0xff] %v2351_v18  ;;  %v2345_v16 = vor.u32 1.1754944e-38, %v2344_v63 }
 0x3d4   : > { %vm2343_vm10 = vcmp.eq.f32.partialorder %v2342_v24, 8.507059e+37 }
 0x3d7   : > { %v2586_v58 = vpop.eup %2585 }
 0x3d8   : > { %v2334_v23 = vmul.f32 %v2586_v58, %v2242_v3  ;;  %vm2339_vm8 = vweird.f32 %v2586_v58 }
 0x3d9   : > { %vm2340_vm5 = vmor %vm2338_vm7, %vm2339_vm8 }
 0x3da   : > { %v2335_v29 = vsub.f32 1.0, %v2334_v23 }
 0x3dc   : > { %v2336_v2 = vmul.f32 %v2586_v58, %v2335_v29  ;;  %v2172_v52 = vpop.f32.mrf.mxu0 }
 0x3dd   : > { %v2173_v7 = vadd.f32 %v2172_v52, %v4086_v0  ;;  %v2192_v42 = vpop.f32.mrf.mxu1 }
 0x3de   : > { %v2337_v21 = vadd.f32 %v2586_v58, %v2336_v2  ;;  %v2193_v13 = vadd.f32 %v2192_v42, %v4086_v0 }
 0x3df   : > { %v2483_v48 = vmul.f32 -1.442695, %v2173_v7 }
 0x3e0   : > { %v2341_v45 = vsel %vm2340_vm5, %v2586_v58, %v2337_v21  ;;  %v2484_v37 = vmul.f32 -1.442695, %v2193_v13 }
 0x3e1   : > { %v2346_v53 = vsel %vm2343_vm10, %v2345_v16, %v2341_v45  ;;  %2587 = vpow2.f32 %v2483_v48 }
 0x3e2   : > { %v2354_v62 = vadd.f32 1.0, %v2346_v53  ;;  %2589 = vpow2.f32 %v2484_v37 }
 0x3e4   : > { %2362 = vst.msk [vmem:[%s4093_s23 + $0x30] sm:$0xff] %vm2361_vm6, %v2354_v62 }
 0x3e7   : > { %v2588_v59 = vpop.eup %2587 }
 0x3e8   : > { %v2590_v5 = vpop.eup %2589  ;;  %v2240_v36 = vadd.f32 1.0, %v2588_v59 }
 0x3e9   : > { %v2241_v15 = vadd.f32 1.0, %v2590_v5 }
 0x3ea   : > { %2591 = vrcp.f32 %v2240_v36  ;;  %v2314_v57 = vand.u32 2147483648, %v2240_v36  ;;  %v2312_v33 = vand.u32 2147483647, %v2240_v36  ;;  %vm2308_vm14 = vweird.f32 %v2240_v36 }
 0x3eb   : > { %2593 = vrcp.f32 %v2241_v15  ;;  %v2329_v8 = vand.u32 2147483648, %v2241_v15  ;;  %v2327_v55 = vand.u32 2147483647, %v2241_v15  ;;  %vm2323_vm3 = vweird.f32 %v2241_v15 }
 0x3ec   : > { %v2315_v39 = vor.u32 1.1754944e-38, %v2314_v57  ;;  %vm2313_vm11 = vcmp.eq.f32.partialorder %v2312_v33, 8.507059e+37 }
 0x3ed   : > { %v2330_v26 = vor.u32 1.1754944e-38, %v2329_v8  ;;  %vm2328_vm13 = vcmp.eq.f32.partialorder %v2327_v55, 8.507059e+37 }
 0x3f0   : > { %v2592_v19 = vpop.eup %2591 }
 0x3f1   : > { %v2594_v38 = vpop.eup %2593  ;;  %v2304_v6 = vmul.f32 %v2592_v19, %v2240_v36  ;;  %vm2309_vm1 = vweird.f32 %v2592_v19 }
 0x3f2   : > { %v2319_v0 = vmul.f32 %v2594_v38, %v2241_v15  ;;  %vm2324_vm15 = vweird.f32 %v2594_v38  ;;  %vm2310_vm4 = vmor %vm2308_vm14, %vm2309_vm1 }
 0x3f3   : > { %v2305_v28 = vsub.f32 1.0, %v2304_v6  ;;  %vm2325_vm12 = vmor %vm2323_vm3, %vm2324_vm15 }
 0x3f4   : > { %v2320_v20 = vsub.f32 1.0, %v2319_v0 }
 0x3f5   : > { %v2306_v12 = vmul.f32 %v2592_v19, %v2305_v28 }
 0x3f6   : > { %v2321_v50 = vmul.f32 %v2594_v38, %v2320_v20 }
 0x3f7   : > { %v2307_v46 = vadd.f32 %v2592_v19, %v2306_v12 }
 0x3f8   : > { %v2322_v11 = vadd.f32 %v2594_v38, %v2321_v50 }
 0x3f9   : > { %v2311_v22 = vsel %vm2310_vm4, %v2592_v19, %v2307_v46 }
 0x3fa   : > { %v2316_v41 = vsel %vm2313_vm11, %v2315_v39, %v2311_v22  ;;  %v2326_v14 = vsel %vm2325_vm12, %v2594_v38, %v2322_v11 }
 0x3fb   : > { %v2352_v34 = vadd.f32 1.0, %v2316_v41  ;;  %v2331_v35 = vsel %vm2328_vm13, %v2330_v26, %v2326_v14 }
 0x3fc   : > { %v2353_v25 = vadd.f32 1.0, %v2331_v35 }
 0x3fd   : > { %2359 = vst [vmem:[%s4093_s23 + $0x20] sm:$0xff] %v2352_v34 }
 0x3fe   : > { %2360 = vst [vmem:[%s4093_s23 + $0x28] sm:$0xff] %v2353_v25 }
 0x3ff   : > { %2652 = shalt.err (!%p2649_p4)
}
 0x400   : > { %2494 = dma.vmem_to_hbm [thread:$0]  (%p2800_p11), %s2378_s22, 896, %s2380_s9, %s2364_s8  }
 0x401 PF: > { %s2391_s7 = sand.u32 1, %s2679_s18   ;;  %p4282_p7 = scmp.ge.s32.totalorder %s2691_s21, 2 }
 0x402   : > { %s2392_s17 = scalar_lea.sflag [#allocation5], %s2391_s7 }
 0x403   : > { %p2501_p5 = pnand %p4282_p7, %p2804_p12 }
 0x405   : > { %p2502_p8 = pneg %p2501_p5 }
 0x407   : > { %2674 = dma.done.wait (%p2502_p8), %s2392_s17, 896  }
 0x408   : > { %2676 = vsyncadd (%p2502_p8), %s2392_s17, 4294966400  ;;  %p18_p10 = scmp.ge.s32.totalorder %s2775_s24, 4   ;;  %s4283_s18 = smov %s2683_s19 }
 0x409   : > { %s4284_s19 = smov %s2687_s20  ;;  %s4285_s20 = smov %s2787_s27 }
 0x40a   : > { %s4286_s21 = smov %s2775_s24  ;;  %20 = sbr.rel (!%p18_p10) target bundleno = 5 (0x5), region = 179 }
 0x40f   :  { %2398 = vsyncpa [#allocation4], 1 }
 0x410   :  { %2400 = vsyncpa [#allocation4 + $0x1], 1 }
 0x411   :  { %2401 = vsyncpa [#allocation5], 1 }
 0x412   :  { %2403 = vsyncpa [#allocation5 + $0x1], 1 }

</bundles_post_ra>
